<compile_context>
chip_gen: v6e
topology: v6e:2x2x1
jax: 0.10.0
libtpu: 0.0.40
codegen_flags: <defaults>
</compile_context>

<pallas_src>
import functools
import math

import jax
import jax.numpy as jnp
from jax import lax
from jax.experimental import pallas as pl
from jax.experimental.pallas import tpu as pltpu

# Accurate f32 matmuls for both the reference and the in-kernel dots (test inputs are f32).
jax.config.update("jax_default_matmul_precision", "highest")


def _dmha_kernel(q_ref, k_ref, v_ref, wqkv_ref, bqkv_ref, wo_ref, bo_ref,
                 gamma_ref, beta_ref, o_ref, *, num_heads, ln_eps):
    TB, S, E = o_ref.shape
    H = num_heads
    D = E // H
    M = TB * S
    cdt = q_ref.dtype                      # MXU operand dtype (bf16 stays bf16; f32 acc)

    # ---- fused Q/K/V projections: three (M,E)@(E,E) MXU matmuls, f32 accumulate ----
    # W_q / b_q are pre-scaled by 1/sqrt(D) in the wrapper (zero in-kernel scaling).
    xq = q_ref[...].reshape(M, E)
    xk = k_ref[...].reshape(M, E)
    xv = v_ref[...].reshape(M, E)
    qp = jnp.dot(xq, wqkv_ref[0], preferred_element_type=jnp.float32) + bqkv_ref[0]
    kp = jnp.dot(xk, wqkv_ref[1], preferred_element_type=jnp.float32) + bqkv_ref[1]
    vp = jnp.dot(xv, wqkv_ref[2], preferred_element_type=jnp.float32) + bqkv_ref[2]

    # ---- batched attention over the folded (head, batch) axis ----
    def split_heads(x):                     # (M, E) -> (H*TB, S, D), batch order (head, batch)
        heads = [x[:, h * D:(h + 1) * D].reshape(TB, S, D) for h in range(H)]
        return jnp.stack(heads, axis=0).reshape(H * TB, S, D).astype(cdt)

    qh = split_heads(qp)                    # scale already folded into W_q
    kh = split_heads(kp)
    vh = split_heads(vp)

    s = jnp.einsum("bqd,bkd->bqk", qh, kh,
                   preferred_element_type=jnp.float32)          # (H*TB, S, S)
    s = s - jnp.max(s, axis=-1, keepdims=True)
    p = jnp.exp(s)
    p = p / jnp.sum(p, axis=-1, keepdims=True)                  # exact softmax (matches torch)
    ctx = jnp.einsum("bqk,bkd->bqd", p.astype(cdt), vh,
                     preferred_element_type=jnp.float32)        # (H*TB, S, D)

    # Merge heads back to the PyTorch (row, head*D) layout and do ONE K=E output
    # projection; dynamic head_weights are pre-folded into the W_out rows
    # (valid because dropout is identity in eval mode).
    ctx = ctx.reshape(H, M, D)
    merged = jnp.concatenate([ctx[h] for h in range(H)], axis=-1).astype(cdt)   # (M, E)
    out = jnp.dot(merged, wo_ref[...], preferred_element_type=jnp.float32) + bo_ref[...]

    # ---- LayerNorm over the embedding dimension ----
    mean = jnp.mean(out, axis=-1, keepdims=True)
    cent = out - mean
    var = jnp.mean(cent * cent, axis=-1, keepdims=True)
    y = cent * lax.rsqrt(var + ln_eps) * gamma_ref[...] + beta_ref[...]

    o_ref[...] = y.reshape(TB, S, E).astype(o_ref.dtype)


def _vmem_capacity_bytes():
    """Per-TensorCore VMEM capacity (128 MiB on v5e/v6e, 64 MiB on v7x)."""
    try:
        cap = getattr(pltpu.get_tpu_info(), "vmem_capacity_bytes", None)
        if cap:
            return int(cap)
    except Exception:
        pass
    try:
        kind = jax.devices()[0].device_kind.lower()
        if "v7" in kind or "7x" in kind:
            return 64 * 2**20
        return 128 * 2**20
    except Exception:
        return 64 * 2**20                  # conservative default


def _pick_block_batch(B, S, E, H, *, budget, multi_core):
    """How many batch elements to fold into one grid step."""
    def est(tb):                            # rough per-step VMEM estimate (f32 bytes)
        m = tb * S
        io = 4 * 2 * m * E * 4              # 3 inputs + 1 output, double buffered
        interm = 14 * m * E * 4 + 3 * tb * H * S * S * 4
        weights = 2 * (4 * E * E + 8 * E) * 4
        return io + interm + weights

    tb = max(1, min(B, 1024 // max(S, 1)))  # target ~1024 projection rows per step
    if multi_core and B >= 2:
        tb = min(tb, -(-B // 2))            # >=2 grid steps only on dual-TC chips (v7x)
    while tb > 1 and est(tb) > budget:
        tb = max(1, tb // 2)
    align = max(1, 128 // max(S, 1))        # make M = TB*S a multiple of 128 when possible
    if tb > align:
        tb = (tb // align) * align
    return tb


def dynamic_multi_head_attention(query, key, value, params, *, num_heads):
    """query/key/value: (B, S, E). Returns (B, S, E) (squeezed on axis 1 if S == 1)."""
    B, S, E = query.shape
    assert E % num_heads == 0, "embedding dim must be divisible by num_heads"
    D = E // num_heads

    cap = _vmem_capacity_bytes()
    vmem_limit = int(min(96 * 2**20, max(32 * 2**20, cap - 16 * 2**20)))   # 96 MiB on v5e/v6e, 48 MiB on v7x
    budget = (vmem_limit * 2) // 3
    multi_core = cap <= 64 * 2**20          # v7x heuristic: 64 MiB/TC, 2 TCs per chip

    TB = _pick_block_batch(B, S, E, num_heads, budget=budget, multi_core=multi_core)
    G = -(-B // TB)
    Bp = G * TB

    q, k, v = query, key, value
    if Bp != B:                             # only pads when TB does not divide B
        pad = ((0, Bp - B), (0, 0), (0, 0))
        q, k, v = (jnp.pad(a, pad) for a in (q, k, v))

    inv_sqrt_d = 1.0 / math.sqrt(D)
    # nn.Linear stores (out, in); pre-transpose so the kernel does x @ W + b.
    # 1/sqrt(D) folded into W_q/b_q; head_weights folded into W_out rows (eval-mode dropout).
    wqkv = jnp.stack([params["wq"].T * inv_sqrt_d, params["wk"].T, params["wv"].T], axis=0)  # (3,E,E)
    bqkv = jnp.stack([params["bq"] * inv_sqrt_d, params["bk"], params["bv"]], axis=0)
    bqkv = bqkv.reshape(3, 1, E)
    hw_rows = jnp.repeat(params["head_weights"], D)                                          # (E,)
    wo = params["wo"].T * hw_rows[:, None]                                                   # (E,E)
    bo = params["bo"].reshape(1, E)
    gamma = params["ln_weight"].reshape(1, E)
    beta = params["ln_bias"].reshape(1, E)

    kernel = functools.partial(_dmha_kernel, num_heads=num_heads, ln_eps=1e-5)
    io_spec = pl.BlockSpec((TB, S, E), lambda b: (b, 0, 0))

    def weight_spec(shape, single_buffer):
        n = len(shape)
        idx = lambda b: (0,) * n
        if single_buffer and hasattr(pl, "Buffered"):
            try:
                # Grid-invariant operand: single buffer (halves its VMEM footprint).
                return pl.BlockSpec(shape, idx, pipeline_mode=pl.Buffered(1))
            except Exception:
                pass
        return pl.BlockSpec(shape, idx)

    def build(single_buffer_weights):
        return pl.pallas_call(
            kernel,
            out_shape=jax.ShapeDtypeStruct((Bp, S, E), query.dtype),
            grid_spec=pltpu.PrefetchScalarGridSpec(
                num_scalar_prefetch=0,
                grid=(G,),
                in_specs=[
                    io_spec, io_spec, io_spec,                       # q, k, v batch slabs
                    weight_spec((3, E, E), single_buffer_weights),   # fused Wq/Wk/Wv
                    weight_spec((3, 1, E), single_buffer_weights),   # fused biases
                    weight_spec((E, E), single_buffer_weights),      # Wo (head-weight scaled)
                    weight_spec((1, E), single_buffer_weights),      # bo
                    weight_spec((1, E), single_buffer_weights),      # LN gamma
                    weight_spec((1, E), single_buffer_weights),      # LN beta
                ],
                out_specs=pl.BlockSpec((TB, S, E), lambda b: (b, 0, 0)),
            ),
            compiler_params=pltpu.CompilerParams(
                dimension_semantics=("parallel",),
                vmem_limit_bytes=vmem_limit,
            ),
        )

    args = (q, k, v, wqkv, bqkv, wo, bo, gamma, beta)
    try:
        out = jax.block_until_ready(build(True)(*args))
    except Exception:
        # Fallback if this JAX build rejects pipeline_mode=pl.Buffered(1).
        out = jax.block_until_ready(build(False)(*args))

    out = out[:B]
    if out.shape[1] == 1:                   # mirrors torch `.squeeze(1)`
        out = out[:, 0]
    return out


def _reference(query, key, value, params, *, num_heads):
    """Pure-JAX reference mirroring the PyTorch forward (eval mode)."""
    B, S, E = query.shape
    D = E // num_heads
    lin = lambda x, w, b: x @ w.T + b
    q = lin(query, params["wq"], params["bq"]).reshape(B, S, num_heads, D).transpose(0, 2, 1, 3)
    k = lin(key, params["wk"], params["bk"]).reshape(B, S, num_heads, D).transpose(0, 2, 1, 3)
    v = lin(value, params["wv"], params["bv"]).reshape(B, S, num_heads, D).transpose(0, 2, 1, 3)
    scores = jnp.einsum("bhqd,bhkd->bhqk", q, k) / jnp.sqrt(jnp.float32(D))
    attn = jax.nn.softmax(scores, axis=-1)
    wv_ = jnp.einsum("bhqk,bhkd->bhqd", attn, v)
    wv_ = wv_ * params["head_weights"].reshape(1, num_heads, 1, 1)   # dropout = identity (eval)
    wv_ = wv_.transpose(0, 2, 1, 3).reshape(B, S, E)
    out = lin(wv_, params["wo"], params["bo"])
    mean = out.mean(-1, keepdims=True)
    var = ((out - mean) ** 2).mean(-1, keepdims=True)
    out = (out - mean) / jnp.sqrt(var + 1e-5) * params["ln_weight"] + params["ln_bias"]
    if out.shape[1] == 1:
        out = out[:, 0]
    return out


if __name__ == "__main__":
    B, S, E, H = 2, 8, 32, 4

    root = jax.random.PRNGKey(0)
    ks = jax.random.split(root, 12)

    params = {
        "wq": jax.random.normal(ks[0], (E, E), jnp.float32) * 0.1,
        "bq": jax.random.normal(ks[1], (E,), jnp.float32) * 0.1,
        "wk": jax.random.normal(ks[2], (E, E), jnp.float32) * 0.1,
        "bk": jax.random.normal(ks[3], (E,), jnp.float32) * 0.1,
        "wv": jax.random.normal(ks[4], (E, E), jnp.float32) * 0.1,
        "bv": jax.random.normal(ks[5], (E,), jnp.float32) * 0.1,
        "wo": jax.random.normal(ks[6], (E, E), jnp.float32) * 0.1,
        "bo": jax.random.normal(ks[7], (E,), jnp.float32) * 0.1,
        "head_weights": jax.random.normal(ks[8], (H,), jnp.float32) * 0.1,  # N(0, 0.1) init
        "ln_weight": jnp.ones((E,), jnp.float32),
        "ln_bias": jnp.zeros((E,), jnp.float32),
    }

    query = jax.random.normal(ks[9], (B, S, E), jnp.float32)
    key_in = jax.random.normal(ks[10], (B, S, E), jnp.float32)
    value = jax.random.normal(ks[11], (B, S, E), jnp.float32)

    out = dynamic_multi_head_attention(query, key_in, value, params, num_heads=H)
    out = jax.block_until_ready(out)

    ref = _reference(query, key_in, value, params, num_heads=H)
    if not jnp.allclose(out, ref, atol=1e-3, rtol=1e-3):
        err = float(jnp.max(jnp.abs(out - ref)))
        raise AssertionError(f"Pallas kernel output does not match reference (max abs err {err:.2e})")

    print("KERNEL_OK")
</pallas_src>

<mosaic_0001>
module attributes {stable_mosaic.version = 11 : i64} {
  func.func @_dmha_kernel(%arg0: i32, %arg1: memref<2x8x32xf32, #tpu.memory_space<vmem>>, %arg2: memref<2x8x32xf32, #tpu.memory_space<vmem>>, %arg3: memref<2x8x32xf32, #tpu.memory_space<vmem>>, %arg4: memref<3x32x32xf32, #tpu.memory_space<vmem>>, %arg5: memref<3x1x32xf32, #tpu.memory_space<vmem>>, %arg6: memref<32x32xf32, #tpu.memory_space<vmem>>, %arg7: memref<1x32xf32, #tpu.memory_space<vmem>>, %arg8: memref<1x32xf32, #tpu.memory_space<vmem>>, %arg9: memref<1x32xf32, #tpu.memory_space<vmem>>, %arg10: memref<2x8x32xf32, #tpu.memory_space<vmem>>) attributes {dimension_semantics = [#tpu.dimension_semantics<parallel>], iteration_bounds = array<i64: 1>, scalar_prefetch = 0 : i64, scratch_operands = 0 : i64, tpu.core_type = #tpu.core_type<tc>, window_params = [{transform_indices = @transform_0, window_bounds = array<i64: 2, 8, 32>}, {transform_indices = @transform_1, window_bounds = array<i64: 2, 8, 32>}, {transform_indices = @transform_2, window_bounds = array<i64: 2, 8, 32>}, {pipeline_mode = #tpu.pipeline_mode<synchronous>, transform_indices = @transform_3, window_bounds = array<i64: 3, 32, 32>}, {pipeline_mode = #tpu.pipeline_mode<synchronous>, transform_indices = @transform_4, window_bounds = array<i64: 3, 1, 32>}, {pipeline_mode = #tpu.pipeline_mode<synchronous>, transform_indices = @transform_5, window_bounds = array<i64: 32, 32>}, {pipeline_mode = #tpu.pipeline_mode<synchronous>, transform_indices = @transform_6, window_bounds = array<i64: 1, 32>}, {pipeline_mode = #tpu.pipeline_mode<synchronous>, transform_indices = @transform_7, window_bounds = array<i64: 1, 32>}, {pipeline_mode = #tpu.pipeline_mode<synchronous>, transform_indices = @transform_8, window_bounds = array<i64: 1, 32>}, {transform_indices = @transform_9, window_bounds = array<i64: 2, 8, 32>}]} {
    %c0 = arith.constant 0 : index
    %c0_0 = arith.constant 0 : index
    %c0_1 = arith.constant 0 : index
    %0 = vector.load %arg1[%c0, %c0_0, %c0_1] : memref<2x8x32xf32, #tpu.memory_space<vmem>>, vector<2x8x32xf32>
    %1 = vector.shape_cast %0 : vector<2x8x32xf32> to vector<16x32xf32>
    %c0_2 = arith.constant 0 : index
    %c0_3 = arith.constant 0 : index
    %c0_4 = arith.constant 0 : index
    %2 = vector.load %arg2[%c0_2, %c0_3, %c0_4] : memref<2x8x32xf32, #tpu.memory_space<vmem>>, vector<2x8x32xf32>
    %3 = vector.shape_cast %2 : vector<2x8x32xf32> to vector<16x32xf32>
    %c0_5 = arith.constant 0 : index
    %c0_6 = arith.constant 0 : index
    %c0_7 = arith.constant 0 : index
    %4 = vector.load %arg3[%c0_5, %c0_6, %c0_7] : memref<2x8x32xf32, #tpu.memory_space<vmem>>, vector<2x8x32xf32>
    %5 = vector.shape_cast %4 : vector<2x8x32xf32> to vector<16x32xf32>
    %c0_8 = arith.constant 0 : index
    %c0_9 = arith.constant 0 : index
    %c0_10 = arith.constant 0 : index
    %6 = vector.load %arg4[%c0_8, %c0_9, %c0_10] : memref<3x32x32xf32, #tpu.memory_space<vmem>>, vector<1x32x32xf32>
    %7 = vector.shape_cast %6 : vector<1x32x32xf32> to vector<32x32xf32>
    %cst = arith.constant dense<0.000000e+00> : vector<16x32xf32>
    %8 = tpu.matmul %1, %7, %cst {dimension_numbers = #tpu.dot_dimension_numbers<[1], [0], [0], [1], [0, 0, 1, 1], [], []>, precision = #tpu.contract_precision<fp32>} : vector<16x32xf32>, vector<32x32xf32>, vector<16x32xf32> -> vector<16x32xf32>
    %c0_11 = arith.constant 0 : index
    %c0_12 = arith.constant 0 : index
    %c0_13 = arith.constant 0 : index
    %9 = vector.load %arg5[%c0_11, %c0_12, %c0_13] : memref<3x1x32xf32, #tpu.memory_space<vmem>>, vector<1x1x32xf32>
    %10 = vector.shape_cast %9 : vector<1x1x32xf32> to vector<1x32xf32>
    %11 = vector.broadcast %10 : vector<1x32xf32> to vector<16x32xf32>
    %12 = arith.addf %8, %11 : vector<16x32xf32>
    %c1 = arith.constant 1 : index
    %c0_14 = arith.constant 0 : index
    %c0_15 = arith.constant 0 : index
    %13 = vector.load %arg4[%c1, %c0_14, %c0_15] : memref<3x32x32xf32, #tpu.memory_space<vmem>>, vector<1x32x32xf32>
    %14 = vector.shape_cast %13 : vector<1x32x32xf32> to vector<32x32xf32>
    %cst_16 = arith.constant dense<0.000000e+00> : vector<16x32xf32>
    %15 = tpu.matmul %3, %14, %cst_16 {dimension_numbers = #tpu.dot_dimension_numbers<[1], [0], [0], [1], [0, 0, 1, 1], [], []>, precision = #tpu.contract_precision<fp32>} : vector<16x32xf32>, vector<32x32xf32>, vector<16x32xf32> -> vector<16x32xf32>
    %c1_17 = arith.constant 1 : index
    %c0_18 = arith.constant 0 : index
    %c0_19 = arith.constant 0 : index
    %16 = vector.load %arg5[%c1_17, %c0_18, %c0_19] : memref<3x1x32xf32, #tpu.memory_space<vmem>>, vector<1x1x32xf32>
    %17 = vector.shape_cast %16 : vector<1x1x32xf32> to vector<1x32xf32>
    %18 = vector.broadcast %17 : vector<1x32xf32> to vector<16x32xf32>
    %19 = arith.addf %15, %18 : vector<16x32xf32>
    %c2 = arith.constant 2 : index
    %c0_20 = arith.constant 0 : index
    %c0_21 = arith.constant 0 : index
    %20 = vector.load %arg4[%c2, %c0_20, %c0_21] : memref<3x32x32xf32, #tpu.memory_space<vmem>>, vector<1x32x32xf32>
    %21 = vector.shape_cast %20 : vector<1x32x32xf32> to vector<32x32xf32>
    %cst_22 = arith.constant dense<0.000000e+00> : vector<16x32xf32>
    %22 = tpu.matmul %5, %21, %cst_22 {dimension_numbers = #tpu.dot_dimension_numbers<[1], [0], [0], [1], [0, 0, 1, 1], [], []>, precision = #tpu.contract_precision<fp32>} : vector<16x32xf32>, vector<32x32xf32>, vector<16x32xf32> -> vector<16x32xf32>
    %c2_23 = arith.constant 2 : index
    %c0_24 = arith.constant 0 : index
    %c0_25 = arith.constant 0 : index
    %23 = vector.load %arg5[%c2_23, %c0_24, %c0_25] : memref<3x1x32xf32, #tpu.memory_space<vmem>>, vector<1x1x32xf32>
    %24 = vector.shape_cast %23 : vector<1x1x32xf32> to vector<1x32xf32>
    %25 = vector.broadcast %24 : vector<1x32xf32> to vector<16x32xf32>
    %26 = arith.addf %22, %25 : vector<16x32xf32>
    %27 = vector.extract_strided_slice %12 {offsets = [0, 0], sizes = [16, 8], strides = [1, 1]} : vector<16x32xf32> to vector<16x8xf32>
    %28 = vector.shape_cast %27 : vector<16x8xf32> to vector<2x8x8xf32>
    %29 = vector.extract_strided_slice %12 {offsets = [0, 8], sizes = [16, 8], strides = [1, 1]} : vector<16x32xf32> to vector<16x8xf32>
    %30 = vector.shape_cast %29 : vector<16x8xf32> to vector<2x8x8xf32>
    %31 = vector.extract_strided_slice %12 {offsets = [0, 16], sizes = [16, 8], strides = [1, 1]} : vector<16x32xf32> to vector<16x8xf32>
    %32 = vector.shape_cast %31 : vector<16x8xf32> to vector<2x8x8xf32>
    %33 = vector.extract_strided_slice %12 {offsets = [0, 24], sizes = [16, 8], strides = [1, 1]} : vector<16x32xf32> to vector<16x8xf32>
    %34 = vector.shape_cast %33 : vector<16x8xf32> to vector<2x8x8xf32>
    %35 = vector.shape_cast %28 : vector<2x8x8xf32> to vector<1x2x8x8xf32>
    %36 = vector.shape_cast %30 : vector<2x8x8xf32> to vector<1x2x8x8xf32>
    %37 = vector.shape_cast %32 : vector<2x8x8xf32> to vector<1x2x8x8xf32>
    %38 = vector.shape_cast %34 : vector<2x8x8xf32> to vector<1x2x8x8xf32>
    %39 = tpu.concatenate %35, %36, %37, %38 in 0 : vector<1x2x8x8xf32>, vector<1x2x8x8xf32>, vector<1x2x8x8xf32>, vector<1x2x8x8xf32> -> vector<4x2x8x8xf32>
    %40 = vector.shape_cast %39 : vector<4x2x8x8xf32> to vector<8x8x8xf32>
    %41 = vector.extract_strided_slice %19 {offsets = [0, 0], sizes = [16, 8], strides = [1, 1]} : vector<16x32xf32> to vector<16x8xf32>
    %42 = vector.shape_cast %41 : vector<16x8xf32> to vector<2x8x8xf32>
    %43 = vector.extract_strided_slice %19 {offsets = [0, 8], sizes = [16, 8], strides = [1, 1]} : vector<16x32xf32> to vector<16x8xf32>
    %44 = vector.shape_cast %43 : vector<16x8xf32> to vector<2x8x8xf32>
    %45 = vector.extract_strided_slice %19 {offsets = [0, 16], sizes = [16, 8], strides = [1, 1]} : vector<16x32xf32> to vector<16x8xf32>
    %46 = vector.shape_cast %45 : vector<16x8xf32> to vector<2x8x8xf32>
    %47 = vector.extract_strided_slice %19 {offsets = [0, 24], sizes = [16, 8], strides = [1, 1]} : vector<16x32xf32> to vector<16x8xf32>
    %48 = vector.shape_cast %47 : vector<16x8xf32> to vector<2x8x8xf32>
    %49 = vector.shape_cast %42 : vector<2x8x8xf32> to vector<1x2x8x8xf32>
    %50 = vector.shape_cast %44 : vector<2x8x8xf32> to vector<1x2x8x8xf32>
    %51 = vector.shape_cast %46 : vector<2x8x8xf32> to vector<1x2x8x8xf32>
    %52 = vector.shape_cast %48 : vector<2x8x8xf32> to vector<1x2x8x8xf32>
    %53 = tpu.concatenate %49, %50, %51, %52 in 0 : vector<1x2x8x8xf32>, vector<1x2x8x8xf32>, vector<1x2x8x8xf32>, vector<1x2x8x8xf32> -> vector<4x2x8x8xf32>
    %54 = vector.shape_cast %53 : vector<4x2x8x8xf32> to vector<8x8x8xf32>
    %55 = vector.extract_strided_slice %26 {offsets = [0, 0], sizes = [16, 8], strides = [1, 1]} : vector<16x32xf32> to vector<16x8xf32>
    %56 = vector.shape_cast %55 : vector<16x8xf32> to vector<2x8x8xf32>
    %57 = vector.extract_strided_slice %26 {offsets = [0, 8], sizes = [16, 8], strides = [1, 1]} : vector<16x32xf32> to vector<16x8xf32>
    %58 = vector.shape_cast %57 : vector<16x8xf32> to vector<2x8x8xf32>
    %59 = vector.extract_strided_slice %26 {offsets = [0, 16], sizes = [16, 8], strides = [1, 1]} : vector<16x32xf32> to vector<16x8xf32>
    %60 = vector.shape_cast %59 : vector<16x8xf32> to vector<2x8x8xf32>
    %61 = vector.extract_strided_slice %26 {offsets = [0, 24], sizes = [16, 8], strides = [1, 1]} : vector<16x32xf32> to vector<16x8xf32>
    %62 = vector.shape_cast %61 : vector<16x8xf32> to vector<2x8x8xf32>
    %63 = vector.shape_cast %56 : vector<2x8x8xf32> to vector<1x2x8x8xf32>
    %64 = vector.shape_cast %58 : vector<2x8x8xf32> to vector<1x2x8x8xf32>
    %65 = vector.shape_cast %60 : vector<2x8x8xf32> to vector<1x2x8x8xf32>
    %66 = vector.shape_cast %62 : vector<2x8x8xf32> to vector<1x2x8x8xf32>
    %67 = tpu.concatenate %63, %64, %65, %66 in 0 : vector<1x2x8x8xf32>, vector<1x2x8x8xf32>, vector<1x2x8x8xf32>, vector<1x2x8x8xf32> -> vector<4x2x8x8xf32>
    %68 = vector.shape_cast %67 : vector<4x2x8x8xf32> to vector<8x8x8xf32>
    "tpu.trace_start"() <{level = 10 : i32, message = "bqd,bkd->bqk"}> : () -> ()
    %cst_26 = arith.constant dense<0.000000e+00> : vector<8x8x8xf32>
    %69 = tpu.matmul %40, %54, %cst_26 {dimension_numbers = #tpu.dot_dimension_numbers<[2], [2], [1], [1], [0, 0, 0, 1, 1, 1], [0], [0]>, precision = #tpu.contract_precision<fp32>} : vector<8x8x8xf32>, vector<8x8x8xf32>, vector<8x8x8xf32> -> vector<8x8x8xf32>
    "tpu.trace_stop"() : () -> ()
    %cst_27 = arith.constant dense<0xFF800000> : vector<8x8xf32>
    %70 = vector.multi_reduction <maximumf>, %69, %cst_27 [2] : vector<8x8x8xf32> to vector<8x8xf32>
    %71 = vector.shape_cast %70 : vector<8x8xf32> to vector<8x8x1xf32>
    %72 = vector.broadcast %71 : vector<8x8x1xf32> to vector<8x8x8xf32>
    %73 = arith.subf %69, %72 : vector<8x8x8xf32>
    %74 = math.exp %73 : vector<8x8x8xf32>
    %cst_28 = arith.constant dense<0.000000e+00> : vector<8x8xf32>
    %75 = vector.multi_reduction <add>, %74, %cst_28 [2] : vector<8x8x8xf32> to vector<8x8xf32>
    %76 = vector.shape_cast %75 : vector<8x8xf32> to vector<8x8x1xf32>
    %77 = vector.broadcast %76 : vector<8x8x1xf32> to vector<8x8x8xf32>
    %78 = arith.divf %74, %77 : vector<8x8x8xf32>
    "tpu.trace_start"() <{level = 10 : i32, message = "bqk,bkd->bqd"}> : () -> ()
    %cst_29 = arith.constant dense<0.000000e+00> : vector<8x8x8xf32>
    %79 = tpu.matmul %78, %68, %cst_29 {dimension_numbers = #tpu.dot_dimension_numbers<[2], [1], [1], [2], [0, 0, 0, 1, 1, 2], [0], [0]>, precision = #tpu.contract_precision<fp32>} : vector<8x8x8xf32>, vector<8x8x8xf32>, vector<8x8x8xf32> -> vector<8x8x8xf32>
    "tpu.trace_stop"() : () -> ()
    %80 = vector.shape_cast %79 : vector<8x8x8xf32> to vector<4x16x8xf32>
    %81 = vector.extract_strided_slice %80 {offsets = [0, 0, 0], sizes = [1, 16, 8], strides = [1, 1, 1]} : vector<4x16x8xf32> to vector<1x16x8xf32>
    %82 = vector.shape_cast %81 : vector<1x16x8xf32> to vector<16x8xf32>
    %83 = vector.extract_strided_slice %80 {offsets = [1, 0, 0], sizes = [1, 16, 8], strides = [1, 1, 1]} : vector<4x16x8xf32> to vector<1x16x8xf32>
    %84 = vector.shape_cast %83 : vector<1x16x8xf32> to vector<16x8xf32>
    %85 = vector.extract_strided_slice %80 {offsets = [2, 0, 0], sizes = [1, 16, 8], strides = [1, 1, 1]} : vector<4x16x8xf32> to vector<1x16x8xf32>
    %86 = vector.shape_cast %85 : vector<1x16x8xf32> to vector<16x8xf32>
    %87 = vector.extract_strided_slice %80 {offsets = [3, 0, 0], sizes = [1, 16, 8], strides = [1, 1, 1]} : vector<4x16x8xf32> to vector<1x16x8xf32>
    %88 = vector.shape_cast %87 : vector<1x16x8xf32> to vector<16x8xf32>
    %89 = tpu.concatenate %82, %84, %86, %88 in 1 : vector<16x8xf32>, vector<16x8xf32>, vector<16x8xf32>, vector<16x8xf32> -> vector<16x32xf32>
    %c0_30 = arith.constant 0 : index
    %c0_31 = arith.constant 0 : index
    %90 = vector.load %arg6[%c0_30, %c0_31] : memref<32x32xf32, #tpu.memory_space<vmem>>, vector<32x32xf32>
    %cst_32 = arith.constant dense<0.000000e+00> : vector<16x32xf32>
    %91 = tpu.matmul %89, %90, %cst_32 {dimension_numbers = #tpu.dot_dimension_numbers<[1], [0], [0], [1], [0, 0, 1, 1], [], []>, precision = #tpu.contract_precision<fp32>} : vector<16x32xf32>, vector<32x32xf32>, vector<16x32xf32> -> vector<16x32xf32>
    %c0_33 = arith.constant 0 : index
    %c0_34 = arith.constant 0 : index
    %92 = vector.load %arg7[%c0_33, %c0_34] : memref<1x32xf32, #tpu.memory_space<vmem>>, vector<1x32xf32>
    %93 = vector.broadcast %92 : vector<1x32xf32> to vector<16x32xf32>
    %94 = arith.addf %91, %93 : vector<16x32xf32>
    %cst_35 = arith.constant dense<0.000000e+00> : vector<16xf32>
    %95 = vector.multi_reduction <add>, %94, %cst_35 [1] : vector<16x32xf32> to vector<16xf32>
    %96 = vector.shape_cast %95 : vector<16xf32> to vector<16x1xf32>
    %cst_36 = arith.constant 3.200000e+01 : f32
    %97 = vector.broadcast %cst_36 : f32 to vector<16x1xf32>
    %98 = arith.divf %96, %97 : vector<16x1xf32>
    %99 = vector.broadcast %98 : vector<16x1xf32> to vector<16x32xf32>
    %100 = arith.subf %94, %99 : vector<16x32xf32>
    %101 = arith.mulf %100, %100 : vector<16x32xf32>
    %cst_37 = arith.constant dense<0.000000e+00> : vector<16xf32>
    %102 = vector.multi_reduction <add>, %101, %cst_37 [1] : vector<16x32xf32> to vector<16xf32>
    %103 = vector.shape_cast %102 : vector<16xf32> to vector<16x1xf32>
    %cst_38 = arith.constant 3.200000e+01 : f32
    %104 = vector.broadcast %cst_38 : f32 to vector<16x1xf32>
    %105 = arith.divf %103, %104 : vector<16x1xf32>
    %cst_39 = arith.constant 9.99999974E-6 : f32
    %106 = vector.broadcast %cst_39 : f32 to vector<16x1xf32>
    %107 = arith.addf %105, %106 : vector<16x1xf32>
    %108 = math.rsqrt %107 : vector<16x1xf32>
    %109 = vector.broadcast %108 : vector<16x1xf32> to vector<16x32xf32>
    %110 = arith.mulf %100, %109 : vector<16x32xf32>
    %c0_40 = arith.constant 0 : index
    %c0_41 = arith.constant 0 : index
    %111 = vector.load %arg8[%c0_40, %c0_41] : memref<1x32xf32, #tpu.memory_space<vmem>>, vector<1x32xf32>
    %112 = vector.broadcast %111 : vector<1x32xf32> to vector<16x32xf32>
    %113 = arith.mulf %110, %112 : vector<16x32xf32>
    %c0_42 = arith.constant 0 : index
    %c0_43 = arith.constant 0 : index
    %114 = vector.load %arg9[%c0_42, %c0_43] : memref<1x32xf32, #tpu.memory_space<vmem>>, vector<1x32xf32>
    %115 = vector.broadcast %114 : vector<1x32xf32> to vector<16x32xf32>
    %116 = arith.addf %113, %115 : vector<16x32xf32>
    %117 = vector.shape_cast %116 : vector<16x32xf32> to vector<2x8x32xf32>
    %c0_44 = arith.constant 0 : index
    %c0_45 = arith.constant 0 : index
    %c0_46 = arith.constant 0 : index
    %118 = vector.load %arg10[%c0_44, %c0_45, %c0_46] : memref<2x8x32xf32, #tpu.memory_space<vmem>>, vector<2x8x32xf32>
    tpu.vector_store %arg10[%c0_44, %c0_45, %c0_46], %117 {strides = array<i32>} : memref<2x8x32xf32, #tpu.memory_space<vmem>>, vector<2x8x32xf32>,
    return
  }
  func.func @transform_0(%arg0: i32) -> (i32, i32, i32) {
    %c0_i32 = arith.constant 0 : i32
    %c0_i32_0 = arith.constant 0 : i32
    %c0_i32_1 = arith.constant 0 : i32
    return %arg0, %c0_i32, %c0_i32_0 : i32, i32, i32
  }
  func.func @transform_1(%arg0: i32) -> (i32, i32, i32) {
    %c0_i32 = arith.constant 0 : i32
    %c0_i32_0 = arith.constant 0 : i32
    %c0_i32_1 = arith.constant 0 : i32
    return %arg0, %c0_i32, %c0_i32_0 : i32, i32, i32
  }
  func.func @transform_2(%arg0: i32) -> (i32, i32, i32) {
    %c0_i32 = arith.constant 0 : i32
    %c0_i32_0 = arith.constant 0 : i32
    %c0_i32_1 = arith.constant 0 : i32
    return %arg0, %c0_i32, %c0_i32_0 : i32, i32, i32
  }
  func.func @transform_3(%arg0: i32) -> (i32, i32, i32) {
    %c0_i32 = arith.constant 0 : i32
    %c0_i32_0 = arith.constant 0 : i32
    %c0_i32_1 = arith.constant 0 : i32
    %c0_i32_2 = arith.constant 0 : i32
    return %c0_i32, %c0_i32_0, %c0_i32_1 : i32, i32, i32
  }
  func.func @transform_4(%arg0: i32) -> (i32, i32, i32) {
    %c0_i32 = arith.constant 0 : i32
    %c0_i32_0 = arith.constant 0 : i32
    %c0_i32_1 = arith.constant 0 : i32
    %c0_i32_2 = arith.constant 0 : i32
    return %c0_i32, %c0_i32_0, %c0_i32_1 : i32, i32, i32
  }
  func.func @transform_5(%arg0: i32) -> (i32, i32) {
    %c0_i32 = arith.constant 0 : i32
    %c0_i32_0 = arith.constant 0 : i32
    %c0_i32_1 = arith.constant 0 : i32
    return %c0_i32, %c0_i32_0 : i32, i32
  }
  func.func @transform_6(%arg0: i32) -> (i32, i32) {
    %c0_i32 = arith.constant 0 : i32
    %c0_i32_0 = arith.constant 0 : i32
    %c0_i32_1 = arith.constant 0 : i32
    return %c0_i32, %c0_i32_0 : i32, i32
  }
  func.func @transform_7(%arg0: i32) -> (i32, i32) {
    %c0_i32 = arith.constant 0 : i32
    %c0_i32_0 = arith.constant 0 : i32
    %c0_i32_1 = arith.constant 0 : i32
    return %c0_i32, %c0_i32_0 : i32, i32
  }
  func.func @transform_8(%arg0: i32) -> (i32, i32) {
    %c0_i32 = arith.constant 0 : i32
    %c0_i32_0 = arith.constant 0 : i32
    %c0_i32_1 = arith.constant 0 : i32
    return %c0_i32, %c0_i32_0 : i32, i32
  }
  func.func @transform_9(%arg0: i32) -> (i32, i32, i32) {
    %c0_i32 = arith.constant 0 : i32
    %c0_i32_0 = arith.constant 0 : i32
    %c0_i32_1 = arith.constant 0 : i32
    return %arg0, %c0_i32, %c0_i32_0 : i32, i32, i32
  }
}

module attributes {stable_mosaic.version = 11 : i64} {
  func.func @_dmha_kernel(%arg0: i32, %arg1: memref<2x8x32xf32, #tpu.memory_space<vmem>>, %arg2: memref<2x8x32xf32, #tpu.memory_space<vmem>>, %arg3: memref<2x8x32xf32, #tpu.memory_space<vmem>>, %arg4: memref<3x32x32xf32, #tpu.memory_space<vmem>>, %arg5: memref<3x1x32xf32, #tpu.memory_space<vmem>>, %arg6: memref<32x32xf32, #tpu.memory_space<vmem>>, %arg7: memref<1x32xf32, #tpu.memory_space<vmem>>, %arg8: memref<1x32xf32, #tpu.memory_space<vmem>>, %arg9: memref<1x32xf32, #tpu.memory_space<vmem>>, %arg10: memref<2x8x32xf32, #tpu.memory_space<vmem>>) attributes {dimension_semantics = [#tpu.dimension_semantics<parallel>], iteration_bounds = array<i64: 1>, scalar_prefetch = 0 : i64, scratch_operands = 0 : i64, tpu.core_type = #tpu.core_type<tc>, window_params = [{transform_indices = @transform_0, window_bounds = array<i64: 2, 8, 32>}, {transform_indices = @transform_1, window_bounds = array<i64: 2, 8, 32>}, {transform_indices = @transform_2, window_bounds = array<i64: 2, 8, 32>}, {pipeline_mode = #tpu.pipeline_mode<synchronous>, transform_indices = @transform_3, window_bounds = array<i64: 3, 32, 32>}, {pipeline_mode = #tpu.pipeline_mode<synchronous>, transform_indices = @transform_4, window_bounds = array<i64: 3, 1, 32>}, {pipeline_mode = #tpu.pipeline_mode<synchronous>, transform_indices = @transform_5, window_bounds = array<i64: 32, 32>}, {pipeline_mode = #tpu.pipeline_mode<synchronous>, transform_indices = @transform_6, window_bounds = array<i64: 1, 32>}, {pipeline_mode = #tpu.pipeline_mode<synchronous>, transform_indices = @transform_7, window_bounds = array<i64: 1, 32>}, {pipeline_mode = #tpu.pipeline_mode<synchronous>, transform_indices = @transform_8, window_bounds = array<i64: 1, 32>}, {transform_indices = @transform_9, window_bounds = array<i64: 2, 8, 32>}]} {
    %c0 = arith.constant 0 : index
    %c0_0 = arith.constant 0 : index
    %c0_1 = arith.constant 0 : index
    %0 = vector.load %arg1[%c0, %c0_0, %c0_1] : memref<2x8x32xf32, #tpu.memory_space<vmem>>, vector<2x8x32xf32>
    %1 = vector.shape_cast %0 : vector<2x8x32xf32> to vector<16x32xf32>
    %c0_2 = arith.constant 0 : index
    %c0_3 = arith.constant 0 : index
    %c0_4 = arith.constant 0 : index
    %2 = vector.load %arg2[%c0_2, %c0_3, %c0_4] : memref<2x8x32xf32, #tpu.memory_space<vmem>>, vector<2x8x32xf32>
    %3 = vector.shape_cast %2 : vector<2x8x32xf32> to vector<16x32xf32>
    %c0_5 = arith.constant 0 : index
    %c0_6 = arith.constant 0 : index
    %c0_7 = arith.constant 0 : index
    %4 = vector.load %arg3[%c0_5, %c0_6, %c0_7] : memref<2x8x32xf32, #tpu.memory_space<vmem>>, vector<2x8x32xf32>
    %5 = vector.shape_cast %4 : vector<2x8x32xf32> to vector<16x32xf32>
    %c0_8 = arith.constant 0 : index
    %c0_9 = arith.constant 0 : index
    %c0_10 = arith.constant 0 : index
    %6 = vector.load %arg4[%c0_8, %c0_9, %c0_10] : memref<3x32x32xf32, #tpu.memory_space<vmem>>, vector<1x32x32xf32>
    %7 = vector.shape_cast %6 : vector<1x32x32xf32> to vector<32x32xf32>
    %cst = arith.constant dense<0.000000e+00> : vector<16x32xf32>
    %8 = tpu.matmul %1, %7, %cst {dimension_numbers = #tpu.dot_dimension_numbers<[1], [0], [0], [1], [0, 0, 1, 1], [], []>, precision = #tpu.contract_precision<fp32>} : vector<16x32xf32>, vector<32x32xf32>, vector<16x32xf32> -> vector<16x32xf32>
    %c0_11 = arith.constant 0 : index
    %c0_12 = arith.constant 0 : index
    %c0_13 = arith.constant 0 : index
    %9 = vector.load %arg5[%c0_11, %c0_12, %c0_13] : memref<3x1x32xf32, #tpu.memory_space<vmem>>, vector<1x1x32xf32>
    %10 = vector.shape_cast %9 : vector<1x1x32xf32> to vector<1x32xf32>
    %11 = vector.broadcast %10 : vector<1x32xf32> to vector<16x32xf32>
    %12 = arith.addf %8, %11 : vector<16x32xf32>
    %c1 = arith.constant 1 : index
    %c0_14 = arith.constant 0 : index
    %c0_15 = arith.constant 0 : index
    %13 = vector.load %arg4[%c1, %c0_14, %c0_15] : memref<3x32x32xf32, #tpu.memory_space<vmem>>, vector<1x32x32xf32>
    %14 = vector.shape_cast %13 : vector<1x32x32xf32> to vector<32x32xf32>
    %cst_16 = arith.constant dense<0.000000e+00> : vector<16x32xf32>
    %15 = tpu.matmul %3, %14, %cst_16 {dimension_numbers = #tpu.dot_dimension_numbers<[1], [0], [0], [1], [0, 0, 1, 1], [], []>, precision = #tpu.contract_precision<fp32>} : vector<16x32xf32>, vector<32x32xf32>, vector<16x32xf32> -> vector<16x32xf32>
    %c1_17 = arith.constant 1 : index
    %c0_18 = arith.constant 0 : index
    %c0_19 = arith.constant 0 : index
    %16 = vector.load %arg5[%c1_17, %c0_18, %c0_19] : memref<3x1x32xf32, #tpu.memory_space<vmem>>, vector<1x1x32xf32>
    %17 = vector.shape_cast %16 : vector<1x1x32xf32> to vector<1x32xf32>
    %18 = vector.broadcast %17 : vector<1x32xf32> to vector<16x32xf32>
    %19 = arith.addf %15, %18 : vector<16x32xf32>
    %c2 = arith.constant 2 : index
    %c0_20 = arith.constant 0 : index
    %c0_21 = arith.constant 0 : index
    %20 = vector.load %arg4[%c2, %c0_20, %c0_21] : memref<3x32x32xf32, #tpu.memory_space<vmem>>, vector<1x32x32xf32>
    %21 = vector.shape_cast %20 : vector<1x32x32xf32> to vector<32x32xf32>
    %cst_22 = arith.constant dense<0.000000e+00> : vector<16x32xf32>
    %22 = tpu.matmul %5, %21, %cst_22 {dimension_numbers = #tpu.dot_dimension_numbers<[1], [0], [0], [1], [0, 0, 1, 1], [], []>, precision = #tpu.contract_precision<fp32>} : vector<16x32xf32>, vector<32x32xf32>, vector<16x32xf32> -> vector<16x32xf32>
    %c2_23 = arith.constant 2 : index
    %c0_24 = arith.constant 0 : index
    %c0_25 = arith.constant 0 : index
    %23 = vector.load %arg5[%c2_23, %c0_24, %c0_25] : memref<3x1x32xf32, #tpu.memory_space<vmem>>, vector<1x1x32xf32>
    %24 = vector.shape_cast %23 : vector<1x1x32xf32> to vector<1x32xf32>
    %25 = vector.broadcast %24 : vector<1x32xf32> to vector<16x32xf32>
    %26 = arith.addf %22, %25 : vector<16x32xf32>
    %27 = vector.extract_strided_slice %12 {offsets = [0, 0], sizes = [16, 8], strides = [1, 1]} : vector<16x32xf32> to vector<16x8xf32>
    %28 = vector.shape_cast %27 : vector<16x8xf32> to vector<2x8x8xf32>
    %29 = vector.extract_strided_slice %12 {offsets = [0, 8], sizes = [16, 8], strides = [1, 1]} : vector<16x32xf32> to vector<16x8xf32>
    %30 = vector.shape_cast %29 : vector<16x8xf32> to vector<2x8x8xf32>
    %31 = vector.extract_strided_slice %12 {offsets = [0, 16], sizes = [16, 8], strides = [1, 1]} : vector<16x32xf32> to vector<16x8xf32>
    %32 = vector.shape_cast %31 : vector<16x8xf32> to vector<2x8x8xf32>
    %33 = vector.extract_strided_slice %12 {offsets = [0, 24], sizes = [16, 8], strides = [1, 1]} : vector<16x32xf32> to vector<16x8xf32>
    %34 = vector.shape_cast %33 : vector<16x8xf32> to vector<2x8x8xf32>
    %35 = vector.shape_cast %28 : vector<2x8x8xf32> to vector<1x2x8x8xf32>
    %36 = vector.shape_cast %30 : vector<2x8x8xf32> to vector<1x2x8x8xf32>
    %37 = vector.shape_cast %32 : vector<2x8x8xf32> to vector<1x2x8x8xf32>
    %38 = vector.shape_cast %34 : vector<2x8x8xf32> to vector<1x2x8x8xf32>
    %39 = tpu.concatenate %35, %36, %37, %38 in 0 : vector<1x2x8x8xf32>, vector<1x2x8x8xf32>, vector<1x2x8x8xf32>, vector<1x2x8x8xf32> -> vector<4x2x8x8xf32>
    %40 = vector.shape_cast %39 : vector<4x2x8x8xf32> to vector<8x8x8xf32>
    %41 = vector.extract_strided_slice %19 {offsets = [0, 0], sizes = [16, 8], strides = [1, 1]} : vector<16x32xf32> to vector<16x8xf32>
    %42 = vector.shape_cast %41 : vector<16x8xf32> to vector<2x8x8xf32>
    %43 = vector.extract_strided_slice %19 {offsets = [0, 8], sizes = [16, 8], strides = [1, 1]} : vector<16x32xf32> to vector<16x8xf32>
    %44 = vector.shape_cast %43 : vector<16x8xf32> to vector<2x8x8xf32>
    %45 = vector.extract_strided_slice %19 {offsets = [0, 16], sizes = [16, 8], strides = [1, 1]} : vector<16x32xf32> to vector<16x8xf32>
    %46 = vector.shape_cast %45 : vector<16x8xf32> to vector<2x8x8xf32>
    %47 = vector.extract_strided_slice %19 {offsets = [0, 24], sizes = [16, 8], strides = [1, 1]} : vector<16x32xf32> to vector<16x8xf32>
    %48 = vector.shape_cast %47 : vector<16x8xf32> to vector<2x8x8xf32>
    %49 = vector.shape_cast %42 : vector<2x8x8xf32> to vector<1x2x8x8xf32>
    %50 = vector.shape_cast %44 : vector<2x8x8xf32> to vector<1x2x8x8xf32>
    %51 = vector.shape_cast %46 : vector<2x8x8xf32> to vector<1x2x8x8xf32>
    %52 = vector.shape_cast %48 : vector<2x8x8xf32> to vector<1x2x8x8xf32>
    %53 = tpu.concatenate %49, %50, %51, %52 in 0 : vector<1x2x8x8xf32>, vector<1x2x8x8xf32>, vector<1x2x8x8xf32>, vector<1x2x8x8xf32> -> vector<4x2x8x8xf32>
    %54 = vector.shape_cast %53 : vector<4x2x8x8xf32> to vector<8x8x8xf32>
    %55 = vector.extract_strided_slice %26 {offsets = [0, 0], sizes = [16, 8], strides = [1, 1]} : vector<16x32xf32> to vector<16x8xf32>
    %56 = vector.shape_cast %55 : vector<16x8xf32> to vector<2x8x8xf32>
    %57 = vector.extract_strided_slice %26 {offsets = [0, 8], sizes = [16, 8], strides = [1, 1]} : vector<16x32xf32> to vector<16x8xf32>
    %58 = vector.shape_cast %57 : vector<16x8xf32> to vector<2x8x8xf32>
    %59 = vector.extract_strided_slice %26 {offsets = [0, 16], sizes = [16, 8], strides = [1, 1]} : vector<16x32xf32> to vector<16x8xf32>
    %60 = vector.shape_cast %59 : vector<16x8xf32> to vector<2x8x8xf32>
    %61 = vector.extract_strided_slice %26 {offsets = [0, 24], sizes = [16, 8], strides = [1, 1]} : vector<16x32xf32> to vector<16x8xf32>
    %62 = vector.shape_cast %61 : vector<16x8xf32> to vector<2x8x8xf32>
    %63 = vector.shape_cast %56 : vector<2x8x8xf32> to vector<1x2x8x8xf32>
    %64 = vector.shape_cast %58 : vector<2x8x8xf32> to vector<1x2x8x8xf32>
    %65 = vector.shape_cast %60 : vector<2x8x8xf32> to vector<1x2x8x8xf32>
    %66 = vector.shape_cast %62 : vector<2x8x8xf32> to vector<1x2x8x8xf32>
    %67 = tpu.concatenate %63, %64, %65, %66 in 0 : vector<1x2x8x8xf32>, vector<1x2x8x8xf32>, vector<1x2x8x8xf32>, vector<1x2x8x8xf32> -> vector<4x2x8x8xf32>
    %68 = vector.shape_cast %67 : vector<4x2x8x8xf32> to vector<8x8x8xf32>
    "tpu.trace_start"() <{level = 10 : i32, message = "bqd,bkd->bqk"}> : () -> ()
    %cst_26 = arith.constant dense<0.000000e+00> : vector<8x8x8xf32>
    %69 = tpu.matmul %40, %54, %cst_26 {dimension_numbers = #tpu.dot_dimension_numbers<[2], [2], [1], [1], [0, 0, 0, 1, 1, 1], [0], [0]>, precision = #tpu.contract_precision<fp32>} : vector<8x8x8xf32>, vector<8x8x8xf32>, vector<8x8x8xf32> -> vector<8x8x8xf32>
    "tpu.trace_stop"() : () -> ()
    %cst_27 = arith.constant dense<0xFF800000> : vector<8x8xf32>
    %70 = vector.multi_reduction <maximumf>, %69, %cst_27 [2] : vector<8x8x8xf32> to vector<8x8xf32>
    %71 = vector.shape_cast %70 : vector<8x8xf32> to vector<8x8x1xf32>
    %72 = vector.broadcast %71 : vector<8x8x1xf32> to vector<8x8x8xf32>
    %73 = arith.subf %69, %72 : vector<8x8x8xf32>
    %74 = math.exp %73 : vector<8x8x8xf32>
    %cst_28 = arith.constant dense<0.000000e+00> : vector<8x8xf32>
    %75 = vector.multi_reduction <add>, %74, %cst_28 [2] : vector<8x8x8xf32> to vector<8x8xf32>
    %76 = vector.shape_cast %75 : vector<8x8xf32> to vector<8x8x1xf32>
    %77 = vector.broadcast %76 : vector<8x8x1xf32> to vector<8x8x8xf32>
    %78 = arith.divf %74, %77 : vector<8x8x8xf32>
    "tpu.trace_start"() <{level = 10 : i32, message = "bqk,bkd->bqd"}> : () -> ()
    %cst_29 = arith.constant dense<0.000000e+00> : vector<8x8x8xf32>
    %79 = tpu.matmul %78, %68, %cst_29 {dimension_numbers = #tpu.dot_dimension_numbers<[2], [1], [1], [2], [0, 0, 0, 1, 1, 2], [0], [0]>, precision = #tpu.contract_precision<fp32>} : vector<8x8x8xf32>, vector<8x8x8xf32>, vector<8x8x8xf32> -> vector<8x8x8xf32>
    "tpu.trace_stop"() : () -> ()
    %80 = vector.shape_cast %79 : vector<8x8x8xf32> to vector<4x16x8xf32>
    %81 = vector.extract_strided_slice %80 {offsets = [0, 0, 0], sizes = [1, 16, 8], strides = [1, 1, 1]} : vector<4x16x8xf32> to vector<1x16x8xf32>
    %82 = vector.shape_cast %81 : vector<1x16x8xf32> to vector<16x8xf32>
    %83 = vector.extract_strided_slice %80 {offsets = [1, 0, 0], sizes = [1, 16, 8], strides = [1, 1, 1]} : vector<4x16x8xf32> to vector<1x16x8xf32>
    %84 = vector.shape_cast %83 : vector<1x16x8xf32> to vector<16x8xf32>
    %85 = vector.extract_strided_slice %80 {offsets = [2, 0, 0], sizes = [1, 16, 8], strides = [1, 1, 1]} : vector<4x16x8xf32> to vector<1x16x8xf32>
    %86 = vector.shape_cast %85 : vector<1x16x8xf32> to vector<16x8xf32>
    %87 = vector.extract_strided_slice %80 {offsets = [3, 0, 0], sizes = [1, 16, 8], strides = [1, 1, 1]} : vector<4x16x8xf32> to vector<1x16x8xf32>
    %88 = vector.shape_cast %87 : vector<1x16x8xf32> to vector<16x8xf32>
    %89 = tpu.concatenate %82, %84, %86, %88 in 1 : vector<16x8xf32>, vector<16x8xf32>, vector<16x8xf32>, vector<16x8xf32> -> vector<16x32xf32>
    %c0_30 = arith.constant 0 : index
    %c0_31 = arith.constant 0 : index
    %90 = vector.load %arg6[%c0_30, %c0_31] : memref<32x32xf32, #tpu.memory_space<vmem>>, vector<32x32xf32>
    %cst_32 = arith.constant dense<0.000000e+00> : vector<16x32xf32>
    %91 = tpu.matmul %89, %90, %cst_32 {dimension_numbers = #tpu.dot_dimension_numbers<[1], [0], [0], [1], [0, 0, 1, 1], [], []>, precision = #tpu.contract_precision<fp32>} : vector<16x32xf32>, vector<32x32xf32>, vector<16x32xf32> -> vector<16x32xf32>
    %c0_33 = arith.constant 0 : index
    %c0_34 = arith.constant 0 : index
    %92 = vector.load %arg7[%c0_33, %c0_34] : memref<1x32xf32, #tpu.memory_space<vmem>>, vector<1x32xf32>
    %93 = vector.broadcast %92 : vector<1x32xf32> to vector<16x32xf32>
    %94 = arith.addf %91, %93 : vector<16x32xf32>
    %cst_35 = arith.constant dense<0.000000e+00> : vector<16xf32>
    %95 = vector.multi_reduction <add>, %94, %cst_35 [1] : vector<16x32xf32> to vector<16xf32>
    %96 = vector.shape_cast %95 : vector<16xf32> to vector<16x1xf32>
    %cst_36 = arith.constant 3.200000e+01 : f32
    %97 = vector.broadcast %cst_36 : f32 to vector<16x1xf32>
    %98 = arith.divf %96, %97 : vector<16x1xf32>
    %99 = vector.broadcast %98 : vector<16x1xf32> to vector<16x32xf32>
    %100 = arith.subf %94, %99 : vector<16x32xf32>
    %101 = arith.mulf %100, %100 : vector<16x32xf32>
    %cst_37 = arith.constant dense<0.000000e+00> : vector<16xf32>
    %102 = vector.multi_reduction <add>, %101, %cst_37 [1] : vector<16x32xf32> to vector<16xf32>
    %103 = vector.shape_cast %102 : vector<16xf32> to vector<16x1xf32>
    %cst_38 = arith.constant 3.200000e+01 : f32
    %104 = vector.broadcast %cst_38 : f32 to vector<16x1xf32>
    %105 = arith.divf %103, %104 : vector<16x1xf32>
    %cst_39 = arith.constant 9.99999974E-6 : f32
    %106 = vector.broadcast %cst_39 : f32 to vector<16x1xf32>
    %107 = arith.addf %105, %106 : vector<16x1xf32>
    %108 = math.rsqrt %107 : vector<16x1xf32>
    %109 = vector.broadcast %108 : vector<16x1xf32> to vector<16x32xf32>
    %110 = arith.mulf %100, %109 : vector<16x32xf32>
    %c0_40 = arith.constant 0 : index
    %c0_41 = arith.constant 0 : index
    %111 = vector.load %arg8[%c0_40, %c0_41] : memref<1x32xf32, #tpu.memory_space<vmem>>, vector<1x32xf32>
    %112 = vector.broadcast %111 : vector<1x32xf32> to vector<16x32xf32>
    %113 = arith.mulf %110, %112 : vector<16x32xf32>
    %c0_42 = arith.constant 0 : index
    %c0_43 = arith.constant 0 : index
    %114 = vector.load %arg9[%c0_42, %c0_43] : memref<1x32xf32, #tpu.memory_space<vmem>>, vector<1x32xf32>
    %115 = vector.broadcast %114 : vector<1x32xf32> to vector<16x32xf32>
    %116 = arith.addf %113, %115 : vector<16x32xf32>
    %117 = vector.shape_cast %116 : vector<16x32xf32> to vector<2x8x32xf32>
    %c0_44 = arith.constant 0 : index
    %c0_45 = arith.constant 0 : index
    %c0_46 = arith.constant 0 : index
    %118 = vector.load %arg10[%c0_44, %c0_45, %c0_46] : memref<2x8x32xf32, #tpu.memory_space<vmem>>, vector<2x8x32xf32>
    tpu.vector_store %arg10[%c0_44, %c0_45, %c0_46], %117 {strides = array<i32>} : memref<2x8x32xf32, #tpu.memory_space<vmem>>, vector<2x8x32xf32>,
    return
  }
  func.func @transform_0(%arg0: i32) -> (i32, i32, i32) {
    %c0_i32 = arith.constant 0 : i32
    %c0_i32_0 = arith.constant 0 : i32
    %c0_i32_1 = arith.constant 0 : i32
    return %arg0, %c0_i32, %c0_i32_0 : i32, i32, i32
  }
  func.func @transform_1(%arg0: i32) -> (i32, i32, i32) {
    %c0_i32 = arith.constant 0 : i32
    %c0_i32_0 = arith.constant 0 : i32
    %c0_i32_1 = arith.constant 0 : i32
    return %arg0, %c0_i32, %c0_i32_0 : i32, i32, i32
  }
  func.func @transform_2(%arg0: i32) -> (i32, i32, i32) {
    %c0_i32 = arith.constant 0 : i32
    %c0_i32_0 = arith.constant 0 : i32
    %c0_i32_1 = arith.constant 0 : i32
    return %arg0, %c0_i32, %c0_i32_0 : i32, i32, i32
  }
  func.func @transform_3(%arg0: i32) -> (i32, i32, i32) {
    %c0_i32 = arith.constant 0 : i32
    %c0_i32_0 = arith.constant 0 : i32
    %c0_i32_1 = arith.constant 0 : i32
    %c0_i32_2 = arith.constant 0 : i32
    return %c0_i32, %c0_i32_0, %c0_i32_1 : i32, i32, i32
  }
  func.func @transform_4(%arg0: i32) -> (i32, i32, i32) {
    %c0_i32 = arith.constant 0 : i32
    %c0_i32_0 = arith.constant 0 : i32
    %c0_i32_1 = arith.constant 0 : i32
    %c0_i32_2 = arith.constant 0 : i32
    return %c0_i32, %c0_i32_0, %c0_i32_1 : i32, i32, i32
  }
  func.func @transform_5(%arg0: i32) -> (i32, i32) {
    %c0_i32 = arith.constant 0 : i32
    %c0_i32_0 = arith.constant 0 : i32
    %c0_i32_1 = arith.constant 0 : i32
    return %c0_i32, %c0_i32_0 : i32, i32
  }
  func.func @transform_6(%arg0: i32) -> (i32, i32) {
    %c0_i32 = arith.constant 0 : i32
    %c0_i32_0 = arith.constant 0 : i32
    %c0_i32_1 = arith.constant 0 : i32
    return %c0_i32, %c0_i32_0 : i32, i32
  }
  func.func @transform_7(%arg0: i32) -> (i32, i32) {
    %c0_i32 = arith.constant 0 : i32
    %c0_i32_0 = arith.constant 0 : i32
    %c0_i32_1 = arith.constant 0 : i32
    return %c0_i32, %c0_i32_0 : i32, i32
  }
  func.func @transform_8(%arg0: i32) -> (i32, i32) {
    %c0_i32 = arith.constant 0 : i32
    %c0_i32_0 = arith.constant 0 : i32
    %c0_i32_1 = arith.constant 0 : i32
    return %c0_i32, %c0_i32_0 : i32, i32
  }
  func.func @transform_9(%arg0: i32) -> (i32, i32, i32) {
    %c0_i32 = arith.constant 0 : i32
    %c0_i32_0 = arith.constant 0 : i32
    %c0_i32_1 = arith.constant 0 : i32
    return %arg0, %c0_i32, %c0_i32_0 : i32, i32, i32
  }
}

</mosaic_0001>

<bundles_post_ra>
// kernel: tpu_custom_call.1
= control target key start
LH: loop header
LB: loop body
LE: loop exit
PB: predicated region body
PF: predicated region fallthrough
CT: control target
= control target key end

     0   :  { %14 = vsyncpa [#allocation3], 0  ;;  %s12025_s0 = inlined_call_operand.hbm [shape: f32[2,8,32], index: 0, kind: input, shape index: {}]   ;;  %s12026_s1 = inlined_call_operand.hbm [shape: f32[2,8,32], index: 1, kind: input, shape index: {}]   ;;  %s12027_s2 = inlined_call_operand.hbm [shape: f32[2,8,32], index: 2, kind: input, shape index: {}]   ;;  %s12028_s3 = inlined_call_operand.hbm [shape: f32[3,32,32], index: 3, kind: input, shape index: {}]   ;;  %s12029_s4 = inlined_call_operand.vmem [shape: f32[3,1,32], index: 4, kind: input, shape index: {}]   ;;  %s12030_s5 = inlined_call_operand.hbm [shape: f32[32,32], index: 5, kind: input, shape index: {}]   ;;  %s12031_s6 = inlined_call_operand.vmem [shape: f32[1,32], index: 6, kind: input, shape index: {}]   ;;  %s12032_s7 = inlined_call_operand.vmem [shape: f32[1,32], index: 7, kind: input, shape index: {}]   ;;  %s12033_s8 = inlined_call_operand.vmem [shape: f32[1,32], index: 8, kind: input, shape index: {}]   ;;  %s12034_s9 = inlined_call_operand.hbm [shape: f32[2,8,32], index: 9, kind: output, shape index: {}]  }
   0x1   :  { %15 = vsyncpa [#allocation6], 0 }
   0x2   :  { %16 = vsyncpa [#allocation9], 0 }
   0x3   :  { %17 = vsyncpa [#allocation4], 0  ;;  %s10986_s30 = smov [#allocation5]   ;;  %s10987_s11 = smov [#allocation8]  }
   0x4   :  { %s35_s10 = sshll.u32 %s10986_s30, 4  ;;  %s59_s12 = sshll.u32 %s10987_s11, 4  ;;  %s36_s10 = int_to_ptr.vmem [resolvable:$true] %s35_s10  ;;  %s60_s12 = int_to_ptr.vmem [resolvable:$true] %s59_s12 }
   0x5   :  { %s10866_s13 = scalar_lea.vmem %s36_s10, 256  ;;  %p10871_p1 = scmp.lt.s32.totalorder %s36_s10, %s36_s10 }
   0x6   :  { %p10867_p0 = scmp.ne.s32.totalorder %s36_s10, %s10866_s13  ;;  %p10872_p2 = scmp.lt.s32.totalorder %s10866_s13, %s10866_s13 }
   0x8   :  { %p10873_p3 = por %p10872_p2, %p10871_p1 }
   0xa   :  { %p10874_p4 = pnand %p10873_p3, %p10867_p0 }
   0xc   :  { %10877 = shalt.err (!%p10874_p4)
}
   0xd   :  { %s10988_s14 = smov 128   ;;  %s10989_s15 = smov 8  }
   0xe   :  { %41 = dma.hbm_to_vmem [thread:$0]  %s12026_s1, 256, %s36_s10, [#allocation6], %s10988_s14, %s10988_s14, %s10989_s15  }
   0xf   :  { %s10886_s18 = scalar_lea.vmem %s60_s12, 1536  ;;  %p10891_p6 = scmp.lt.s32.totalorder %s60_s12, %s60_s12 }
  0x10   :  { %p10887_p5 = scmp.ne.s32.totalorder %s60_s12, %s10886_s18  ;;  %p10892_p7 = scmp.lt.s32.totalorder %s10886_s18, %s10886_s18 }
  0x12   :  { %p10893_p8 = por %p10892_p7, %p10891_p6 }
  0x14   :  { %p10894_p9 = pnand %p10893_p8, %p10887_p5 }
  0x16   :  { %10897 = shalt.err (!%p10894_p9)
}
  0x17   :  { %65 = dma.hbm_to_vmem [thread:$0]  %s12028_s3, 1536, %s60_s12, [#allocation9], %s10988_s14, %s10988_s14, %s10989_s15  }
  0x18   :  { %s10990_s21 = smov [#allocation2]   ;;  %s10991_s23 = smov [#allocation7]  }
  0x19   :  { %s23_s22 = sshll.u32 %s10990_s21, 4  ;;  %s47_s24 = sshll.u32 %s10991_s23, 4  ;;  %s24_s22 = int_to_ptr.vmem [resolvable:$true] %s23_s22  ;;  %s48_s24 = int_to_ptr.vmem [resolvable:$true] %s47_s24 }
  0x1a   :  { %s10906_s1 = scalar_lea.vmem %s24_s22, 256  ;;  %p10911_p11 = scmp.lt.s32.totalorder %s24_s22, %s24_s22 }
  0x1b   :  { %p10907_p10 = scmp.ne.s32.totalorder %s24_s22, %s10906_s1  ;;  %p10912_p12 = scmp.lt.s32.totalorder %s10906_s1, %s10906_s1 }
  0x1d   :  { %p10913_p13 = por %p10912_p12, %p10911_p11 }
  0x1f   :  { %p10914_p0 = pnand %p10913_p13, %p10907_p10 }
  0x21   :  { %10917 = shalt.err (!%p10914_p0)
}
  0x22   :  { %29 = dma.hbm_to_vmem [thread:$0]  %s12025_s0, 256, %s24_s22, [#allocation3], %s10988_s14, %s10988_s14, %s10989_s15  }
  0x23   :  { %s10926_s3 = scalar_lea.vmem %s48_s24, 256  ;;  %p10931_p2 = scmp.lt.s32.totalorder %s48_s24, %s48_s24 }
  0x24   :  { %p10927_p1 = scmp.ne.s32.totalorder %s48_s24, %s10926_s3  ;;  %p10932_p3 = scmp.lt.s32.totalorder %s10926_s3, %s10926_s3 }
  0x26   :  { %p10933_p4 = por %p10932_p3, %p10931_p2 }
  0x28   :  { %p10934_p5 = pnand %p10933_p4, %p10927_p1 }
  0x2a   :  { %10937 = shalt.err (!%p10934_p5)
}
  0x2b   :  { %53 = dma.hbm_to_vmem [thread:$0]  %s12027_s2, 256, %s48_s24, [#allocation6], %s10988_s14, %s10988_s14, %s10989_s15  }
  0x2c   :  { %s10992_s29 = smov [#allocation10]  }
  0x2d   :  { %s73_s30 = sshll.u32 %s10992_s29, 4  ;;  %s74_s30 = int_to_ptr.vmem [resolvable:$true] %s73_s30 }
  0x2e   :  { %s10946_s10 = scalar_lea.vmem %s74_s30, 512  ;;  %p10951_p7 = scmp.lt.s32.totalorder %s74_s30, %s74_s30 }
  0x2f   :  { %p10947_p6 = scmp.ne.s32.totalorder %s74_s30, %s10946_s10  ;;  %p10952_p8 = scmp.lt.s32.totalorder %s10946_s10, %s10946_s10 }
  0x31   :  { %p10953_p9 = por %p10952_p8, %p10951_p7 }
  0x33   :  { %p10954_p10 = pnand %p10953_p9, %p10947_p6 }
  0x35   :  { %10957 = shalt.err (!%p10954_p10)
}
  0x36   :  { %79 = dma.hbm_to_vmem [thread:$0]  %s12030_s5, 512, %s74_s30, [#allocation9], %s10988_s14, %s10988_s14, %s10989_s15  }
  0x37   :  { %10978 = dma.done.wait [#allocation3], 256  }
  0x38   :  { %10979 = vsyncadd [#allocation3], 4294967040 }
  0x39   :  { %10980 = dma.done.wait [#allocation6], 512  }
  0x3a   :  { %10981 = vsyncadd [#allocation6], 4294966784 }
  0x3b   :  { %10982 = dma.done.wait [#allocation9], 2048  }
  0x3c   :  { %10983 = vsyncadd [#allocation9], 4294965248  ;;  %vm118_vm0 = vcmask 261120   ;;  %v110_v0 = vld [vmem:[#allocation8 + $0x18] sm:$0xff]  ;;  %v109_v1 = vld [vmem:[#allocation8 + $0x10] sm:$0xff]  ;;  %vm10994_vm1 = vmmov 0  }
  0x3d   :  { %v108_v2 = vld [vmem:[#allocation8 + $0x8] sm:$0xff]  ;;  %v11081_v3 = vand.u32 4294901760, %v110_v0  ;;  %v11083_v4 = vand.u32 4294901760, %v109_v1  ;;  %v107_v6 = vld [vmem:[#allocation8] sm:$0xff]  ;;  %v101_v7 = vld [vmem:[#allocation2] sm:$0xff]  ;;  %vm1795_vm2 = vcmask 64512  }
  0x3e   :  { %v11085_v5 = vand.u32 4294901760, %v108_v2  ;;  %v102_v8 = vld [vmem:[#allocation2 + $0x8] sm:$0xff]  ;;  %v11087_v9 = vand.u32 4294901760, %v107_v6  ;;  %v120_v10 = vsel %vm118_vm0, %v101_v7, 0  ;;  %v103_v38 = vld [vmem:[#allocation5] sm:$0xff]  ;;  %v104_v40 = vld [vmem:[#allocation5 + $0x8] sm:$0xff] }
  0x3f   :  { %v123_v11 = vsel %vm118_vm0, %v102_v8, 0  ;;  %10063 = vmatprep.subr.mxu0 %v11081_v3  ;;  %v240_v12 = vsub.f32 %v110_v0, %v11081_v3  ;;  %v11093_v13 = vand.u32 4294901760, %v120_v10  ;;  %v247_v14 = vsub.f32 %v109_v1, %v11083_v4  ;;  %v657_v39 = vld [vmem:[#allocation8 + $0x38] sm:$0xff]  ;;  %v656_v41 = vld [vmem:[#allocation8 + $0x30] sm:$0xff]  ;;  %v655_v46 = vld [vmem:[#allocation8 + $0x28] sm:$0xff]  ;;  %s10995_s16 = smov 120  }
  0x40   :  { %v11096_v15 = vand.u32 4294901760, %v123_v11  ;;  %10064 = vmatpush3.msra.mxu0 %v11081_v3  ;;  %v254_v16 = vsub.f32 %v108_v2, %v11085_v5  ;;  %v261_v17 = vsub.f32 %v107_v6, %v11087_v9  ;;  %v667_v42 = vsel %vm118_vm0, %v103_v38, 0  ;;  %v654_v49 = vld [vmem:[#allocation8 + $0x20] sm:$0xff]  ;;  %s10996_s17 = smov 112   ;;  %s10997_s18 = smov 104  }
  0x41   :  { %10065 = vmatprep.subr.mxu0 %v11083_v4  ;;  %v241_v18 = vand.u32 4294901760, %v240_v12  ;;  %v11103_v19 = vsub.f32 %v120_v10, %v11093_v13  ;;  %v11105_v20 = vand.u32 4294901760, %v247_v14  ;;  %10082 = vmatprep.mubr.f32.mxu1 %v11093_v13  ;;  %v11134_v43 = vand.u32 4294901760, %v657_v39  ;;  %s10999_s21 = smov 24   ;;  %s11000_s26 = smov [#allocation11]  }
  0x42   :  { %v11108_v21 = vsub.f32 %v123_v11, %v11096_v15  ;;  %10066 = vmatpush3.msra.mxu0 %v11083_v4  ;;  %v11112_v22 = vand.u32 4294901760, %v254_v16  ;;  %v11114_v23 = vand.u32 4294901760, %v261_v17  ;;  %v670_v44 = vsel %vm118_vm0, %v104_v40, 0  ;;  %s9705_s3 = sshll.u32 %s11000_s26, 4  ;;  %s9706_s3 = int_to_ptr.vmem [resolvable:$true] %s9705_s3 }
  0x43   :  { %10067 = vmatprep.subr.mxu0 %v11085_v5  ;;  %v242_v24 = vsub.f32 %v240_v12, %v241_v18  ;;  %v196_v25 = vand.u32 4294901760, %v11103_v19  ;;  %v249_v26 = vsub.f32 %v247_v14, %v11105_v20  ;;  %v11140_v45 = vand.u32 4294901760, %v656_v41  ;;  %s10958_s27 = scalar_lea.vmem %s9706_s3, 256  ;;  %p10963_p12 = scmp.lt.s32.totalorder %s9706_s3, %s9706_s3 }
  0x44   :  { %v206_v27 = vand.u32 4294901760, %v11108_v21  ;;  %10068 = vmatpush3.msra.mxu0 %v11085_v5  ;;  %v256_v28 = vsub.f32 %v254_v16, %v11112_v22  ;;  %v263_v29 = vsub.f32 %v261_v17, %v11114_v23  ;;  %v11142_v47 = vand.u32 4294901760, %v667_v42  ;;  %p10959_p11 = scmp.ne.s32.totalorder %s9706_s3, %s10958_s27  ;;  %p10964_p13 = scmp.lt.s32.totalorder %s10958_s27, %s10958_s27 }
  0x45   :  { %10069 = vmatprep.subr.mxu0 %v11087_v9  ;;  %v243_v30 = vand.u32 4294901760, %v242_v24  ;;  %v197_v31 = vsub.f32 %v11103_v19, %v196_v25  ;;  %v250_v32 = vand.u32 4294901760, %v249_v26  ;;  %v11145_v48 = vand.u32 4294901760, %v670_v44  ;;  %v1202_v24 = vld [vmem:[#allocation8 + $0x48] sm:$0xff] }
  0x46   :  { %v207_v33 = vsub.f32 %v11108_v21, %v206_v27  ;;  %10070 = vmatpush3.msra.mxu0 %v11087_v9  ;;  %v257_v36 = vand.u32 4294901760, %v256_v28  ;;  %v264_v37 = vand.u32 4294901760, %v263_v29  ;;  %v11149_v50 = vsub.f32 %v657_v39, %v11134_v43  ;;  %p10965_p0 = por %p10964_p13, %p10963_p12 }
  0x47   :  { %10074 = vmatprep.subr.mxu1 %v243_v30  ;;  %v198_v34 = vand.u32 4294901760, %v197_v31  ;;  %10085 = vmatprep.subr.mxu0 %v240_v12  ;;  %v11153_v51 = vand.u32 4294901760, %v655_v46  ;;  %v11158_v52 = vsub.f32 %v667_v42, %v11142_v47  ;;  %v794_v53 = vsub.f32 %v656_v41, %v11140_v45 }
  0x48   :  { %v208_v35 = vand.u32 4294901760, %v207_v33  ;;  %10075 = vmatpush3.msra.mxu1 %v243_v30  ;;  %v11163_v54 = vand.u32 4294901760, %v654_v49  ;;  %v11166_v55 = vsub.f32 %v670_v44, %v11145_v48  ;;  %v11172_v56 = vand.u32 4294901760, %v11149_v50  ;;  %v1201_v30 = vld [vmem:[#allocation8 + $0x40] sm:$0xff]  ;;  %p10966_p1 = pnand %p10965_p0, %p10959_p11 }
  0x49   :  { %10071 = vmatprep.mubr.f32.mxu0 %v198_v34  ;;  %10076 = vmatprep.subr.mxu1 %v250_v32  ;;  %v801_v57 = vsub.f32 %v655_v46, %v11153_v51  ;;  %v743_v58 = vand.u32 4294901760, %v11158_v52  ;;  %v11181_v59 = vand.u32 4294901760, %v794_v53  ;;  %v11270_v26 = vand.u32 4294901760, %v1202_v24 }
  0x4a   :  { %10072 = vmatmul.mubr.f32.vlgmr.msra.gmra.mxu0 %v208_v35  ;;  %10077 = vmatpush3.msra.mxu1 %v250_v32  ;;  %v753_v60 = vand.u32 4294901760, %v11166_v55  ;;  %v808_v61 = vsub.f32 %v654_v49, %v11163_v54  ;;  %v789_v62 = vsub.f32 %v11149_v50, %v11172_v56  ;;  %v11276_v32 = vand.u32 4294901760, %v1201_v30 }
  0x4b   :  { %10086 = vmatpush3.msra.mxu0 %v240_v12  ;;  %10078 = vmatprep.subr.mxu1 %v257_v36  ;;  %v802_v63 = vand.u32 4294901760, %v801_v57  ;;  %v744_v0 = vsub.f32 %v11158_v52, %v743_v58  ;;  %v796_v1 = vsub.f32 %v794_v53, %v11181_v59  ;;  %v1204_v12 = vld [vmem:[#allocation8 + $0x58] sm:$0xff]  ;;  %vm9102_vm3 = vcmask 130048  }
  0x4c   :  { %10087 = vmatprep.subr.mxu0 %v247_v14  ;;  %10079 = vmatpush3.msra.mxu1 %v257_v36  ;;  %v754_v2 = vsub.f32 %v11166_v55, %v753_v60  ;;  %v1355_v41 = vsub.f32 %v1201_v30, %v11276_v32  ;;  %vm9105_vm4 = vcmask 195584  }
  0x4d   :  { %10088 = vmatpush3.msra.mxu0 %v247_v14  ;;  %10080 = vmatprep.subr.mxu1 %v264_v37  ;;  %v803_v6 = vsub.f32 %v801_v57, %v802_v63  ;;  %v745_v7 = vand.u32 4294901760, %v744_v0  ;;  %v797_v8 = vand.u32 4294901760, %v796_v1  ;;  %v105_v14 = vld [vmem:[#allocation7] sm:$0xff] }
  0x4e   :  { %10089 = vmatprep.subr.mxu0 %v254_v16  ;;  %10081 = vmatpush3.msra.mxu1 %v264_v37  ;;  %v755_v10 = vand.u32 4294901760, %v754_v2  ;;  %v1348_v37 = vsub.f32 %v1202_v24, %v11270_v26 }
  0x4f   :  { %10090 = vmatpush3.msra.mxu0 %v254_v16  ;;  %10083 = vmatmul.mubr.f32.vlgmr.msra.gmra.mxu1 %v11096_v15  ;;  %v804_v11 = vand.u32 4294901760, %v803_v6  ;;  %v106_v16 = vld [vmem:[#allocation7 + $0x8] sm:$0xff]  ;;  %v9721_v6 = vld [vmem:[%s12029_s4 + $0x1] ss:$0 sm:$0xff] }
  0x50   :  { %10091 = vmatprep.subr.mxu0 %v261_v17  ;;  %10096 = vmatprep.subr.mxu1 %v11081_v3 }
  0x51   :  { %10092 = vmatpush3.msra.mxu0 %v261_v17  ;;  %10093 = vmatprep.mubr.f32.mxu0 %v11103_v19  ;;  %v1203_v17 = vld [vmem:[#allocation8 + $0x50] sm:$0xff]  ;;  %v1217_v19 = vsel %vm118_vm0, %v106_v16, 0 }
  0x52   :  { %10097 = vmatpush3.msra.mxu1 %v11081_v3  ;;  %10094 = vmatmul.mubr.f32.vlgmr.msra.gmra.mxu0 %v11108_v21  ;;  %v11258_v21 = vand.u32 4294901760, %v1217_v19 }
  0x53   :  { %10098 = vmatprep.subr.mxu1 %v11083_v4  ;;  %10107 = vmatprep.subr.mxu0 %v241_v18 }
  0x54   :  { %10099 = vmatpush3.msra.mxu1 %v11083_v4  ;;  %10108 = vmatpush3.msra.mxu0 %v241_v18 }
  0x55   :  { %10100 = vmatprep.subr.mxu1 %v11085_v5  ;;  %10109 = vmatprep.subr.mxu0 %v11105_v20 }
  0x56   :  { %10101 = vmatpush3.msra.mxu1 %v11085_v5  ;;  %10110 = vmatpush3.msra.mxu0 %v11105_v20  ;;  %v11256_v20 = vand.u32 4294901760, %v1203_v17 }
  0x57   :  { %10102 = vmatprep.subr.mxu1 %v11087_v9  ;;  %10111 = vmatprep.subr.mxu0 %v11112_v22 }
  0x58   :  { %10103 = vmatpush3.msra.mxu1 %v11087_v9  ;;  %10104 = vmatprep.mubr.f32.mxu1 %v196_v25  ;;  %v11267_v25 = vsub.f32 %v1217_v19, %v11258_v21  ;;  %v1341_v29 = vsub.f32 %v1203_v17, %v11256_v20 }
  0x59   :  { %10112 = vmatpush3.msra.mxu0 %v11112_v22  ;;  %10105 = vmatmul.mubr.f32.vlgmr.msra.gmra.mxu1 %v206_v27 }
  0x5a   :  { %10113 = vmatprep.subr.mxu0 %v11114_v23  ;;  %10118 = vmatprep.subr.mxu1 %v11081_v3  ;;  %v1300_v31 = vand.u32 4294901760, %v11267_v25  ;;  %v1342_v35 = vand.u32 4294901760, %v1341_v29 }
  0x5b   :  { %10114 = vmatpush3.msra.mxu0 %v11114_v23  ;;  %10115 = vmatprep.mubr.f32.mxu0 %v11093_v13 }
  0x5c   :  { %10119 = vmatpush3.msra.mxu1 %v11081_v3  ;;  %10116 = vmatmul.mubr.f32.vlgmr.msra.gmra.mxu0 %v11096_v15  ;;  %v809_v3 = vand.u32 4294901760, %v808_v61  ;;  %v1301_v36 = vsub.f32 %v11267_v25, %v1300_v31  ;;  %v1343_v40 = vsub.f32 %v1341_v29, %v1342_v35 }
  0x5d   :  { %10120 = vmatprep.subr.mxu1 %v11083_v4  ;;  %10129 = vmatprep.subr.mxu0 %v11134_v43 }
  0x5e   :  { %10121 = vmatpush3.msra.mxu1 %v11083_v4  ;;  %10130 = vmatpush3.msra.mxu0 %v11134_v43  ;;  %v790_v4 = vand.u32 4294901760, %v789_v62  ;;  %v1302_v42 = vand.u32 4294901760, %v1301_v36  ;;  %v1344_v44 = vand.u32 4294901760, %v1343_v40 }
  0x5f   :  { %10122 = vmatprep.subr.mxu1 %v11085_v5  ;;  %10131 = vmatprep.subr.mxu0 %v11140_v45 }
  0x60   :  { %10123 = vmatpush3.msra.mxu1 %v11085_v5  ;;  %10132 = vmatpush3.msra.mxu0 %v11140_v45  ;;  %v810_v5 = vsub.f32 %v808_v61, %v809_v3 }
  0x61   :  { %10124 = vmatprep.subr.mxu1 %v11087_v9  ;;  %10133 = vmatprep.subr.mxu0 %v11153_v51 }
  0x62   :  { %10125 = vmatpush3.msra.mxu1 %v11087_v9  ;;  %10126 = vmatprep.mubr.f32.mxu1 %v11093_v13  ;;  %v811_v9 = vand.u32 4294901760, %v810_v5  ;;  %v11248_v13 = vand.u32 4294901760, %v1204_v12 }
  0x63   :  { %10134 = vmatpush3.msra.mxu0 %v11153_v51  ;;  %10127 = vmatmul.mubr.f32.vlgmr.msra.gmra.mxu1 %v11096_v15  ;;  %v1214_v15 = vsel %vm118_vm0, %v105_v14, 0 }
  0x64   :  { %10135 = vmatprep.subr.mxu0 %v11163_v54  ;;  %10140 = vmatprep.subr.mxu1 %v790_v4  ;;  %v11252_v18 = vand.u32 4294901760, %v1214_v15  ;;  %v1334_v23 = vsub.f32 %v1204_v12, %v11248_v13 }
  0x65   :  { %10136 = vmatpush3.msra.mxu0 %v11163_v54  ;;  %10141 = vmatpush3.msra.mxu1 %v790_v4 }
  0x66   :  { %10137 = vmatprep.mubr.f32.mxu0 %v745_v7  ;;  %10142 = vmatprep.subr.mxu1 %v797_v8  ;;  %v11261_v22 = vsub.f32 %v1214_v15, %v11252_v18  ;;  %v1335_v28 = vand.u32 4294901760, %v1334_v23 }
  0x67   :  { %10151 = vmatprep.subr.mxu0 %v11149_v50  ;;  %10138 = vmatmul.mubr.f32.vlgmr.msra.gmra.mxu0 %v755_v10 }
  0x68   :  { %10143 = vmatpush3.msra.mxu1 %v797_v8  ;;  %10152 = vmatpush3.msra.mxu0 %v11149_v50  ;;  %v1290_v27 = vand.u32 4294901760, %v11261_v22  ;;  %v1336_v34 = vsub.f32 %v1334_v23, %v1335_v28  ;;  %v10993_v50 = vmov 0.0  }
  0x69   :  { %10144 = vmatprep.subr.mxu1 %v804_v11  ;;  %10153 = vmatprep.subr.mxu0 %v794_v53 }
  0x6a   :  { %10145 = vmatpush3.msra.mxu1 %v804_v11  ;;  %10154 = vmatpush3.msra.mxu0 %v794_v53  ;;  %v1291_v33 = vsub.f32 %v11261_v22, %v1290_v27  ;;  %v1337_v39 = vand.u32 4294901760, %v1336_v34 }
  0x6b   :  { %10146 = vmatprep.subr.mxu1 %v811_v9  ;;  %10155 = vmatprep.subr.mxu0 %v801_v57 }
  0x6c   :  { %10147 = vmatpush3.msra.mxu1 %v811_v9  ;;  %10148 = vmatprep.mubr.f32.mxu1 %v11142_v47  ;;  %v1292_v38 = vand.u32 4294901760, %v1291_v33 }
  0x6d   :  { %10156 = vmatpush3.msra.mxu0 %v801_v57  ;;  %10149 = vmatmul.mubr.f32.vlgmr.msra.gmra.mxu1 %v11145_v48 }
  0x6e   :  { %10157 = vmatprep.subr.mxu0 %v808_v61  ;;  %10162 = vmatprep.subr.mxu1 %v11134_v43 }
  0x6f   :  { %10158 = vmatpush3.msra.mxu0 %v808_v61  ;;  %10159 = vmatprep.mubr.f32.mxu0 %v11158_v52 }
  0x70   :  { %10163 = vmatpush3.msra.mxu1 %v11134_v43  ;;  %10160 = vmatmul.mubr.f32.vlgmr.msra.gmra.mxu0 %v11166_v55 }
  0x71   :  { %10164 = vmatprep.subr.mxu1 %v11140_v45  ;;  %10173 = vmatprep.subr.mxu0 %v11172_v56 }
  0x72   :  { %10165 = vmatpush3.msra.mxu1 %v11140_v45  ;;  %10174 = vmatpush3.msra.mxu0 %v11172_v56 }
  0x73   :  { %10166 = vmatprep.subr.mxu1 %v11153_v51  ;;  %10175 = vmatprep.subr.mxu0 %v11181_v59 }
  0x74   :  { %10167 = vmatpush3.msra.mxu1 %v11153_v51  ;;  %10176 = vmatpush3.msra.mxu0 %v11181_v59 }
  0x75   :  { %10168 = vmatprep.subr.mxu1 %v11163_v54  ;;  %10177 = vmatprep.subr.mxu0 %v802_v63 }
  0x76   :  { %10169 = vmatpush3.msra.mxu1 %v11163_v54  ;;  %10170 = vmatprep.mubr.f32.mxu1 %v743_v58 }
  0x77   :  { %10178 = vmatpush3.msra.mxu0 %v802_v63  ;;  %10171 = vmatmul.mubr.f32.vlgmr.msra.gmra.mxu1 %v753_v60 }
  0x78   :  { %10179 = vmatprep.subr.mxu0 %v809_v3  ;;  %10184 = vmatprep.subr.mxu1 %v11134_v43 }
  0x79   :  { %10180 = vmatpush3.msra.mxu0 %v809_v3  ;;  %10181 = vmatprep.mubr.f32.mxu0 %v11142_v47 }
  0x7a   :  { %10185 = vmatpush3.msra.mxu1 %v11134_v43  ;;  %10182 = vmatmul.mubr.f32.vlgmr.msra.gmra.mxu0 %v11145_v48  ;;  %v1349_v43 = vand.u32 4294901760, %v1348_v37 }
  0x7b   :  { %10186 = vmatprep.subr.mxu1 %v11140_v45  ;;  %10192 = vmatprep.mubr.f32.mxu1 %v11142_v47 }
  0x7c   :  { %10187 = vmatpush3.msra.mxu1 %v11140_v45  ;;  %10195 = vmatprep.subr.mxu0 %v11248_v13  ;;  %v1356_v45 = vand.u32 4294901760, %v1355_v41  ;;  %v1350_v46 = vsub.f32 %v1348_v37, %v1349_v43 }
  0x7d   :  { %10188 = vmatprep.subr.mxu1 %v11153_v51  ;;  %10196 = vmatpush3.msra.mxu0 %v11248_v13 }
  0x7e   :  { %10189 = vmatpush3.msra.mxu1 %v11153_v51  ;;  %10197 = vmatprep.subr.mxu0 %v11256_v20  ;;  %v1357_v47 = vsub.f32 %v1355_v41, %v1356_v45 }
  0x7f   :  { %10190 = vmatprep.subr.mxu1 %v11163_v54  ;;  %10198 = vmatpush3.msra.mxu0 %v11256_v20 }
  0x80   :  { %10191 = vmatpush3.msra.mxu1 %v11163_v54  ;;  %10199 = vmatprep.subr.mxu0 %v11270_v26  ;;  %v1358_v49 = vand.u32 4294901760, %v1357_v47  ;;  %v9719_v54 = vld [vmem:[%s12029_s4] ss:$0 sm:$0xff] }
  0x81   :  { %10193 = vmatmul.mubr.f32.vlgmr.msra.gmra.mxu1 %v11145_v48  ;;  %10200 = vmatpush3.msra.mxu0 %v11270_v26  ;;  %v1351_v48 = vand.u32 4294901760, %v1350_v46 }
  0x82   :  { %10214 = vmatprep.mubr.f32.mxu1 %v11252_v18  ;;  %10201 = vmatprep.subr.mxu0 %v11276_v32 }
  0x83   :  { %10202 = vmatpush3.msra.mxu0 %v11276_v32  ;;  %10203 = vmatprep.mubr.f32.mxu0 %v1292_v38 }
  0x84   :  { %10206 = vmatprep.subr.mxu1 %v1337_v39  ;;  %10217 = vmatprep.subr.mxu0 %v1334_v23 }
  0x85   :  { %10204 = vmatmul.mubr.f32.vlgmr.msra.gmra.mxu0 %v1302_v42  ;;  %10207 = vmatpush3.msra.mxu1 %v1337_v39 }
  0x86   :  { %10218 = vmatpush3.msra.mxu0 %v1334_v23  ;;  %10208 = vmatprep.subr.mxu1 %v1344_v44 }
  0x87   :  { %10219 = vmatprep.subr.mxu0 %v1341_v29  ;;  %10209 = vmatpush3.msra.mxu1 %v1344_v44 }
  0x88   :  { %10220 = vmatpush3.msra.mxu0 %v1341_v29  ;;  %10210 = vmatprep.subr.mxu1 %v1351_v48 }
  0x89   :  { %10221 = vmatprep.subr.mxu0 %v1348_v37  ;;  %10211 = vmatpush3.msra.mxu1 %v1351_v48 }
  0x8a   :  { %10222 = vmatpush3.msra.mxu0 %v1348_v37  ;;  %10212 = vmatprep.subr.mxu1 %v1358_v49 }
  0x8b   :  { %10223 = vmatprep.subr.mxu0 %v1355_v41  ;;  %10213 = vmatpush3.msra.mxu1 %v1358_v49 }
  0x8c   :  { %10224 = vmatpush3.msra.mxu0 %v1355_v41  ;;  %10225 = vmatprep.mubr.f32.mxu0 %v11261_v22 }
  0x8d   :  { %10228 = vmatprep.subr.mxu1 %v11248_v13  ;;  %10239 = vmatprep.subr.mxu0 %v1335_v28 }
  0x8e   :  { %10215 = vmatmul.mubr.f32.vlgmr.msra.gmra.mxu1 %v11258_v21  ;;  %10226 = vmatmul.mubr.f32.vlgmr.msra.gmra.mxu0 %v11267_v25 }
  0x8f   :  { %10229 = vmatpush3.msra.mxu1 %v11248_v13  ;;  %10240 = vmatpush3.msra.mxu0 %v1335_v28 }
  0x90   :  { %10230 = vmatprep.subr.mxu1 %v11256_v20  ;;  %10241 = vmatprep.subr.mxu0 %v1342_v35 }
  0x91   :  { %10231 = vmatpush3.msra.mxu1 %v11256_v20  ;;  %10242 = vmatpush3.msra.mxu0 %v1342_v35 }
  0x92   :  { %10232 = vmatprep.subr.mxu1 %v11270_v26  ;;  %10243 = vmatprep.subr.mxu0 %v1349_v43 }
  0x93   :  { %10233 = vmatpush3.msra.mxu1 %v11270_v26  ;;  %10244 = vmatpush3.msra.mxu0 %v1349_v43 }
  0x94   :  { %10234 = vmatprep.subr.mxu1 %v11276_v32  ;;  %10245 = vmatprep.subr.mxu0 %v1356_v45 }
  0x95   :  { %10235 = vmatpush3.msra.mxu1 %v11276_v32  ;;  %10246 = vmatpush3.msra.mxu0 %v1356_v45 }
  0x96   :  { %10247 = vmatprep.mubr.f32.mxu0 %v11252_v18  ;;  %10236 = vmatprep.mubr.f32.mxu1 %v1290_v27 }
  0x97   :  { %10248 = vmatmul.mubr.f32.vlgmr.msra.gmra.mxu0 %v11258_v21  ;;  %10250 = vmatprep.subr.mxu1 %v11248_v13 }
  0x98   :  { %10261 = vmatprep.subr.mxu0 %v10993_v50  ;;  %10237 = vmatmul.mubr.f32.vlgmr.msra.gmra.mxu1 %v1300_v31 }
  0x99   :  { %10263 = vmatprep.mubr.msk.f32.mxu0 %vm10994_vm1, %v10993_v50  ;;  %10251 = vmatpush3.msra.mxu1 %v11248_v13 }
  0x9a   :  { %10258 = vmatprep.mubr.f32.mxu1 %v11252_v18  ;;  %10252 = vmatprep.subr.mxu1 %v11256_v20 }
  0x9b   :  { %10253 = vmatpush3.msra.mxu1 %v11256_v20 }
  0x9c   :  { %10254 = vmatprep.subr.mxu1 %v11270_v26 }
  0x9d   :  { %10255 = vmatpush3.msra.mxu1 %v11270_v26 }
  0x9e   :  { %10256 = vmatprep.subr.mxu1 %v11276_v32 }
  0x9f   :  { %10257 = vmatpush3.msra.mxu1 %v11276_v32 }
  0xa0   :  { %10259 = vmatmul.mubr.f32.vlgmr.msra.gmra.mxu1 %v11258_v21  ;;  %10266 = vmatprep.subr.mxu1 %v10993_v50 }
  0xa1   :  { %10268 = vmatprep.mubr.msk.f32.mxu1 %vm10994_vm1, %v10993_v50 }
 0x10a   :  { %v10073_v51 = vpop.f32.mrf.mxu0 }
 0x10b   :  { %v211_v7 = vadd.f32 %v10073_v51, %v9719_v54 }
 0x10c   :  { %v200_v52 = vpop.f32.mrf.mxu0 }
 0x10d   :  { %v201_v56 = vadd.f32 %v9719_v54, %v200_v52 }
 0x10f   :  { %v10084_v53 = vpop.f32.mrf.mxu1 }
 0x110   :  { %v308_v12 = vadd.f32 %v10084_v53, %v211_v7 }
 0x111   :  { %v301_v57 = vpop.f32.mrf.mxu1 }
 0x112   :  { %v10095_v55 = vpop.f32.mrf.mxu0  ;;  %v302_v60 = vadd.f32 %v301_v57, %v201_v56 }
 0x113   :  { %v395_v19 = vadd.f32 %v10095_v55, %v308_v12 }
 0x114   :  { %v387_v58 = vpop.f32.mrf.mxu0 }
 0x115   :  { %v388_v63 = vadd.f32 %v387_v58, %v302_v60 }
 0x119   :  { %v10106_v59 = vpop.f32.mrf.mxu1 }
 0x11a   :  { %v480_v22 = vadd.f32 %v10106_v59, %v395_v19 }
 0x11b   :  { %v471_v62 = vpop.f32.mrf.mxu1 }
 0x11c   :  { %v10117_v61 = vpop.f32.mrf.mxu0  ;;  %v472_v2 = vadd.f32 %v471_v62, %v388_v63  ;;  %v11401_v63 = vld [vmem:[%s12029_s4 + $0x2] ss:$0 sm:$0xff]  ;;  %s10998_s4 = smov 16  }
 0x11d   :  { %v569_v29 = vadd.f32 %v10117_v61, %v480_v22 }
 0x11e   :  { %v562_v0 = vpop.f32.mrf.mxu0 }
 0x11f   :  { %v563_v8 = vadd.f32 %v562_v0, %v472_v2 }
 0x123   :  { %v10128_v1 = vpop.f32.mrf.mxu1 }
 0x124   :  { %v650_v33 = vadd.f32 %v10128_v1, %v569_v29 }
 0x125   :  { %v643_v4 = vpop.f32.mrf.mxu1 }
 0x126   :  { %v11328_v9 = vadd.f32 %v643_v4, %v563_v8  ;;  %v2246_v40 = vsel %vm1795_vm2, %v650_v33, 0 }
 0x127   :  { %v10139_v3 = vpop.f32.mrf.mxu0  ;;  %v11339_v44 = vand.u32 4294901760, %v2246_v40 }
 0x128   :  { %v758_v11 = vadd.f32 %v10139_v3, %v9721_v6  ;;  %v1796_v17 = vsel %vm1795_vm2, %v11328_v9, 0 }
 0x129   :  { %v747_v10 = vpop.f32.mrf.mxu0  ;;  %v11332_v23 = vand.u32 4294901760, %v1796_v17  ;;  %v2317_v49 = vsub.f32 %v2246_v40, %v11339_v44 }
 0x12a   :  { %v748_v13 = vadd.f32 %v9721_v6, %v747_v10 }
 0x12b   :  { %v1867_v30 = vsub.f32 %v1796_v17, %v11332_v23  ;;  %v2318_v55 = vand.u32 4294901760, %v2317_v49 }
 0x12d   :  { %v10150_v5 = vpop.f32.mrf.mxu1  ;;  %v1868_v38 = vand.u32 4294901760, %v1867_v30  ;;  %v2319_v57 = vsub.f32 %v2317_v49, %v2318_v55 }
 0x12e   :  { %v855_v16 = vadd.f32 %v10150_v5, %v758_v11 }
 0x12f   :  { %v848_v14 = vpop.f32.mrf.mxu1  ;;  %v1869_v43 = vsub.f32 %v1867_v30, %v1868_v38  ;;  %v2320_v59 = vand.u32 4294901760, %v2319_v57 }
 0x130   :  { %v10161_v15 = vpop.f32.mrf.mxu0  ;;  %v849_v20 = vadd.f32 %v848_v14, %v748_v13 }
 0x131   :  { %v942_v24 = vadd.f32 %v10161_v15, %v855_v16  ;;  %v1870_v47 = vand.u32 4294901760, %v1869_v43 }
 0x132   :  { %v934_v21 = vpop.f32.mrf.mxu0 }
 0x133   :  { %v935_v27 = vadd.f32 %v934_v21, %v849_v20 }
 0x137   :  { %v10172_v18 = vpop.f32.mrf.mxu1 }
 0x138   :  { %v1027_v28 = vadd.f32 %v10172_v18, %v942_v24 }
 0x139   :  { %v1018_v25 = vpop.f32.mrf.mxu1 }
 0x13a   :  { %v10183_v26 = vpop.f32.mrf.mxu0  ;;  %v1019_v31 = vadd.f32 %v1018_v25, %v935_v27 }
 0x13b   :  { %v1116_v34 = vadd.f32 %v10183_v26, %v1027_v28 }
 0x13c   :  { %v1109_v32 = vpop.f32.mrf.mxu0 }
 0x13d   :  { %v1110_v36 = vadd.f32 %v1109_v32, %v1019_v31 }
 0x141   :  { %v10194_v35 = vpop.f32.mrf.mxu1 }
 0x142   :  { %v1197_v37 = vadd.f32 %v10194_v35, %v1116_v34 }
 0x143   :  { %v1190_v39 = vpop.f32.mrf.mxu1 }
 0x144   :  { %v1191_v41 = vadd.f32 %v1190_v39, %v1110_v36  ;;  %1765 = vrot.lane.b32.xlu1 %v1197_v37, %s10995_s16  ;;  %v2248_v48 = vsel %vm1795_vm2, %v1197_v37, 0 }
 0x145   :  { %v2281_v53 = vand.u32 4294901760, %v2248_v48  ;;  %v10205_v62 = vpop.f32.mrf.mxu0 }
 0x146   :  { %1763 = vrot.lane.b32.xlu0 %v1191_v41, %s10995_s16  ;;  %v1798_v42 = vsel %vm1795_vm2, %v1191_v41, 0  ;;  %v1305_v0 = vadd.f32 %v10205_v62, %v11401_v63 }
 0x147   :  { %v1831_v45 = vand.u32 4294901760, %v1798_v42  ;;  %v2358_v56 = vsub.f32 %v2248_v48, %v2281_v53  ;;  %v11404_v1 = vpop.f32.mrf.mxu0 }
 0x148   :  { %1751 = vrot.lane.b32.xlu1 %v650_v33, %s10995_s16 }
 0x149   :  { %10262 = vmatpush3.xpose.msra.mxu0 %v1831_v45  ;;  %v1908_v46 = vsub.f32 %v1798_v42, %v1831_v45  ;;  %v2359_v58 = vand.u32 4294901760, %v2358_v56 }
 0x14a   :  { %1749 = vrot.lane.b32.xlu0 %v11328_v9, %s10995_s16  ;;  %10271 = vmatprep.subr.mxu0 %v10993_v50 }
 0x14b   :  { %v1909_v51 = vand.u32 4294901760, %v1908_v46  ;;  %v2360_v60 = vsub.f32 %v2358_v56, %v2359_v58 }
 0x14c   :  { %1753 = vrot.lane.b32.xlu1 %v11328_v9, %s10996_s17  ;;  %10264 = vmatmul.mubr.f32.vlgmr.msra.gmra.mxu0 %v1870_v47 }
 0x14d   :  { %10272 = vmatpush3.xpose.msra.mxu0 %v1908_v46  ;;  %10273 = vmatprep.mubr.msk.f32.mxu0 %vm10994_vm1, %v10993_v50  ;;  %v1910_v52 = vsub.f32 %v1908_v46, %v1909_v51  ;;  %v2361_v61 = vand.u32 4294901760, %v2360_v60 }
 0x14e   :  { %1767 = vrot.lane.b32.xlu0 %v1191_v41, %s10996_s17  ;;  %10281 = vmatprep.subr.mxu0 %v10993_v50  ;;  %v10227_v2 = vpop.f32.mrf.mxu0  ;;  %v10216_v3 = vpop.f32.mrf.mxu1 }
 0x14f   :  { %v1911_v54 = vand.u32 4294901760, %v1910_v52  ;;  %v1402_v4 = vadd.f32 %v10216_v3, %v1305_v0 }
 0x150   :  { %1755 = vrot.lane.b32.xlu1 %v650_v33, %s10996_s17  ;;  %10274 = vmatmul.mubr.f32.vlgmr.msra.gmra.mxu0 %v1867_v30  ;;  %v11406_v6 = vpop.f32.mrf.mxu1  ;;  %v11408_v7 = vpop.f32.mrf.mxu0 }
 0x151   :  { %10267 = vmatpush3.xpose.msra.mxu1 %v1911_v54  ;;  %10282 = vmatpush3.xpose.msra.mxu0 %v1909_v51  ;;  %v1489_v8 = vadd.f32 %v10227_v2, %v1402_v4 }
 0x152   :  { %1769 = vrot.lane.b32.xlu0 %v1197_v37, %s10996_s17  ;;  %10283 = vmatprep.mubr.msk.f32.mxu0 %vm10994_vm1, %v10993_v50 }
 0x153   :  { %10276 = vmatprep.subr.mxu1 %v10993_v50  ;;  %10291 = vmatprep.subr.mxu0 %v10993_v50 }
 0x154   :  { %1757 = vrot.lane.b32.xlu1 %v11328_v9, %s10997_s18  ;;  %10269 = vmatmul.mubr.f32.vlgmr.msra.gmra.mxu1 %v11332_v23 }
 0x155   :  { %10284 = vmatmul.mubr.f32.vlgmr.msra.gmra.mxu0 %v11332_v23  ;;  %10277 = vmatpush3.xpose.msra.mxu1 %v1831_v45 }
 0x156   :  { %10292 = vmatpush3.xpose.msra.mxu0 %v2281_v53  ;;  %1771 = vrot.lane.b32.xlu0 %v1191_v41, %s10997_s18 }
 0x157   :  { %10278 = vmatprep.mubr.msk.f32.mxu1 %vm10994_vm1, %v10993_v50  ;;  %10293 = vmatprep.mubr.msk.f32.mxu0 %vm10994_vm1, %v10993_v50  ;;  %v10249_v11 = vpop.f32.mrf.mxu0 }
 0x158   :  { %1759 = vrot.lane.b32.xlu1 %v650_v33, %s10997_s18  ;;  %10279 = vmatmul.mubr.f32.vlgmr.msra.gmra.mxu1 %v1868_v38  ;;  %v10238_v10 = vpop.f32.mrf.mxu1 }
 0x159   :  { %10286 = vmatprep.subr.mxu1 %v10993_v50  ;;  %10294 = vmatmul.mubr.f32.vlgmr.msra.gmra.mxu0 %v2320_v59  ;;  %v1574_v5 = vadd.f32 %v10238_v10, %v1489_v8 }
 0x15a   :  { %10301 = vmatprep.subr.mxu0 %v10993_v50  ;;  %10287 = vmatpush3.xpose.msra.mxu1 %v1831_v45  ;;  %v11410_v12 = vpop.f32.mrf.mxu1 }
 0x15b   :  { %10302 = vmatpush3.xpose.msra.mxu0 %v2358_v56  ;;  %1773 = vrot.lane.b32.xlu0 %v1197_v37, %s10997_s18  ;;  %v1663_v9 = vadd.f32 %v10249_v11, %v1574_v5  ;;  %v1295_v11 = vadd.f32 %v11401_v63, %v11404_v1 }
 0x15c   :  { %10288 = vmatprep.mubr.msk.f32.mxu1 %vm10994_vm1, %v10993_v50  ;;  %10303 = vmatprep.mubr.msk.f32.mxu0 %vm10994_vm1, %v10993_v50 }
 0x15d   :  { %10289 = vmatmul.mubr.f32.vlgmr.msra.gmra.mxu1 %v11332_v23  ;;  %10296 = vmatprep.subr.mxu1 %v10993_v50  ;;  %v1396_v63 = vadd.f32 %v11406_v6, %v1295_v11 }
 0x15e   :  { %10304 = vmatmul.mubr.f32.vlgmr.msra.gmra.mxu0 %v2317_v49  ;;  %10311 = vmatprep.subr.mxu0 %v10993_v50 }
 0x15f   :  { %10297 = vmatpush3.xpose.msra.mxu1 %v2361_v61  ;;  %10312 = vmatpush3.xpose.msra.mxu0 %v2359_v58 }
 0x160   :  { %10298 = vmatprep.mubr.msk.f32.mxu1 %vm10994_vm1, %v10993_v50  ;;  %10313 = vmatprep.mubr.msk.f32.mxu0 %vm10994_vm1, %v10993_v50  ;;  %v10260_v13 = vpop.f32.mrf.mxu1 }
 0x161   :  { %10306 = vmatprep.subr.mxu1 %v10993_v50  ;;  %10321 = vmatprep.subr.mxu0 %v10993_v50  ;;  %v11412_v14 = vadd.f32 %v10260_v13, %v1663_v9 }
 0x162   :  { %10299 = vmatmul.mubr.f32.vlgmr.msra.gmra.mxu1 %v11339_v44  ;;  %10314 = vmatmul.mubr.f32.vlgmr.msra.gmra.mxu0 %v11339_v44 }
 0x163   :  { %10307 = vmatpush3.xpose.msra.mxu1 %v2281_v53  ;;  %10308 = vmatprep.mubr.msk.f32.mxu1 %vm10994_vm1, %v10993_v50 }
 0x164   :  { %10316 = vmatprep.subr.mxu1 %v10993_v50  ;;  %10323 = vmatprep.mubr.msk.f32.mxu0 %vm10994_vm1, %v10993_v50 }
 0x166   :  { %10309 = vmatmul.mubr.f32.vlgmr.msra.gmra.mxu1 %v2318_v55 }
 0x167   :  { %10317 = vmatpush3.xpose.msra.mxu1 %v2281_v53  ;;  %10318 = vmatprep.mubr.msk.f32.mxu1 %vm10994_vm1, %v10993_v50 }
 0x168   :  { %10326 = vmatprep.subr.mxu1 %v10993_v50 }
 0x16a   :  { %10319 = vmatmul.mubr.f32.vlgmr.msra.gmra.mxu1 %v11339_v44 }
 0x16b   :  { %10328 = vmatprep.mubr.msk.f32.mxu1 %vm10994_vm1, %v10993_v50 }
 0x1b6   :  { %v1766_v15 = vpop.permute.xlu1 %1765 }
 0x1b7   :  { %v3148_v19 = vsel %vm1795_vm2, %v1766_v15, 0 }
 0x1b8   :  { %v1764_v16 = vpop.permute.xlu0 %1763  ;;  %v11418_v24 = vand.u32 4294901760, %v3148_v19 }
 0x1b9   :  { %v2698_v17 = vsel %vm1795_vm2, %v1764_v16, 0 }
 0x1ba   :  { %v2731_v18 = vand.u32 4294901760, %v2698_v17  ;;  %v1752_v21 = vpop.permute.xlu1 %1751  ;;  %v11422_v30 = vsub.f32 %v3148_v19, %v11418_v24 }
 0x1bb   :  { %v3146_v27 = vsel %vm1795_vm2, %v1752_v21, 0 }
 0x1bc   :  { %v2808_v20 = vsub.f32 %v2698_v17, %v2731_v18  ;;  %v1750_v22 = vpop.permute.xlu0 %1749  ;;  %10322 = vmatpush3.xpose.msra.mxu0 %v2731_v18  ;;  %v11424_v32 = vand.u32 4294901760, %v3146_v27  ;;  %v3259_v36 = vand.u32 4294901760, %v11422_v30 }
 0x1bd   :  { %v2696_v23 = vsel %vm1795_vm2, %v1750_v22, 0  ;;  %10331 = vmatprep.subr.mxu0 %v10993_v50 }
 0x1be   :  { %v2809_v25 = vand.u32 4294901760, %v2808_v20  ;;  %v2766_v26 = vand.u32 4294901760, %v2696_v23  ;;  %v3217_v37 = vsub.f32 %v3146_v27, %v11424_v32  ;;  %v1754_v40 = vpop.permute.xlu1 %1753  ;;  %v3260_v41 = vsub.f32 %v11422_v30, %v3259_v36 }
 0x1bf   :  { %v3596_v44 = vsel %vm1795_vm2, %v1754_v40, 0 }
 0x1c0   :  { %v2810_v28 = vsub.f32 %v2808_v20, %v2809_v25  ;;  %v2767_v29 = vsub.f32 %v2696_v23, %v2766_v26  ;;  %v1768_v35 = vpop.permute.xlu0 %1767  ;;  %v3218_v42 = vand.u32 4294901760, %v3217_v37  ;;  %v3261_v45 = vand.u32 4294901760, %v3260_v41 }
 0x1c1   :  { %v3598_v39 = vsel %vm1795_vm2, %v1768_v35, 0  ;;  %v11442_v47 = vand.u32 4294901760, %v3596_v44  ;;  %v1737_v35 = vpop.f32.mrf.mxu1 }
 0x1c2   :  { %v2811_v31 = vand.u32 4294901760, %v2810_v28  ;;  %v2768_v33 = vand.u32 4294901760, %v2767_v29  ;;  %v11433_v43 = vand.u32 4294901760, %v3598_v39  ;;  %v3219_v46 = vsub.f32 %v3217_v37, %v3218_v42  ;;  %v1756_v55 = vpop.permute.xlu1 %1755 }
 0x1c3   :  { %v3667_v52 = vsub.f32 %v3596_v44, %v11442_v47  ;;  %v4046_v59 = vsel %vm1795_vm2, %v1756_v55, 0 }
 0x1c4   :  { %v2769_v34 = vsub.f32 %v2767_v29, %v2768_v33  ;;  %10327 = vmatpush3.xpose.msra.mxu1 %v2811_v31  ;;  %v11445_v48 = vsub.f32 %v3598_v39, %v11433_v43  ;;  %v1770_v49 = vpop.permute.xlu0 %1769  ;;  %v3220_v51 = vand.u32 4294901760, %v3219_v46  ;;  %v11477_v62 = vand.u32 4294901760, %v4046_v59 }
 0x1c5   :  { %10336 = vmatprep.subr.mxu1 %v10993_v50  ;;  %v4048_v54 = vsel %vm1795_vm2, %v1770_v49, 0  ;;  %v3668_v56 = vand.u32 4294901760, %v3667_v52 }
 0x1c6   :  { %v2770_v38 = vand.u32 4294901760, %v2769_v34  ;;  %v3709_v53 = vand.u32 4294901760, %v11445_v48  ;;  %v11467_v58 = vand.u32 4294901760, %v4048_v54  ;;  %v4117_v4 = vsub.f32 %v4046_v59, %v11477_v62  ;;  %v1758_v5 = vpop.permute.xlu1 %1757 }
 0x1c7   :  { %10329 = vmatmul.mubr.f32.vlgmr.msra.gmra.mxu1 %v2766_v26  ;;  %v3669_v60 = vsub.f32 %v3667_v52, %v3668_v56  ;;  %v4496_v16 = vsel %vm1795_vm2, %v1758_v5, 0 }
 0x1c8   :  { %10324 = vmatmul.mubr.f32.vlgmr.msra.gmra.mxu0 %v2770_v38  ;;  %10337 = vmatpush3.xpose.msra.mxu1 %v2731_v18  ;;  %v3710_v57 = vsub.f32 %v11445_v48, %v3709_v53  ;;  %v11480_v0 = vsub.f32 %v4048_v54, %v11467_v58  ;;  %v1772_v2 = vpop.permute.xlu0 %1771  ;;  %v4118_v9 = vand.u32 4294901760, %v4117_v4 }
 0x1c9   :  { %10332 = vmatpush3.xpose.msra.mxu0 %v2808_v20  ;;  %10338 = vmatprep.mubr.msk.f32.mxu1 %vm10994_vm1, %v10993_v50  ;;  %v3670_v3 = vand.u32 4294901760, %v3669_v60  ;;  %v4498_v10 = vsel %vm1795_vm2, %v1772_v2, 0  ;;  %v1482_v20 = vadd.f32 %v11408_v7, %v1396_v63 }
 0x1ca   :  { %10333 = vmatprep.mubr.msk.f32.mxu0 %vm10994_vm1, %v10993_v50  ;;  %10341 = vmatprep.subr.mxu0 %v10993_v50  ;;  %v3711_v61 = vand.u32 4294901760, %v3710_v57  ;;  %v4159_v8 = vand.u32 4294901760, %v11480_v0  ;;  %v11508_v15 = vand.u32 4294901760, %v4498_v10  ;;  %v4119_v1 = vsub.f32 %v4117_v4, %v4118_v9  ;;  %v1760_v7 = vpop.permute.xlu1 %1759 }
 0x1cb   :  { %10339 = vmatmul.mubr.f32.vlgmr.msra.gmra.mxu1 %v2768_v33  ;;  %10346 = vmatprep.subr.mxu1 %v10993_v50 }
 0x1cc   :  { %10334 = vmatmul.mubr.f32.vlgmr.msra.gmra.mxu0 %v2767_v29  ;;  %10347 = vmatpush3.xpose.msra.mxu1 %v2731_v18  ;;  %v4160_v13 = vsub.f32 %v11480_v0, %v4159_v8  ;;  %v11519_v18 = vand.u32 4294901760, %v4496_v16  ;;  %v11522_v19 = vsub.f32 %v4498_v10, %v11508_v15  ;;  %v4120_v21 = vand.u32 4294901760, %v4119_v1 }
 0x1cd   :  { %10342 = vmatpush3.xpose.msra.mxu0 %v2809_v25  ;;  %10348 = vmatprep.mubr.msk.f32.mxu1 %vm10994_vm1, %v10993_v50  ;;  %v1774_v6 = vpop.permute.xlu0 %1773  ;;  %v1566_v25 = vadd.f32 %v11410_v12, %v1482_v20  ;;  %v4946_v29 = vsel %vm1795_vm2, %v1760_v7, 0  ;;  %v1656_v12 = vpop.f32.mrf.mxu0 }
 0x1ce   :  { %10343 = vmatprep.mubr.msk.f32.mxu0 %vm10994_vm1, %v10993_v50  ;;  %10351 = vmatprep.subr.mxu0 %v10993_v50  ;;  %v4161_v17 = vand.u32 4294901760, %v4160_v13  ;;  %v4567_v22 = vsub.f32 %v4496_v16, %v11519_v18  ;;  %v4609_v23 = vand.u32 4294901760, %v11522_v19  ;;  %v11560_v33 = vand.u32 4294901760, %v4946_v29 }
 0x1cf   :  { %10349 = vmatmul.mubr.f32.vlgmr.msra.gmra.mxu1 %v2766_v26  ;;  %10356 = vmatprep.subr.mxu1 %v10993_v50 }
 0x1d0   :  { %10344 = vmatmul.mubr.f32.vlgmr.msra.gmra.mxu0 %v2766_v26  ;;  %10357 = vmatpush3.xpose.msra.mxu1 %v3261_v45  ;;  %v4568_v26 = vand.u32 4294901760, %v4567_v22  ;;  %v4610_v27 = vsub.f32 %v11522_v19, %v4609_v23  ;;  %v5017_v38 = vsub.f32 %v4946_v29, %v11560_v33 }
 0x1d1   :  { %10352 = vmatpush3.xpose.msra.mxu0 %v11418_v24  ;;  %10358 = vmatprep.mubr.msk.f32.mxu1 %vm10994_vm1, %v10993_v50 }
 0x1d2   :  { %10353 = vmatprep.mubr.msk.f32.mxu0 %vm10994_vm1, %v10993_v50  ;;  %10361 = vmatprep.subr.mxu0 %v10993_v50  ;;  %v4569_v31 = vsub.f32 %v4567_v22, %v4568_v26  ;;  %v5018_v41 = vand.u32 4294901760, %v5017_v38 }
 0x1d3   :  { %10359 = vmatmul.mubr.f32.vlgmr.msra.gmra.mxu1 %v11424_v32  ;;  %10366 = vmatprep.subr.mxu1 %v10993_v50 }
 0x1d4   :  { %10354 = vmatmul.mubr.f32.vlgmr.msra.gmra.mxu0 %v3220_v51  ;;  %10367 = vmatpush3.xpose.msra.mxu1 %v11418_v24  ;;  %v5019_v44 = vsub.f32 %v5017_v38, %v5018_v41 }
 0x1d5   :  { %10362 = vmatpush3.xpose.msra.mxu0 %v11422_v30  ;;  %10368 = vmatprep.mubr.msk.f32.mxu1 %vm10994_vm1, %v10993_v50  ;;  %v1657_v30 = vadd.f32 %v1656_v12, %v1566_v25 }
 0x1d6   :  { %10363 = vmatprep.mubr.msk.f32.mxu0 %vm10994_vm1, %v10993_v50  ;;  %10371 = vmatprep.subr.mxu0 %v10993_v50 }
 0x1d7   :  { %10369 = vmatmul.mubr.f32.vlgmr.msra.gmra.mxu1 %v3218_v42  ;;  %10376 = vmatprep.subr.mxu1 %v10993_v50 }
 0x1d8   :  { %10364 = vmatmul.mubr.f32.vlgmr.msra.gmra.mxu0 %v3217_v37  ;;  %10377 = vmatpush3.xpose.msra.mxu1 %v11418_v24  ;;  %v4948_v24 = vsel %vm1795_vm2, %v1774_v6, 0  ;;  %v4570_v37 = vand.u32 4294901760, %v4569_v31 }
 0x1d9   :  { %10372 = vmatpush3.xpose.msra.mxu0 %v3259_v36  ;;  %10378 = vmatprep.mubr.msk.f32.mxu1 %vm10994_vm1, %v10993_v50  ;;  %v11548_v28 = vand.u32 4294901760, %v4948_v24  ;;  %v11569_v36 = vadd.f32 %v1737_v35, %v1657_v30 }
 0x1da   :  { %10373 = vmatprep.mubr.msk.f32.mxu0 %vm10994_vm1, %v10993_v50  ;;  %10381 = vmatprep.subr.mxu0 %v10993_v50 }
 0x1db   :  { %10379 = vmatmul.mubr.f32.vlgmr.msra.gmra.mxu1 %v11424_v32  ;;  %10386 = vmatprep.subr.mxu1 %v10993_v50  ;;  %v5058_v34 = vsub.f32 %v4948_v24, %v11548_v28  ;;  %v11582_v40 = vand.u32 4294901760, %v11569_v36 }
 0x1dc   :  { %10374 = vmatmul.mubr.f32.vlgmr.msra.gmra.mxu0 %v11424_v32  ;;  %10387 = vmatpush3.xpose.msra.mxu1 %v3711_v61  ;;  %v4611_v32 = vand.u32 4294901760, %v4610_v27 }
 0x1dd   :  { %10382 = vmatpush3.xpose.msra.mxu0 %v11433_v43  ;;  %10388 = vmatprep.mubr.msk.f32.mxu1 %vm10994_vm1, %v10993_v50  ;;  %v5059_v39 = vand.u32 4294901760, %v5058_v34 }
 0x1de   :  { %10383 = vmatprep.mubr.msk.f32.mxu0 %vm10994_vm1, %v10993_v50  ;;  %10391 = vmatprep.subr.mxu0 %v10993_v50 }
 0x1df   :  { %10389 = vmatmul.mubr.f32.vlgmr.msra.gmra.mxu1 %v11442_v47  ;;  %10396 = vmatprep.subr.mxu1 %v10993_v50  ;;  %v5060_v42 = vsub.f32 %v5058_v34, %v5059_v39 }
 0x1e0   :  { %10384 = vmatmul.mubr.f32.vlgmr.msra.gmra.mxu0 %v3670_v3  ;;  %10397 = vmatpush3.xpose.msra.mxu1 %v11433_v43 }
 0x1e1   :  { %10392 = vmatpush3.xpose.msra.mxu0 %v11445_v48  ;;  %10398 = vmatprep.mubr.msk.f32.mxu1 %vm10994_vm1, %v10993_v50  ;;  %v5061_v45 = vand.u32 4294901760, %v5060_v42 }
 0x1e2   :  { %10393 = vmatprep.mubr.msk.f32.mxu0 %vm10994_vm1, %v10993_v50  ;;  %10401 = vmatprep.subr.mxu0 %v10993_v50 }
 0x1e3   :  { %10399 = vmatmul.mubr.f32.vlgmr.msra.gmra.mxu1 %v3668_v56  ;;  %10406 = vmatprep.subr.mxu1 %v10993_v50 }
 0x1e4   :  { %10394 = vmatmul.mubr.f32.vlgmr.msra.gmra.mxu0 %v3667_v52  ;;  %10407 = vmatpush3.xpose.msra.mxu1 %v11433_v43  ;;  %v11594_v43 = vsub.f32 %v11569_v36, %v11582_v40 }
 0x1e5   :  { %10402 = vmatpush3.xpose.msra.mxu0 %v3709_v53  ;;  %10408 = vmatprep.mubr.msk.f32.mxu1 %vm10994_vm1, %v10993_v50 }
 0x1e6   :  { %10403 = vmatprep.mubr.msk.f32.mxu0 %vm10994_vm1, %v10993_v50  ;;  %10411 = vmatprep.subr.mxu0 %v10993_v50  ;;  %v5596_v46 = vand.u32 4294901760, %v11594_v43 }
 0x1e7   :  { %10409 = vmatmul.mubr.f32.vlgmr.msra.gmra.mxu1 %v11442_v47  ;;  %10416 = vmatprep.subr.mxu1 %v10993_v50 }
 0x1e8   :  { %10404 = vmatmul.mubr.f32.vlgmr.msra.gmra.mxu0 %v11442_v47  ;;  %10417 = vmatpush3.xpose.msra.mxu1 %v4161_v17  ;;  %v5020_v47 = vand.u32 4294901760, %v5019_v44  ;;  %v5597_v48 = vsub.f32 %v11594_v43, %v5596_v46 }
 0x1e9   :  { %10412 = vmatpush3.xpose.msra.mxu0 %v11467_v58  ;;  %10418 = vmatprep.mubr.msk.f32.mxu1 %vm10994_vm1, %v10993_v50 }
 0x1ea   :  { %10413 = vmatprep.mubr.msk.f32.mxu0 %vm10994_vm1, %v10993_v50  ;;  %10421 = vmatprep.subr.mxu0 %v10993_v50  ;;  %v5598_v49 = vand.u32 4294901760, %v5597_v48 }
 0x1eb   :  { %10419 = vmatmul.mubr.f32.vlgmr.msra.gmra.mxu1 %v11477_v62  ;;  %10426 = vmatprep.subr.mxu1 %v10993_v50 }
 0x1ec   :  { %10414 = vmatmul.mubr.f32.vlgmr.msra.gmra.mxu0 %v4120_v21  ;;  %10427 = vmatpush3.xpose.msra.mxu1 %v11467_v58 }
 0x1ed   :  { %10422 = vmatpush3.xpose.msra.mxu0 %v11480_v0  ;;  %10428 = vmatprep.mubr.msk.f32.mxu1 %vm10994_vm1, %v10993_v50 }
 0x1ee   :  { %10423 = vmatprep.mubr.msk.f32.mxu0 %vm10994_vm1, %v10993_v50  ;;  %10431 = vmatprep.subr.mxu0 %v10993_v50 }
 0x1ef   :  { %10429 = vmatmul.mubr.f32.vlgmr.msra.gmra.mxu1 %v4118_v9  ;;  %10436 = vmatprep.subr.mxu1 %v10993_v50 }
 0x1f0   :  { %10424 = vmatmul.mubr.f32.vlgmr.msra.gmra.mxu0 %v4117_v4  ;;  %10437 = vmatpush3.xpose.msra.mxu1 %v11467_v58 }
 0x1f1   :  { %10432 = vmatpush3.xpose.msra.mxu0 %v4159_v8  ;;  %10438 = vmatprep.mubr.msk.f32.mxu1 %vm10994_vm1, %v10993_v50 }
 0x1f2   :  { %10433 = vmatprep.mubr.msk.f32.mxu0 %vm10994_vm1, %v10993_v50  ;;  %10441 = vmatprep.subr.mxu0 %v10993_v50 }
 0x1f3   :  { %10439 = vmatmul.mubr.f32.vlgmr.msra.gmra.mxu1 %v11477_v62  ;;  %10446 = vmatprep.subr.mxu1 %v10993_v50 }
 0x1f4   :  { %10434 = vmatmul.mubr.f32.vlgmr.msra.gmra.mxu0 %v11477_v62  ;;  %10447 = vmatpush3.xpose.msra.mxu1 %v4611_v32 }
 0x1f5   :  { %10442 = vmatpush3.xpose.msra.mxu0 %v11508_v15  ;;  %10448 = vmatprep.mubr.msk.f32.mxu1 %vm10994_vm1, %v10993_v50 }
 0x1f6   :  { %10443 = vmatprep.mubr.msk.f32.mxu0 %vm10994_vm1, %v10993_v50  ;;  %10451 = vmatprep.subr.mxu0 %v10993_v50 }
 0x1f7   :  { %10449 = vmatmul.mubr.f32.vlgmr.msra.gmra.mxu1 %v11519_v18  ;;  %10456 = vmatprep.subr.mxu1 %v10993_v50 }
 0x1f8   :  { %10444 = vmatmul.mubr.f32.vlgmr.msra.gmra.mxu0 %v4570_v37  ;;  %10457 = vmatpush3.xpose.msra.mxu1 %v11508_v15 }
 0x1f9   :  { %10452 = vmatpush3.xpose.msra.mxu0 %v11522_v19  ;;  %10458 = vmatprep.mubr.msk.f32.mxu1 %vm10994_vm1, %v10993_v50 }
 0x1fa   :  { %10453 = vmatprep.mubr.msk.f32.mxu0 %vm10994_vm1, %v10993_v50  ;;  %10461 = vmatprep.subr.mxu0 %v10993_v50 }
 0x1fb   :  { %10459 = vmatmul.mubr.f32.vlgmr.msra.gmra.mxu1 %v4568_v26  ;;  %10466 = vmatprep.subr.mxu1 %v10993_v50 }
 0x1fc   :  { %10454 = vmatmul.mubr.f32.vlgmr.msra.gmra.mxu0 %v4567_v22  ;;  %10467 = vmatpush3.xpose.msra.mxu1 %v11508_v15 }
 0x1fd   :  { %10462 = vmatpush3.xpose.msra.mxu0 %v4609_v23  ;;  %10468 = vmatprep.mubr.msk.f32.mxu1 %vm10994_vm1, %v10993_v50 }
 0x1fe   :  { %10463 = vmatprep.mubr.msk.f32.mxu0 %vm10994_vm1, %v10993_v50  ;;  %10471 = vmatprep.subr.mxu0 %v10993_v50 }
 0x1ff   :  { %10469 = vmatmul.mubr.f32.vlgmr.msra.gmra.mxu1 %v11519_v18  ;;  %10476 = vmatprep.subr.mxu1 %v10993_v50 }
 0x200   :  { %10464 = vmatmul.mubr.f32.vlgmr.msra.gmra.mxu0 %v11519_v18  ;;  %10477 = vmatpush3.xpose.msra.mxu1 %v5061_v45 }
 0x201   :  { %10472 = vmatpush3.xpose.msra.mxu0 %v11548_v28  ;;  %10478 = vmatprep.mubr.msk.f32.mxu1 %vm10994_vm1, %v10993_v50 }
 0x202   :  { %10473 = vmatprep.mubr.msk.f32.mxu0 %vm10994_vm1, %v10993_v50  ;;  %10481 = vmatprep.subr.mxu0 %v10993_v50 }
 0x203   :  { %10479 = vmatmul.mubr.f32.vlgmr.msra.gmra.mxu1 %v11560_v33  ;;  %10486 = vmatprep.subr.mxu1 %v10993_v50 }
 0x204   :  { %10474 = vmatmul.mubr.f32.vlgmr.msra.gmra.mxu0 %v5020_v47  ;;  %10487 = vmatpush3.xpose.msra.mxu1 %v11548_v28 }
 0x205   :  { %10482 = vmatpush3.xpose.msra.mxu0 %v5058_v34  ;;  %10488 = vmatprep.mubr.msk.f32.mxu1 %vm10994_vm1, %v10993_v50 }
 0x206   :  { %10483 = vmatprep.mubr.msk.f32.mxu0 %vm10994_vm1, %v10993_v50  ;;  %10491 = vmatprep.subr.mxu0 %v10993_v50 }
 0x207   :  { %10489 = vmatmul.mubr.f32.vlgmr.msra.gmra.mxu1 %v5018_v41  ;;  %10496 = vmatprep.subr.mxu1 %v10993_v50 }
 0x208   :  { %10484 = vmatmul.mubr.f32.vlgmr.msra.gmra.mxu0 %v5017_v38  ;;  %10497 = vmatpush3.xpose.msra.mxu1 %v11548_v28 }
 0x209   :  { %10492 = vmatpush3.xpose.msra.mxu0 %v5059_v39  ;;  %10498 = vmatprep.mubr.msk.f32.mxu1 %vm10994_vm1, %v10993_v50 }
 0x20a   :  { %10493 = vmatprep.mubr.msk.f32.mxu0 %vm10994_vm1, %v10993_v50  ;;  %10501 = vmatprep.subr.mxu0 %v10993_v50 }
 0x20b   :  { %10499 = vmatmul.mubr.f32.vlgmr.msra.gmra.mxu1 %v11560_v33  ;;  %10506 = vmatprep.subr.mxu1 %v10993_v50 }
 0x20c   :  { %v1872_v51 = vpop.f32.mrf.mxu0  ;;  %10494 = vmatmul.mubr.f32.vlgmr.msra.gmra.mxu0 %v11560_v33  ;;  %10507 = vmatpush3.msra.mxu1 %v5598_v49 }
 0x20d   :  { %10502 = vmatpush3.msra.mxu0 %v11582_v40  ;;  %10508 = vmatprep.mubr.msk.f32.mxu1 %vm10994_vm1, %v10993_v50 }
 0x20e   :  { %v10265_v52 = vpop.f32.mrf.mxu0  ;;  %10516 = vmatprep.subr.mxu1 %v10993_v50  ;;  %10503 = vmatprep.mubr.msk.f32.mxu0 %vm10994_vm1, %v10993_v50 }
 0x20f   :  { %10511 = vmatprep.subr.mxu0 %v10993_v50 }
 0x210   :  { %v2022_v53 = vpop.f32.mrf.mxu0 }
 0x212   :  { %v10275_v54 = vpop.f32.mrf.mxu0 }
 0x214   :  { %v1948_v55 = vpop.f32.mrf.mxu1 }
 0x215   :  { %v1949_v56 = vadd.f32 %v1948_v55, %v1872_v51  ;;  %v2170_v57 = vpop.f32.mrf.mxu0 }
 0x216   :  { %v10270_v58 = vpop.f32.mrf.mxu1 }
 0x217   :  { %v10285_v59 = vpop.f32.mrf.mxu0  ;;  %v2023_v60 = vadd.f32 %v2022_v53, %v1949_v56 }
 0x218   :  { %v2096_v61 = vpop.f32.mrf.mxu1 }
 0x219   :  { %v2097_v62 = vadd.f32 %v2096_v61, %v2023_v60  ;;  %v2322_v0 = vpop.f32.mrf.mxu0 }
 0x21a   :  { %v10280_v2 = vpop.f32.mrf.mxu1 }
 0x21b   :  { %v10295_v3 = vpop.f32.mrf.mxu0  ;;  %v2171_v4 = vadd.f32 %v2170_v57, %v2097_v62 }
 0x21d   :  { %v2242_v8 = vpop.f32.mrf.mxu1 }
 0x21e   :  { %v11639_v10 = vadd.f32 %v2242_v8, %v2171_v4  ;;  %v2472_v5 = vpop.f32.mrf.mxu0 }
 0x21f   :  { %v10290_v11 = vpop.f32.mrf.mxu1 }
 0x220   :  { %v10305_v9 = vpop.f32.mrf.mxu0  ;;  %v5396_v13 = vsel %vm1795_vm2, %v11639_v10, -inf }
 0x221   :  { %5397 = vmax.xlane.f32.xlu0 %v5396_v13 }
 0x222   :  { %v2398_v15 = vpop.f32.mrf.mxu1  ;;  %v2620_v16 = vpop.f32.mrf.mxu0 }
 0x223   :  { %v2399_v63 = vadd.f32 %v2398_v15, %v2322_v0 }
 0x224   :  { %v10300_v1 = vpop.f32.mrf.mxu1  ;;  %v10315_v17 = vpop.f32.mrf.mxu0 }
 0x225   :  { %v2473_v18 = vadd.f32 %v2472_v5, %v2399_v63 }
 0x226   :  { %v2546_v19 = vpop.f32.mrf.mxu1 }
 0x227   :  { %v2547_v6 = vadd.f32 %v2546_v19, %v2473_v18 }
 0x228   :  { %v10310_v20 = vpop.f32.mrf.mxu1 }
 0x229   :  { %v2621_v21 = vadd.f32 %v2620_v16, %v2547_v6 }
 0x22a   :  { %v2692_v22 = vpop.f32.mrf.mxu1 }
 0x22b   :  { %v11643_v23 = vadd.f32 %v2692_v22, %v2621_v21 }
 0x22c   :  { %v10320_v24 = vpop.f32.mrf.mxu1 }
 0x22d   :  { %v5399_v7 = vsel %vm1795_vm2, %v11643_v23, -inf }
 0x22e   :  { %5400 = vmax.xlane.f32.xlu1 %v5399_v7 }
 0x287   :  { %v2848_v25 = vpop.f32.mrf.mxu1 }
 0x288   :  { %v2772_v26 = vpop.f32.mrf.mxu0 }
 0x289   :  { %v10330_v27 = vpop.f32.mrf.mxu1  ;;  %v2849_v29 = vadd.f32 %v2848_v25, %v2772_v26 }
 0x28a   :  { %v10325_v28 = vpop.f32.mrf.mxu0 }
 0x28b   :  { %v2996_v12 = vpop.f32.mrf.mxu1 }
 0x28c   :  { %v2922_v30 = vpop.f32.mrf.mxu0 }
 0x28d   :  { %v2923_v31 = vadd.f32 %v2922_v30, %v2849_v29  ;;  %v10340_v32 = vpop.f32.mrf.mxu1 }
 0x28e   :  { %v10335_v33 = vpop.f32.mrf.mxu0 }
 0x28f   :  { %v3142_v34 = vpop.f32.mrf.mxu1  ;;  %v2997_v35 = vadd.f32 %v2996_v12, %v2923_v31 }
 0x290   :  { %v3070_v37 = vpop.f32.mrf.mxu0 }
 0x291   :  { %v3071_v38 = vadd.f32 %v3070_v37, %v2997_v35  ;;  %v10350_v39 = vpop.f32.mrf.mxu1 }
 0x292   :  { %v10345_v41 = vpop.f32.mrf.mxu0 }
 0x293   :  { %v3298_v42 = vpop.f32.mrf.mxu1  ;;  %v11647_v44 = vadd.f32 %v3142_v34, %v3071_v38 }
 0x294   :  { %v3222_v45 = vpop.f32.mrf.mxu0 }
 0x295   :  { %v10360_v47 = vpop.f32.mrf.mxu1  ;;  %v5402_v48 = vsel %vm1795_vm2, %v11647_v44, -inf  ;;  %v3299_v51 = vadd.f32 %v3298_v42, %v3222_v45 }
 0x296   :  { %5403 = vmax.xlane.f32.xlu0 %v5402_v48  ;;  %v10355_v49 = vpop.f32.mrf.mxu0 }
 0x297   :  { %v3446_v52 = vpop.f32.mrf.mxu1 }
 0x298   :  { %v3372_v53 = vpop.f32.mrf.mxu0 }
 0x299   :  { %v3373_v54 = vadd.f32 %v3372_v53, %v3299_v51  ;;  %v10370_v55 = vpop.f32.mrf.mxu1 }
 0x29a   :  { %v10365_v56 = vpop.f32.mrf.mxu0 }
 0x29b   :  { %v3592_v57 = vpop.f32.mrf.mxu1  ;;  %v3447_v58 = vadd.f32 %v3446_v52, %v3373_v54 }
 0x29c   :  { %v3520_v59 = vpop.f32.mrf.mxu0 }
 0x29d   :  { %v3521_v60 = vadd.f32 %v3520_v59, %v3447_v58  ;;  %v10380_v61 = vpop.f32.mrf.mxu1 }
 0x29e   :  { %v10375_v62 = vpop.f32.mrf.mxu0 }
 0x29f   :  { %v3748_v0 = vpop.f32.mrf.mxu1  ;;  %v11651_v2 = vadd.f32 %v3592_v57, %v3521_v60 }
 0x2a0   :  { %v3672_v3 = vpop.f32.mrf.mxu0 }
 0x2a1   :  { %v10390_v4 = vpop.f32.mrf.mxu1  ;;  %v5405_v8 = vsel %vm1795_vm2, %v11651_v2, -inf  ;;  %v3749_v11 = vadd.f32 %v3748_v0, %v3672_v3 }
 0x2a2   :  { %5406 = vmax.xlane.f32.xlu0 %v5405_v8  ;;  %v10385_v5 = vpop.f32.mrf.mxu0 }
 0x2a3   :  { %v3896_v9 = vpop.f32.mrf.mxu1 }
 0x2a4   :  { %v3822_v13 = vpop.f32.mrf.mxu0 }
 0x2a5   :  { %v3823_v15 = vadd.f32 %v3822_v13, %v3749_v11  ;;  %v10400_v16 = vpop.f32.mrf.mxu1 }
 0x2a6   :  { %v10395_v63 = vpop.f32.mrf.mxu0 }
 0x2a7   :  { %v4042_v1 = vpop.f32.mrf.mxu1  ;;  %v3897_v17 = vadd.f32 %v3896_v9, %v3823_v15 }
 0x2a8   :  { %v3970_v18 = vpop.f32.mrf.mxu0 }
 0x2a9   :  { %v3971_v19 = vadd.f32 %v3970_v18, %v3897_v17  ;;  %v10410_v6 = vpop.f32.mrf.mxu1 }
 0x2aa   :  { %v10405_v20 = vpop.f32.mrf.mxu0  ;;  %v5398_v26 = vpop.xlane.xlu0 %5397 }
 0x2ab   :  { %v4198_v21 = vpop.f32.mrf.mxu1  ;;  %v11655_v22 = vadd.f32 %v4042_v1, %v3971_v19  ;;  %v5420_v30 = vsub.f32 %v11639_v10, %v5398_v26 }
 0x2ac   :  { %v4122_v24 = vpop.f32.mrf.mxu0 }
 0x2ad   :  { %v10420_v7 = vpop.f32.mrf.mxu1  ;;  %v5408_v25 = vsel %vm1795_vm2, %v11655_v22, -inf  ;;  %v4199_v28 = vadd.f32 %v4198_v21, %v4122_v24  ;;  %v5428_v38 = vmul.f32 1.442695, %v5420_v30 }
 0x2ae   :  { %5409 = vmax.xlane.f32.xlu1 %v5408_v25  ;;  %v10415_v27 = vpop.f32.mrf.mxu0 }
 0x2af   :  { %v4346_v29 = vpop.f32.mrf.mxu1  ;;  %10822 = vpow2.f32 %v5428_v38 }
 0x2b0   :  { %v4272_v12 = vpop.f32.mrf.mxu0 }
 0x2b1   :  { %v4273_v31 = vadd.f32 %v4272_v12, %v4199_v28  ;;  %v10430_v32 = vpop.f32.mrf.mxu1 }
 0x2b2   :  { %v10425_v33 = vpop.f32.mrf.mxu0 }
 0x2b3   :  { %v4492_v34 = vpop.f32.mrf.mxu1  ;;  %v4347_v35 = vadd.f32 %v4346_v29, %v4273_v31 }
 0x2b4   :  { %v4420_v37 = vpop.f32.mrf.mxu0 }
 0x2b5   :  { %v4421_v39 = vadd.f32 %v4420_v37, %v4347_v35  ;;  %v10440_v41 = vpop.f32.mrf.mxu1 }
 0x2b6   :  { %v10435_v42 = vpop.f32.mrf.mxu0 }
 0x2b7   :  { %v4648_v45 = vpop.f32.mrf.mxu1  ;;  %v11660_v47 = vadd.f32 %v4492_v34, %v4421_v39  ;;  %v5401_v10 = vpop.xlane.xlu1 %5400 }
 0x2b8   :  { %v4572_v48 = vpop.f32.mrf.mxu0  ;;  %v5421_v56 = vsub.f32 %v11643_v23, %v5401_v10 }
 0x2b9   :  { %v10450_v49 = vpop.f32.mrf.mxu1  ;;  %v5411_v51 = vsel %vm1795_vm2, %v11660_v47, -inf  ;;  %v4649_v53 = vadd.f32 %v4648_v45, %v4572_v48 }
 0x2ba   :  { %5412 = vmax.xlane.f32.xlu0 %v5411_v51  ;;  %v10445_v52 = vpop.f32.mrf.mxu0  ;;  %v5430_v0 = vmul.f32 1.442695, %v5421_v56 }
 0x2bb   :  { %v4796_v54 = vpop.f32.mrf.mxu1 }
 0x2bc   :  { %v4722_v55 = vpop.f32.mrf.mxu0  ;;  %10824 = vpow2.f32 %v5430_v0  ;;  %v10823_v16 = vpop.eup %10822 }
 0x2bd   :  { %v4723_v57 = vadd.f32 %v4722_v55, %v4649_v53  ;;  %v10460_v58 = vpop.f32.mrf.mxu1  ;;  %v5444_v6 = vsel %vm1795_vm2, %v10823_v16, 0.0  ;;  %v5967_v55 = vand.u32 4294901760, %v11412_v14 }
 0x2be   :  { %v10455_v59 = vpop.f32.mrf.mxu0 }
 0x2bf   :  { %v4942_v60 = vpop.f32.mrf.mxu1  ;;  %v4797_v61 = vadd.f32 %v4796_v54, %v4723_v57 }
 0x2c0   :  { %v4870_v62 = vpop.f32.mrf.mxu0 }
 0x2c1   :  { %v4871_v3 = vadd.f32 %v4870_v62, %v4797_v61  ;;  %v10470_v4 = vpop.f32.mrf.mxu1 }
 0x2c2   :  { %v10465_v8 = vpop.f32.mrf.mxu0 }
 0x2c3   :  { %v5098_v5 = vpop.f32.mrf.mxu1  ;;  %v4943_v11 = vadd.f32 %v4942_v60, %v4871_v3 }
 0x2c4   :  { %v5022_v9 = vpop.f32.mrf.mxu0 }
 0x2c5   :  { %v10480_v13 = vpop.f32.mrf.mxu1  ;;  %v5414_v15 = vsel %vm1795_vm2, %v4943_v11, -inf  ;;  %v5099_v63 = vadd.f32 %v5098_v5, %v5022_v9 }
 0x2c6   :  { %5415 = vmax.xlane.f32.xlu1 %v5414_v15  ;;  %v10475_v23 = vpop.f32.mrf.mxu0 }
 0x2c7   :  { %v5246_v1 = vpop.f32.mrf.mxu1 }
 0x2c8   :  { %v5172_v17 = vpop.f32.mrf.mxu0 }
 0x2c9   :  { %v5173_v18 = vadd.f32 %v5172_v17, %v5099_v63  ;;  %v10490_v19 = vpop.f32.mrf.mxu1  ;;  %v11671_v12 = vpop.eup %10824 }
 0x2ca   :  { %5445 = vadd.xlane.f32.xlu1 %v5444_v6  ;;  %v10485_v20 = vpop.f32.mrf.mxu0  ;;  %v5447_v30 = vsel %vm1795_vm2, %v11671_v12, 0.0 }
 0x2cb   :  { %v5392_v21 = vpop.f32.mrf.mxu1  ;;  %v5247_v24 = vadd.f32 %v5246_v1, %v5173_v18 }
 0x2cc   :  { %v5320_v7 = vpop.f32.mrf.mxu0 }
 0x2cd   :  { %v5321_v25 = vadd.f32 %v5320_v7, %v5247_v24  ;;  %v10500_v26 = vpop.f32.mrf.mxu1 }
 0x2ce   :  { %v10495_v27 = vpop.f32.mrf.mxu0 }
 0x2cf   :  { %v11667_v28 = vadd.f32 %v5392_v21, %v5321_v25 }
 0x2d1   :  { %v5417_v29 = vsel %vm1795_vm2, %v11667_v28, -inf }
 0x2d2   :  { %5418 = vmax.xlane.f32.xlu0 %v5417_v29 }
 0x2d6   :  { %5448 = vadd.xlane.f32.xlu0 %v5447_v30 }
 0x31f   :  { %v5404_v31 = vpop.xlane.xlu0 %5403 }
 0x320   :  { %v5422_v32 = vsub.f32 %v11647_v44, %v5404_v31 }
 0x322   :  { %v5432_v33 = vmul.f32 1.442695, %v5422_v32 }
 0x324   :  { %10826 = vpow2.f32 %v5432_v33 }
 0x32b   :  { %v5407_v34 = vpop.xlane.xlu0 %5406 }
 0x32c   :  { %v5423_v35 = vsub.f32 %v11651_v2, %v5407_v34 }
 0x32e   :  { %v5434_v37 = vmul.f32 1.442695, %v5423_v35 }
 0x330   :  { %10828 = vpow2.f32 %v5434_v37 }
 0x331   :  { %v11677_v38 = vpop.eup %10826 }
 0x332   :  { %v5450_v39 = vsel %vm1795_vm2, %v11677_v38, 0.0 }
 0x333   :  { %5451 = vadd.xlane.f32.xlu1 %v5450_v39 }
 0x337   :  { %v5410_v44 = vpop.xlane.xlu1 %5409 }
 0x338   :  { %v5424_v2 = vsub.f32 %v11655_v22, %v5410_v44 }
 0x33a   :  { %v5436_v49 = vmul.f32 1.442695, %v5424_v2 }
 0x33d   :  { %v11681_v41 = vpop.eup %10828 }
 0x33e   :  { %v5453_v42 = vsel %vm1795_vm2, %v11681_v41, 0.0 }
 0x33f   :  { %5454 = vadd.xlane.f32.xlu0 %v5453_v42 }
 0x343   :  { %v5413_v48 = vpop.xlane.xlu0 %5412 }
 0x344   :  { %1779 = vrot.lane.b32.xlu1 %v11412_v14, %s10995_s16  ;;  %v5425_v51 = vsub.f32 %v11660_v47, %v5413_v48  ;;  %v11695_v47 = vsub.f32 %v11412_v14, %v5967_v55 }
 0x346   :  { %v5438_v52 = vmul.f32 1.442695, %v5425_v51  ;;  %v6045_v0 = vand.u32 4294901760, %v11695_v47 }
 0x34f   :  { %v5416_v45 = vpop.xlane.xlu1 %5415 }
 0x350   :  { %v5426_v54 = vsub.f32 %v4943_v11, %v5416_v45  ;;  %v6046_v11 = vsub.f32 %v11695_v47, %v6045_v0 }
 0x352   :  { %v5440_v22 = vmul.f32 1.442695, %v5426_v54 }
 0x353   :  { %v5446_v10 = vpop.xlane.xlu1 %5445 }
 0x354   :  { %10830 = vrcp.f32 %v5446_v10 }
 0x355   :  { %1777 = vrot.lane.b32.xlu0 %v11569_v36, %s10995_s16  ;;  %10832 = vpow2.f32 %v5436_v49 }
 0x356   :  { %10834 = vpow2.f32 %v5438_v52 }
 0x35b   :  { %v11691_v53 = vpop.xlane.xlu0 %5418 }
 0x35f   :  { %v5449_v56 = vpop.xlane.xlu0 %5448 }
 0x360   :  { %10836 = vrcp.f32 %v5449_v56 }
 0x361   :  { %v10831_v57 = vpop.eup %10830  ;;  %10838 = vpow2.f32 %v5440_v22 }
 0x362   :  { %v5469_v58 = vmul.f32 %v10831_v57, %v10823_v16  ;;  %v11697_v59 = vpop.eup %10832  ;;  %v6047_v16 = vand.u32 4294901760, %v6046_v11 }
 0x363   :  { %v5456_v62 = vsel %vm1795_vm2, %v11697_v59, 0.0  ;;  %v11703_v3 = vpop.eup %10834 }
 0x364   :  { %v5485_v60 = vsel %vm1795_vm2, %v5469_v58, 0  ;;  %v5459_v5 = vsel %vm1795_vm2, %v11703_v3, 0.0 }
 0x365   :  { %v5553_v61 = vand.u32 4294901760, %v5485_v60 }
 0x367   :  { %v5554_v4 = vsub.f32 %v5485_v60, %v5553_v61  ;;  %10509 = vmatmul.mubr.f32.vlgmr.msra.gmra.mxu1 %v5553_v61 }
 0x368   :  { %5457 = vadd.xlane.f32.xlu1 %v5456_v62  ;;  %10517 = vmatpush3.msra.mxu1 %v11582_v40 }
 0x369   :  { %10518 = vmatprep.mubr.msk.f32.mxu1 %vm10994_vm1, %v10993_v50  ;;  %10526 = vmatprep.subr.mxu1 %v10993_v50  ;;  %v5555_v8 = vand.u32 4294901760, %v5554_v4 }
 0x36b   :  { %10519 = vmatmul.mubr.f32.vlgmr.msra.gmra.mxu1 %v5555_v8  ;;  %v5556_v9 = vsub.f32 %v5554_v4, %v5555_v8 }
 0x36c   :  { %5460 = vadd.xlane.f32.xlu1 %v5459_v5  ;;  %10527 = vmatpush3.msra.mxu1 %v11582_v40 }
 0x36d   :  { %10528 = vmatprep.mubr.msk.f32.mxu1 %vm10994_vm1, %v10993_v50  ;;  %v10837_v13 = vpop.eup %10836  ;;  %10536 = vmatprep.subr.mxu1 %v10993_v50  ;;  %v5557_v15 = vand.u32 4294901760, %v5556_v9 }
 0x36e   :  { %v5471_v23 = vmul.f32 %v10837_v13, %v11671_v12  ;;  %v11719_v1 = vpop.eup %10838 }
 0x36f   :  { %10504 = vmatmul.mubr.f32.vlgmr.msra.gmra.mxu0 %v5557_v15  ;;  %10529 = vmatmul.mubr.f32.vlgmr.msra.gmra.mxu1 %v5553_v61  ;;  %v5462_v18 = vsel %vm1795_vm2, %v11719_v1, 0.0 }
 0x370   :  { %10512 = vmatpush3.msra.mxu0 %v11594_v43  ;;  %10537 = vmatpush3.msra.mxu1 %v6047_v16  ;;  %v5934_v63 = vsel %vm1795_vm2, %v5471_v23, 0 }
 0x371   :  { %10513 = vmatprep.mubr.msk.f32.mxu0 %vm10994_vm1, %v10993_v50  ;;  %10521 = vmatprep.subr.mxu0 %v10993_v50  ;;  %v6002_v40 = vand.u32 4294901760, %v5934_v63 }
 0x372   :  { %10538 = vmatprep.mubr.msk.f32.mxu1 %vm10994_vm1, %v10993_v50  ;;  %10546 = vmatprep.subr.mxu1 %v10993_v50 }
 0x373   :  { %10514 = vmatmul.mubr.f32.vlgmr.msra.gmra.mxu0 %v5554_v4  ;;  %v6003_v17 = vsub.f32 %v5934_v63, %v6002_v40  ;;  %10539 = vmatmul.mubr.f32.vlgmr.msra.gmra.mxu1 %v6002_v40 }
 0x374   :  { %10522 = vmatpush3.msra.mxu0 %v5596_v46  ;;  %10547 = vmatpush3.msra.mxu1 %v5967_v55  ;;  %v5427_v46 = vsub.f32 %v11667_v28, %v11691_v53 }
 0x375   :  { %5463 = vadd.xlane.f32.xlu0 %v5462_v18  ;;  %10523 = vmatprep.mubr.msk.f32.mxu0 %vm10994_vm1, %v10993_v50  ;;  %v6004_v19 = vand.u32 4294901760, %v6003_v17 }
 0x376   :  { %10531 = vmatprep.subr.mxu0 %v10993_v50  ;;  %10548 = vmatprep.mubr.msk.f32.mxu1 %vm10994_vm1, %v10993_v50  ;;  %v5442_v20 = vmul.f32 1.442695, %v5427_v46 }
 0x377   :  { %10556 = vmatprep.subr.mxu1 %v10993_v50  ;;  %10524 = vmatmul.mubr.f32.vlgmr.msra.gmra.mxu0 %v5553_v61  ;;  %v6005_v6 = vsub.f32 %v6003_v17, %v6004_v19 }
 0x378   :  { %10532 = vmatpush3.msra.mxu0 %v5967_v55  ;;  %10549 = vmatmul.mubr.f32.vlgmr.msra.gmra.mxu1 %v6004_v19  ;;  %10840 = vpow2.f32 %v5442_v20 }
 0x379   :  { %10557 = vmatpush3.msra.mxu1 %v5967_v55  ;;  %10533 = vmatprep.mubr.msk.f32.mxu0 %vm10994_vm1, %v10993_v50  ;;  %v6006_v43 = vand.u32 4294901760, %v6005_v6 }
 0x37a   :  { %10541 = vmatprep.subr.mxu0 %v10993_v50  ;;  %10558 = vmatprep.mubr.msk.f32.mxu1 %vm10994_vm1, %v10993_v50 }
 0x37b   :  { %10534 = vmatmul.mubr.f32.vlgmr.msra.gmra.mxu0 %v6006_v43  ;;  %10566 = vmatprep.subr.mxu1 %v10993_v50 }
 0x37c   :  { %10542 = vmatpush3.msra.mxu0 %v11695_v47  ;;  %10559 = vmatmul.mubr.f32.vlgmr.msra.gmra.mxu1 %v6002_v40 }
 0x37d   :  { %1783 = vrot.lane.b32.xlu1 %v11569_v36, %s10996_s17  ;;  %10543 = vmatprep.mubr.msk.f32.mxu0 %vm10994_vm1, %v10993_v50 }
 0x37e   :  { %10551 = vmatprep.subr.mxu0 %v10993_v50  ;;  %10568 = vmatprep.mubr.msk.f32.mxu1 %vm10994_vm1, %v10993_v50 }
 0x37f   :  { %10544 = vmatmul.mubr.f32.vlgmr.msra.gmra.mxu0 %v6003_v17 }
 0x380   :  { %10552 = vmatpush3.msra.mxu0 %v6045_v0  ;;  %10553 = vmatprep.mubr.msk.f32.mxu0 %vm10994_vm1, %v10993_v50 }
 0x381   :  { %10561 = vmatprep.subr.mxu0 %v10993_v50 }
 0x383   :  { %10554 = vmatmul.mubr.f32.vlgmr.msra.gmra.mxu0 %v6002_v40 }
 0x384   :  { %10563 = vmatprep.mubr.msk.f32.mxu0 %vm10994_vm1, %v10993_v50 }
 0x385   :  { %v11762_v21 = vpop.eup %10840 }
 0x386   :  { %v5465_v24 = vsel %vm1795_vm2, %v11762_v21, 0.0 }
 0x38b   :  { %1785 = vrot.lane.b32.xlu0 %v11412_v14, %s10996_s17 }
 0x38f   :  { %1791 = vrot.lane.b32.xlu0 %v11412_v14, %s10997_s18 }
 0x3a1   :  { %5466 = vadd.xlane.f32.xlu1 %v5465_v24 }
 0x3b2   :  { %1789 = vrot.lane.b32.xlu1 %v11569_v36, %s10997_s18 }
 0x3bc   :  { %v5452_v7 = vpop.xlane.xlu1 %5451 }
 0x3bd   :  { %10842 = vrcp.f32 %v5452_v7 }
 0x3c0   :  { %v1780_v29 = vpop.permute.xlu1 %1779 }
 0x3c1   :  { %v6865_v32 = vand.u32 4294901760, %v1780_v29 }
 0x3c3   :  { %v6942_v37 = vsub.f32 %v1780_v29, %v6865_v32 }
 0x3c5   :  { %v6943_v45 = vand.u32 4294901760, %v6942_v37 }
 0x3c8   :  { %v5455_v25 = vpop.xlane.xlu0 %5454 }
 0x3c9   :  { %10844 = vrcp.f32 %v5455_v25 }
 0x3ca   :  { %v10843_v26 = vpop.eup %10842 }
 0x3cb   :  { %v5473_v27 = vmul.f32 %v10843_v26, %v11677_v38 }
 0x3cc   :  { %v1778_v28 = vpop.permute.xlu0 %1777 }
 0x3cd   :  { %v6416_v14 = vand.u32 4294901760, %v1778_v28  ;;  %v6383_v12 = vsel %vm1795_vm2, %v5473_v27, 0 }
 0x3ce   :  { %v6451_v30 = vand.u32 4294901760, %v6383_v12 }
 0x3cf   :  { %v6493_v31 = vsub.f32 %v1778_v28, %v6416_v14  ;;  %10562 = vmatpush3.msra.mxu0 %v6416_v14 }
 0x3d0   :  { %10571 = vmatprep.subr.mxu0 %v10993_v50  ;;  %v6452_v33 = vsub.f32 %v6383_v12, %v6451_v30 }
 0x3d1   :  { %v6494_v36 = vand.u32 4294901760, %v6493_v31 }
 0x3d2   :  { %v6453_v34 = vand.u32 4294901760, %v6452_v33 }
 0x3d3   :  { %v6495_v35 = vsub.f32 %v6493_v31, %v6494_v36 }
 0x3d4   :  { %v6454_v39 = vsub.f32 %v6452_v33, %v6453_v34 }
 0x3d5   :  { %v6496_v42 = vand.u32 4294901760, %v6495_v35 }
 0x3d6   :  { %v10845_v44 = vpop.eup %10844  ;;  %v6455_v38 = vand.u32 4294901760, %v6454_v39 }
 0x3d7   :  { %v5475_v2 = vmul.f32 %v10845_v44, %v11681_v41  ;;  %10567 = vmatpush3.msra.mxu1 %v6496_v42  ;;  %v6944_v41 = vsub.f32 %v6942_v37, %v6943_v45 }
 0x3d8   :  { %10564 = vmatmul.mubr.f32.vlgmr.msra.gmra.mxu0 %v6455_v38  ;;  %10569 = vmatmul.mubr.f32.vlgmr.msra.gmra.mxu1 %v6451_v30 }
 0x3d9   :  { %10572 = vmatpush3.msra.mxu0 %v6493_v31  ;;  %10576 = vmatprep.subr.mxu1 %v10993_v50  ;;  %v6832_v48 = vsel %vm1795_vm2, %v5475_v2, 0  ;;  %v6945_v52 = vand.u32 4294901760, %v6944_v41 }
 0x3da   :  { %10577 = vmatpush3.msra.mxu1 %v6416_v14  ;;  %10573 = vmatprep.mubr.msk.f32.mxu0 %vm10994_vm1, %v10993_v50  ;;  %v6900_v49 = vand.u32 4294901760, %v6832_v48 }
 0x3db   :  { %10578 = vmatprep.mubr.msk.f32.mxu1 %vm10994_vm1, %v10993_v50  ;;  %10581 = vmatprep.subr.mxu0 %v10993_v50 }
 0x3dc   :  { %10586 = vmatprep.subr.mxu1 %v10993_v50  ;;  %10574 = vmatmul.mubr.f32.vlgmr.msra.gmra.mxu0 %v6452_v33  ;;  %v6901_v51 = vsub.f32 %v6832_v48, %v6900_v49 }
 0x3dd   :  { %10579 = vmatmul.mubr.f32.vlgmr.msra.gmra.mxu1 %v6453_v34  ;;  %10582 = vmatpush3.msra.mxu0 %v6494_v36 }
 0x3de   :  { %10587 = vmatpush3.msra.mxu1 %v6416_v14  ;;  %10583 = vmatprep.mubr.msk.f32.mxu0 %vm10994_vm1, %v10993_v50  ;;  %v6902_v10 = vand.u32 4294901760, %v6901_v51 }
 0x3df   :  { %10588 = vmatprep.mubr.msk.f32.mxu1 %vm10994_vm1, %v10993_v50  ;;  %10591 = vmatprep.subr.mxu0 %v10993_v50 }
 0x3e0   :  { %10596 = vmatprep.subr.mxu1 %v10993_v50  ;;  %10584 = vmatmul.mubr.f32.vlgmr.msra.gmra.mxu0 %v6451_v30  ;;  %v6903_v53 = vsub.f32 %v6901_v51, %v6902_v10 }
 0x3e1   :  { %10589 = vmatmul.mubr.f32.vlgmr.msra.gmra.mxu1 %v6451_v30  ;;  %10592 = vmatpush3.msra.mxu0 %v6865_v32 }
 0x3e2   :  { %10597 = vmatpush3.msra.mxu1 %v6945_v52  ;;  %10593 = vmatprep.mubr.msk.f32.mxu0 %vm10994_vm1, %v10993_v50  ;;  %v6904_v54 = vand.u32 4294901760, %v6903_v53 }
 0x3e3   :  { %10598 = vmatprep.mubr.msk.f32.mxu1 %vm10994_vm1, %v10993_v50  ;;  %10601 = vmatprep.subr.mxu0 %v10993_v50 }
 0x3e4   :  { %10606 = vmatprep.subr.mxu1 %v10993_v50  ;;  %10594 = vmatmul.mubr.f32.vlgmr.msra.gmra.mxu0 %v6904_v54 }
 0x3e5   :  { %10599 = vmatmul.mubr.f32.vlgmr.msra.gmra.mxu1 %v6900_v49  ;;  %10602 = vmatpush3.msra.mxu0 %v6942_v37 }
 0x3e6   :  { %10607 = vmatpush3.msra.mxu1 %v6865_v32  ;;  %10603 = vmatprep.mubr.msk.f32.mxu0 %vm10994_vm1, %v10993_v50 }
 0x3e7   :  { %10608 = vmatprep.mubr.msk.f32.mxu1 %vm10994_vm1, %v10993_v50  ;;  %10611 = vmatprep.subr.mxu0 %v10993_v50 }
 0x3e8   :  { %10616 = vmatprep.subr.mxu1 %v10993_v50  ;;  %10604 = vmatmul.mubr.f32.vlgmr.msra.gmra.mxu0 %v6901_v51 }
 0x3e9   :  { %10609 = vmatmul.mubr.f32.vlgmr.msra.gmra.mxu1 %v6902_v10  ;;  %10612 = vmatpush3.msra.mxu0 %v6943_v45 }
 0x3ea   :  { %10617 = vmatpush3.msra.mxu1 %v6865_v32  ;;  %10613 = vmatprep.mubr.msk.f32.mxu0 %vm10994_vm1, %v10993_v50 }
 0x3eb   :  { %10618 = vmatprep.mubr.msk.f32.mxu1 %vm10994_vm1, %v10993_v50  ;;  %10621 = vmatprep.subr.mxu0 %v10993_v50 }
 0x3ec   :  { %10614 = vmatmul.mubr.f32.vlgmr.msra.gmra.mxu0 %v6900_v49  ;;  %10626 = vmatprep.subr.mxu1 %v10993_v50 }
 0x3ed   :  { %10619 = vmatmul.mubr.f32.vlgmr.msra.gmra.mxu1 %v6900_v49  ;;  %10623 = vmatprep.mubr.msk.f32.mxu0 %vm10994_vm1, %v10993_v50 }
 0x3ee   :  { %10628 = vmatprep.mubr.msk.f32.mxu1 %vm10994_vm1, %v10993_v50 }
 0x3f1   :  { %v5458_v55 = vpop.xlane.xlu1 %5457 }
 0x3f2   :  { %10846 = vrcp.f32 %v5458_v55 }
 0x3f5   :  { %v5461_v56 = vpop.xlane.xlu1 %5460 }
 0x3f6   :  { %10848 = vrcp.f32 %v5461_v56 }
 0x3f9   :  { %v1784_v22 = vpop.permute.xlu1 %1783 }
 0x3fa   :  { %v7314_v57 = vand.u32 4294901760, %v1784_v22 }
 0x3fc   :  { %v7391_v58 = vsub.f32 %v1784_v22, %v7314_v57  ;;  %10622 = vmatpush3.msra.mxu0 %v7314_v57 }
 0x3fd   :  { %10631 = vmatprep.subr.mxu0 %v10993_v50 }
 0x3fe   :  { %v7392_v47 = vand.u32 4294901760, %v7391_v58  ;;  %v5464_v61 = vpop.xlane.xlu0 %5463 }
 0x3ff   :  { %v10847_v60 = vpop.eup %10846  ;;  %10850 = vrcp.f32 %v5464_v61 }
 0x400   :  { %v7393_v62 = vsub.f32 %v7391_v58, %v7392_v47  ;;  %v5477_v0 = vmul.f32 %v10847_v60, %v11697_v59 }
 0x402   :  { %v7394_v4 = vand.u32 4294901760, %v7393_v62  ;;  %v7281_v8 = vsel %vm1795_vm2, %v5477_v0, 0  ;;  %v1786_v11 = vpop.permute.xlu0 %1785 }
 0x403   :  { %v10849_v5 = vpop.eup %10848  ;;  %v7349_v9 = vand.u32 4294901760, %v7281_v8  ;;  %v7763_v13 = vand.u32 4294901760, %v1786_v11 }
 0x404   :  { %10627 = vmatpush3.msra.mxu1 %v7394_v4  ;;  %v5479_v15 = vmul.f32 %v10849_v5, %v11703_v3 }
 0x405   :  { %v7350_v16 = vsub.f32 %v7281_v8, %v7349_v9  ;;  %10629 = vmatmul.mubr.f32.vlgmr.msra.gmra.mxu1 %v7349_v9  ;;  %10636 = vmatprep.subr.mxu1 %v10993_v50  ;;  %v7840_v23 = vsub.f32 %v1786_v11, %v7763_v13 }
 0x406   :  { %10637 = vmatpush3.msra.mxu1 %v7314_v57  ;;  %10638 = vmatprep.mubr.msk.f32.mxu1 %vm10994_vm1, %v10993_v50  ;;  %v7730_v59 = vsel %vm1795_vm2, %v5479_v15, 0  ;;  %v1792_v33 = vpop.permute.xlu0 %1791 }
 0x407   :  { %10646 = vmatprep.subr.mxu1 %v10993_v50  ;;  %v7351_v63 = vand.u32 4294901760, %v7350_v16  ;;  %v7798_v40 = vand.u32 4294901760, %v7730_v59  ;;  %v7841_v17 = vand.u32 4294901760, %v7840_v23  ;;  %v11859_v44 = vand.u32 4294901760, %v1792_v33 }
 0x409   :  { %10639 = vmatmul.mubr.f32.vlgmr.msra.gmra.mxu1 %v7351_v63  ;;  %v7352_v18 = vsub.f32 %v7350_v16, %v7351_v63  ;;  %v7842_v3 = vsub.f32 %v7840_v23, %v7841_v17  ;;  %v7799_v6 = vsub.f32 %v7730_v59, %v7798_v40  ;;  %v11866_v10 = vsub.f32 %v1792_v33, %v11859_v44 }
 0x40a   :  { %10647 = vmatpush3.msra.mxu1 %v7314_v57  ;;  %10648 = vmatprep.mubr.msk.f32.mxu1 %vm10994_vm1, %v10993_v50 }
 0x40b   :  { %10656 = vmatprep.subr.mxu1 %v10993_v50  ;;  %v7353_v19 = vand.u32 4294901760, %v7352_v18  ;;  %v7843_v43 = vand.u32 4294901760, %v7842_v3  ;;  %v7800_v46 = vand.u32 4294901760, %v7799_v6  ;;  %v8739_v60 = vand.u32 4294901760, %v11866_v10 }
 0x40c   :  { %v10851_v24 = vpop.eup %10850 }
 0x40d   :  { %10624 = vmatmul.mubr.f32.vlgmr.msra.gmra.mxu0 %v7353_v19  ;;  %10649 = vmatmul.mubr.f32.vlgmr.msra.gmra.mxu1 %v7349_v9  ;;  %v7801_v20 = vsub.f32 %v7799_v6, %v7800_v46  ;;  %v5481_v25 = vmul.f32 %v10851_v24, %v11719_v1 }
 0x40e   :  { %10632 = vmatpush3.msra.mxu0 %v7391_v58  ;;  %10657 = vmatpush3.msra.mxu1 %v7843_v43 }
 0x40f   :  { %10633 = vmatprep.mubr.msk.f32.mxu0 %vm10994_vm1, %v10993_v50  ;;  %10641 = vmatprep.subr.mxu0 %v10993_v50  ;;  %v7802_v7 = vand.u32 4294901760, %v7801_v20  ;;  %v8179_v26 = vsel %vm1795_vm2, %v5481_v25, 0 }
 0x410   :  { %10658 = vmatprep.mubr.msk.f32.mxu1 %vm10994_vm1, %v10993_v50  ;;  %10666 = vmatprep.subr.mxu1 %v10993_v50  ;;  %v11848_v1 = vand.u32 4294901760, %v8179_v26 }
 0x411   :  { %10634 = vmatmul.mubr.f32.vlgmr.msra.gmra.mxu0 %v7350_v16  ;;  %10659 = vmatmul.mubr.f32.vlgmr.msra.gmra.mxu1 %v7798_v40 }
 0x412   :  { %10642 = vmatpush3.msra.mxu0 %v7392_v47  ;;  %10667 = vmatpush3.msra.mxu1 %v7763_v13  ;;  %v11853_v27 = vsub.f32 %v8179_v26, %v11848_v1 }
 0x413   :  { %10643 = vmatprep.mubr.msk.f32.mxu0 %vm10994_vm1, %v10993_v50  ;;  %10651 = vmatprep.subr.mxu0 %v10993_v50 }
 0x414   :  { %10668 = vmatprep.mubr.msk.f32.mxu1 %vm10994_vm1, %v10993_v50  ;;  %10676 = vmatprep.subr.mxu1 %v10993_v50  ;;  %v8249_v29 = vand.u32 4294901760, %v11853_v27 }
 0x415   :  { %10644 = vmatmul.mubr.f32.vlgmr.msra.gmra.mxu0 %v7349_v9  ;;  %10669 = vmatmul.mubr.f32.vlgmr.msra.gmra.mxu1 %v7800_v46 }
 0x416   :  { %10652 = vmatpush3.msra.mxu0 %v7763_v13  ;;  %10677 = vmatpush3.msra.mxu1 %v7763_v13  ;;  %v8250_v31 = vsub.f32 %v11853_v27, %v8249_v29  ;;  %v8740_v13 = vsub.f32 %v11866_v10, %v8739_v60 }
 0x417   :  { %10653 = vmatprep.mubr.msk.f32.mxu0 %vm10994_vm1, %v10993_v50  ;;  %10661 = vmatprep.subr.mxu0 %v10993_v50 }
 0x418   :  { %10678 = vmatprep.mubr.msk.f32.mxu1 %vm10994_vm1, %v10993_v50  ;;  %10686 = vmatprep.subr.mxu1 %v10993_v50  ;;  %v8251_v42 = vand.u32 4294901760, %v8250_v31 }
 0x419   :  { %10654 = vmatmul.mubr.f32.vlgmr.msra.gmra.mxu0 %v7802_v7  ;;  %10679 = vmatmul.mubr.f32.vlgmr.msra.gmra.mxu1 %v7798_v40 }
 0x41a   :  { %10662 = vmatpush3.msra.mxu0 %v7840_v23  ;;  %10663 = vmatprep.mubr.msk.f32.mxu0 %vm10994_vm1, %v10993_v50 }
 0x41b   :  { %10671 = vmatprep.subr.mxu0 %v10993_v50  ;;  %10688 = vmatprep.mubr.msk.f32.mxu1 %vm10994_vm1, %v10993_v50 }
 0x41d   :  { %10664 = vmatmul.mubr.f32.vlgmr.msra.gmra.mxu0 %v7799_v6 }
 0x41e   :  { %10672 = vmatpush3.msra.mxu0 %v7841_v17  ;;  %10673 = vmatprep.mubr.msk.f32.mxu0 %vm10994_vm1, %v10993_v50  ;;  %v8741_v17 = vand.u32 4294901760, %v8740_v13 }
 0x41f   :  { %10681 = vmatprep.subr.mxu0 %v10993_v50 }
 0x421   :  { %10674 = vmatmul.mubr.f32.vlgmr.msra.gmra.mxu0 %v7798_v40 }
 0x422   :  { %10683 = vmatprep.mubr.msk.f32.mxu0 %vm10994_vm1, %v10993_v50 }
 0x427   :  { %v5635_v28 = vpop.f32.mrf.mxu1 }
 0x429   :  { %v10510_v14 = vpop.f32.mrf.mxu1 }
 0x42a   :  { %v5467_v12 = vpop.xlane.xlu1 %5466 }
 0x42b   :  { %10852 = vrcp.f32 %v5467_v12  ;;  %v5783_v30 = vpop.f32.mrf.mxu1 }
 0x42d   :  { %v10520_v32 = vpop.f32.mrf.mxu1 }
 0x42e   :  { %v1790_v36 = vpop.permute.xlu1 %1789 }
 0x42f   :  { %v8212_v34 = vand.u32 4294901760, %v1790_v36  ;;  %v5559_v35 = vpop.f32.mrf.mxu0  ;;  %v5929_v37 = vpop.f32.mrf.mxu1 }
 0x430   :  { %v5636_v39 = vadd.f32 %v5635_v28, %v5559_v35 }
 0x431   :  { %v8289_v38 = vsub.f32 %v1790_v36, %v8212_v34  ;;  %v10505_v2 = vpop.f32.mrf.mxu0  ;;  %v10530_v45 = vpop.f32.mrf.mxu1  ;;  %10682 = vmatpush3.msra.mxu0 %v8212_v34 }
 0x432   :  { %10684 = vmatmul.mubr.f32.vlgmr.msra.gmra.mxu0 %v8251_v42  ;;  %10691 = vmatprep.subr.mxu0 %v10993_v50 }
 0x433   :  { %v8290_v48 = vand.u32 4294901760, %v8289_v38  ;;  %v5709_v49 = vpop.f32.mrf.mxu0  ;;  %v6084_v41 = vpop.f32.mrf.mxu1  ;;  %10692 = vmatpush3.msra.mxu0 %v8289_v38  ;;  %10693 = vmatprep.mubr.msk.f32.mxu0 %vm10994_vm1, %v10993_v50 }
 0x434   :  { %v5710_v51 = vadd.f32 %v5709_v49, %v5636_v39  ;;  %10701 = vmatprep.subr.mxu0 %v10993_v50 }
 0x435   :  { %v8291_v52 = vsub.f32 %v8289_v38, %v8290_v48  ;;  %v10515_v53 = vpop.f32.mrf.mxu0  ;;  %v10540_v54 = vpop.f32.mrf.mxu1 }
 0x436   :  { %10694 = vmatmul.mubr.f32.vlgmr.msra.gmra.mxu0 %v11853_v27  ;;  %v5784_v55 = vadd.f32 %v5783_v30, %v5710_v51 }
 0x437   :  { %v8292_v56 = vand.u32 4294901760, %v8291_v52  ;;  %10702 = vmatpush3.msra.mxu0 %v8290_v48  ;;  %v5857_v22 = vpop.f32.mrf.mxu0  ;;  %10703 = vmatprep.mubr.msk.f32.mxu0 %vm10994_vm1, %v10993_v50 }
 0x438   :  { %v10853_v57 = vpop.eup %10852  ;;  %v5858_v58 = vadd.f32 %v5857_v22, %v5784_v55  ;;  %v6232_v47 = vpop.f32.mrf.mxu1  ;;  %10711 = vmatprep.subr.mxu0 %v10993_v50 }
 0x439   :  { %v5483_v61 = vmul.f32 %v10853_v57, %v11762_v21  ;;  %v10525_v62 = vpop.f32.mrf.mxu0  ;;  %10687 = vmatpush3.msra.mxu1 %v8292_v56 }
 0x43a   :  { %v11874_v0 = vadd.f32 %v5929_v37, %v5858_v58  ;;  %v10550_v4 = vpop.f32.mrf.mxu1  ;;  %10689 = vmatmul.mubr.f32.vlgmr.msra.gmra.mxu1 %v11848_v1  ;;  %10696 = vmatprep.subr.mxu1 %v10993_v50 }
 0x43b   :  { %10704 = vmatmul.mubr.f32.vlgmr.msra.gmra.mxu0 %v11848_v1  ;;  %v6008_v8 = vpop.f32.mrf.mxu0  ;;  %10697 = vmatpush3.msra.mxu1 %v8212_v34  ;;  %v8628_v5 = vsel %vm1795_vm2, %v5483_v61, 0 }
 0x43c   :  { %10712 = vmatpush3.msra.mxu0 %v11859_v44  ;;  %v6085_v11 = vadd.f32 %v6084_v41, %v6008_v8  ;;  %v6378_v9 = vpop.f32.mrf.mxu1  ;;  %10698 = vmatprep.mubr.msk.f32.mxu1 %vm10994_vm1, %v10993_v50  ;;  %v8696_v21 = vand.u32 4294901760, %v8628_v5 }
 0x43d   :  { %v10535_v15 = vpop.f32.mrf.mxu0  ;;  %10706 = vmatprep.subr.mxu1 %v10993_v50  ;;  %10713 = vmatprep.mubr.msk.f32.mxu0 %vm10994_vm1, %v10993_v50 }
 0x43e   :  { %v10560_v16 = vpop.f32.mrf.mxu1  ;;  %10699 = vmatmul.mubr.f32.vlgmr.msra.gmra.mxu1 %v8249_v29  ;;  %10721 = vmatprep.subr.mxu0 %v10993_v50  ;;  %v8697_v23 = vsub.f32 %v8628_v5, %v8696_v21 }
 0x43f   :  { %10707 = vmatpush3.msra.mxu1 %v8212_v34  ;;  %v6158_v59 = vpop.f32.mrf.mxu0  ;;  %10708 = vmatprep.mubr.msk.f32.mxu1 %vm10994_vm1, %v10993_v50 }
 0x440   :  { %v6159_v63 = vadd.f32 %v6158_v59, %v6085_v11  ;;  %10716 = vmatprep.subr.mxu1 %v10993_v50  ;;  %v8698_v40 = vand.u32 4294901760, %v8697_v23 }
 0x441   :  { %v10545_v18 = vpop.f32.mrf.mxu0 }
 0x442   :  { %10709 = vmatmul.mubr.f32.vlgmr.msra.gmra.mxu1 %v11848_v1  ;;  %v6233_v3 = vadd.f32 %v6232_v47, %v6159_v63  ;;  %v8699_v19 = vsub.f32 %v8697_v23, %v8698_v40 }
 0x443   :  { %10717 = vmatpush3.msra.mxu1 %v8741_v17  ;;  %v6306_v6 = vpop.f32.mrf.mxu0  ;;  %10718 = vmatprep.mubr.msk.f32.mxu1 %vm10994_vm1, %v10993_v50 }
 0x444   :  { %v6307_v43 = vadd.f32 %v6306_v6, %v6233_v3  ;;  %10726 = vmatprep.subr.mxu1 %v10993_v50  ;;  %v8700_v46 = vand.u32 4294901760, %v8699_v19 }
 0x445   :  { %v10555_v20 = vpop.f32.mrf.mxu0 }
 0x446   :  { %v11897_v24 = vadd.f32 %v6378_v9, %v6307_v43  ;;  %10714 = vmatmul.mubr.f32.vlgmr.msra.gmra.mxu0 %v8700_v46  ;;  %10719 = vmatmul.mubr.f32.vlgmr.msra.gmra.mxu1 %v8696_v21 }
 0x447   :  { %10722 = vmatpush3.msra.mxu0 %v11866_v10  ;;  %10727 = vmatpush3.msra.mxu1 %v11859_v44 }
 0x448   :  { %10723 = vmatprep.mubr.msk.f32.mxu0 %vm10994_vm1, %v10993_v50  ;;  %10728 = vmatprep.mubr.msk.f32.mxu1 %vm10994_vm1, %v10993_v50 }
 0x449   :  { %10731 = vmatprep.subr.mxu0 %v10993_v50  ;;  %10736 = vmatprep.subr.mxu1 %v10993_v50 }
 0x44a   :  { %10724 = vmatmul.mubr.f32.vlgmr.msra.gmra.mxu0 %v8697_v23  ;;  %10729 = vmatmul.mubr.f32.vlgmr.msra.gmra.mxu1 %v8698_v40 }
 0x44b   :  { %10732 = vmatpush3.msra.mxu0 %v8739_v60  ;;  %10737 = vmatpush3.msra.mxu1 %v11859_v44 }
 0x44c   :  { %10733 = vmatprep.mubr.msk.f32.mxu0 %vm10994_vm1, %v10993_v50  ;;  %10738 = vmatprep.mubr.msk.f32.mxu1 %vm10994_vm1, %v10993_v50 }
 0x44e   :  { %10734 = vmatmul.mubr.f32.vlgmr.msra.gmra.mxu0 %v8696_v21  ;;  %10739 = vmatmul.mubr.f32.vlgmr.msra.gmra.mxu1 %v8696_v21 }
 0x498   :  { %v6457_v7 = vpop.f32.mrf.mxu0  ;;  %v6533_v25 = vpop.f32.mrf.mxu1 }
 0x499   :  { %v6534_v27 = vadd.f32 %v6533_v25, %v6457_v7 }
 0x49a   :  { %v10565_v26 = vpop.f32.mrf.mxu0  ;;  %v10570_v1 = vpop.f32.mrf.mxu1 }
 0x49c   :  { %v6607_v28 = vpop.f32.mrf.mxu0 }
 0x49d   :  { %v6608_v29 = vadd.f32 %v6607_v28, %v6534_v27  ;;  %v6681_v14 = vpop.f32.mrf.mxu1 }
 0x49e   :  { %v10575_v12 = vpop.f32.mrf.mxu0 }
 0x49f   :  { %v6682_v30 = vadd.f32 %v6681_v14, %v6608_v29  ;;  %v10580_v31 = vpop.f32.mrf.mxu1 }
 0x4a0   :  { %v6755_v32 = vpop.f32.mrf.mxu0  ;;  %v9111_v31 = vld [vmem:[#allocation10 + $0x18] sm:$0xff] }
 0x4a1   :  { %v6756_v33 = vadd.f32 %v6755_v32, %v6682_v30  ;;  %v6827_v36 = vpop.f32.mrf.mxu1  ;;  %v11914_v32 = vand.u32 4294901760, %v9111_v31 }
 0x4a2   :  { %v10585_v34 = vpop.f32.mrf.mxu0 }
 0x4a3   :  { %v6828_v35 = vadd.f32 %v6827_v36, %v6756_v33  ;;  %v10590_v37 = vpop.f32.mrf.mxu1  ;;  %v9110_v36 = vld [vmem:[#allocation10 + $0x10] sm:$0xff]  ;;  %10741 = vmatprep.subr.mxu0 %v11914_v32 }
 0x4a4   :  { %v6906_v50 = vpop.f32.mrf.mxu0  ;;  %v11917_v37 = vsub.f32 %v9111_v31, %v11914_v32  ;;  %10742 = vmatpush3.msra.mxu0 %v11914_v32 }
 0x4a5   :  { %v6982_v39 = vpop.f32.mrf.mxu1  ;;  %9078 = vrot.lane.b32.xlu0 %v6828_v35, %s10989_s15 }
 0x4a6   :  { %v10595_v42 = vpop.f32.mrf.mxu0  ;;  %v6983_v44 = vadd.f32 %v6982_v39, %v6906_v50  ;;  %v11919_v50 = vand.u32 4294901760, %v9110_v36 }
 0x4a7   :  { %v10600_v38 = vpop.f32.mrf.mxu1  ;;  %v9109_v42 = vld [vmem:[#allocation10 + $0x8] sm:$0xff] }
 0x4a8   :  { %v7056_v2 = vpop.f32.mrf.mxu0  ;;  %10743 = vmatprep.subr.mxu0 %v11919_v50 }
 0x4a9   :  { %v7057_v45 = vadd.f32 %v7056_v2, %v6983_v44  ;;  %v7130_v48 = vpop.f32.mrf.mxu1  ;;  %v11924_v2 = vand.u32 4294901760, %v11917_v37  ;;  %10744 = vmatpush3.msra.mxu0 %v11919_v50 }
 0x4aa   :  { %v10605_v49 = vpop.f32.mrf.mxu0 }
 0x4ab   :  { %v7131_v41 = vadd.f32 %v7130_v48, %v7057_v45  ;;  %v10610_v51 = vpop.f32.mrf.mxu1  ;;  %v11927_v45 = vsub.f32 %v9110_v36, %v11919_v50  ;;  %v11929_v48 = vand.u32 4294901760, %v9109_v42 }
 0x4ac   :  { %v7204_v10 = vpop.f32.mrf.mxu0 }
 0x4ad   :  { %v7205_v52 = vadd.f32 %v7204_v10, %v7131_v41  ;;  %v7276_v53 = vpop.f32.mrf.mxu1  ;;  %v9108_v41 = vld [vmem:[#allocation10] sm:$0xff]  ;;  %v9242_v10 = vsub.f32 %v11917_v37, %v11924_v2  ;;  %10745 = vmatprep.subr.mxu0 %v11929_v48 }
 0x4ae   :  { %v10615_v54 = vpop.f32.mrf.mxu0  ;;  %10746 = vmatpush3.msra.mxu0 %v11929_v48 }
 0x4af   :  { %v7277_v55 = vadd.f32 %v7276_v53, %v7205_v52  ;;  %v10620_v56 = vpop.f32.mrf.mxu1  ;;  %v11936_v52 = vand.u32 4294901760, %v11927_v45  ;;  %v11939_v53 = vsub.f32 %v9109_v42, %v11929_v48 }
 0x4b1   :  { %9080 = vrot.lane.b32.xlu1 %v7277_v55, %s10989_s15  ;;  %v11942_v55 = vand.u32 4294901760, %v9108_v41 }
 0x4b3   :  { %10747 = vmatprep.subr.mxu0 %v11942_v55 }
 0x4b4   :  { %10748 = vmatpush3.msra.mxu0 %v11942_v55 }
 0x4b5   :  { %10763 = vmatprep.subr.mxu0 %v11917_v37 }
 0x4c5   :  { %v7431_v22 = vpop.f32.mrf.mxu1 }
 0x4c7   :  { %v10630_v57 = vpop.f32.mrf.mxu1 }
 0x4c8   :  { %v9249_v57 = vsub.f32 %v11927_v45, %v11936_v52 }
 0x4c9   :  { %v7579_v58 = vpop.f32.mrf.mxu1 }
 0x4cb   :  { %v10640_v47 = vpop.f32.mrf.mxu1 }
 0x4cd   :  { %v7355_v60 = vpop.f32.mrf.mxu0  ;;  %v7725_v61 = vpop.f32.mrf.mxu1 }
 0x4ce   :  { %v7432_v8 = vadd.f32 %v7431_v22, %v7355_v60  ;;  %v9243_v22 = vand.u32 4294901760, %v9242_v10  ;;  %v11951_v60 = vsub.f32 %v9108_v41, %v11942_v55 }
 0x4cf   :  { %v10625_v62 = vpop.f32.mrf.mxu0  ;;  %v10650_v4 = vpop.f32.mrf.mxu1 }
 0x4d0   :  { %10752 = vmatprep.subr.mxu1 %v9243_v22  ;;  %v9250_v62 = vand.u32 4294901760, %v9249_v57 }
 0x4d1   :  { %v7505_v5 = vpop.f32.mrf.mxu0  ;;  %v7880_v11 = vpop.f32.mrf.mxu1  ;;  %10753 = vmatpush3.msra.mxu1 %v9243_v22 }
 0x4d2   :  { %v7506_v9 = vadd.f32 %v7505_v5, %v7432_v8  ;;  %v11958_v5 = vand.u32 4294901760, %v11951_v60  ;;  %10754 = vmatprep.subr.mxu1 %v9250_v62 }
 0x4d3   :  { %v10635_v21 = vpop.f32.mrf.mxu0  ;;  %v10660_v13 = vpop.f32.mrf.mxu1  ;;  %10755 = vmatpush3.msra.mxu1 %v9250_v62 }
 0x4d4   :  { %v7580_v15 = vadd.f32 %v7579_v58, %v7506_v9  ;;  %v11948_v58 = vand.u32 4294901760, %v11939_v53  ;;  %v9263_v13 = vsub.f32 %v11951_v60, %v11958_v5 }
 0x4d5   :  { %v7653_v16 = vpop.f32.mrf.mxu0  ;;  %v8028_v23 = vpop.f32.mrf.mxu1 }
 0x4d6   :  { %v7654_v59 = vadd.f32 %v7653_v16, %v7580_v15  ;;  %v9256_v4 = vsub.f32 %v11939_v53, %v11948_v58 }
 0x4d7   :  { %v10645_v63 = vpop.f32.mrf.mxu0  ;;  %v10670_v40 = vpop.f32.mrf.mxu1 }
 0x4d8   :  { %v7726_v17 = vadd.f32 %v7725_v61, %v7654_v59 }
 0x4d9   :  { %v7804_v18 = vpop.f32.mrf.mxu0  ;;  %v8174_v3 = vpop.f32.mrf.mxu1 }
 0x4da   :  { %9086 = vrot.lane.b32.xlu0 %v7726_v17, %s10998_s4  ;;  %v7881_v43 = vadd.f32 %v7880_v11, %v7804_v18  ;;  %v9257_v11 = vand.u32 4294901760, %v9256_v4 }
 0x4db   :  { %v10655_v19 = vpop.f32.mrf.mxu0  ;;  %v10680_v6 = vpop.f32.mrf.mxu1 }
 0x4dc   :  { %10756 = vmatprep.subr.mxu1 %v9257_v11 }
 0x4dd   :  { %v7954_v46 = vpop.f32.mrf.mxu0  ;;  %10757 = vmatpush3.msra.mxu1 %v9257_v11 }
 0x4de   :  { %v7955_v20 = vadd.f32 %v7954_v46, %v7881_v43 }
 0x4df   :  { %v10665_v7 = vpop.f32.mrf.mxu0 }
 0x4e0   :  { %v8029_v25 = vadd.f32 %v8028_v23, %v7955_v20  ;;  %v9264_v23 = vand.u32 4294901760, %v9263_v13 }
 0x4e1   :  { %v8102_v26 = vpop.f32.mrf.mxu0 }
 0x4e2   :  { %v8103_v1 = vadd.f32 %v8102_v26, %v8029_v25  ;;  %10758 = vmatprep.subr.mxu1 %v9264_v23 }
 0x4e3   :  { %v10675_v27 = vpop.f32.mrf.mxu0  ;;  %10759 = vmatpush3.msra.mxu1 %v9264_v23 }
 0x4e4   :  { %v8175_v28 = vadd.f32 %v8174_v3, %v8103_v1  ;;  %10774 = vmatprep.subr.mxu1 %v11914_v32 }
 0x4e6   :  { %9088 = vrot.lane.b32.xlu1 %v8175_v28, %s10998_s4 }
 0x4f2   :  { %v8253_v29 = vpop.f32.mrf.mxu0 }
 0x4f4   :  { %v10685_v14 = vpop.f32.mrf.mxu0 }
 0x4f6   :  { %v8403_v12 = vpop.f32.mrf.mxu0 }
 0x4f8   :  { %v10695_v30 = vpop.f32.mrf.mxu0 }
 0x4fa   :  { %v8329_v33 = vpop.f32.mrf.mxu1 }
 0x4fb   :  { %v8330_v34 = vadd.f32 %v8329_v33, %v8253_v29  ;;  %v8551_v35 = vpop.f32.mrf.mxu0 }
 0x4fc   :  { %v10690_v39 = vpop.f32.mrf.mxu1 }
 0x4fd   :  { %v10705_v44 = vpop.f32.mrf.mxu0  ;;  %v8404_v38 = vadd.f32 %v8403_v12, %v8330_v34 }
 0x4fe   :  { %v8477_v49 = vpop.f32.mrf.mxu1 }
 0x4ff   :  { %v8478_v51 = vadd.f32 %v8477_v49, %v8404_v38 }
 0x500   :  { %v10700_v54 = vpop.f32.mrf.mxu1 }
 0x501   :  { %v8552_v56 = vadd.f32 %v8551_v35, %v8478_v51 }
 0x502   :  { %v8623_v47 = vpop.f32.mrf.mxu1 }
 0x503   :  { %v8624_v61 = vadd.f32 %v8623_v47, %v8552_v56 }
 0x504   :  { %v10710_v8 = vpop.f32.mrf.mxu1 }
 0x505   :  { %9094 = vrot.lane.b32.xlu0 %v8624_v61, %s10999_s21 }
 0x506   :  { %v8702_v9 = vpop.f32.mrf.mxu0  ;;  %v8778_v21 = vpop.f32.mrf.mxu1 }
 0x507   :  { %v8779_v59 = vadd.f32 %v8778_v21, %v8702_v9 }
 0x508   :  { %v10715_v15 = vpop.f32.mrf.mxu0  ;;  %v10720_v16 = vpop.f32.mrf.mxu1 }
 0x50a   :  { %v8852_v63 = vpop.f32.mrf.mxu0  ;;  %v8926_v40 = vpop.f32.mrf.mxu1 }
 0x50b   :  { %v8853_v17 = vadd.f32 %v8852_v63, %v8779_v59 }
 0x50c   :  { %v10725_v18 = vpop.f32.mrf.mxu0  ;;  %v10730_v3 = vpop.f32.mrf.mxu1 }
 0x50d   :  { %v8927_v19 = vadd.f32 %v8926_v40, %v8853_v17 }
 0x50e   :  { %v9000_v6 = vpop.f32.mrf.mxu0  ;;  %v9072_v43 = vpop.f32.mrf.mxu1 }
 0x50f   :  { %v9001_v46 = vadd.f32 %v9000_v6, %v8927_v19 }
 0x510   :  { %v10735_v20 = vpop.f32.mrf.mxu0  ;;  %v10740_v7 = vpop.f32.mrf.mxu1 }
 0x511   :  { %v9073_v25 = vadd.f32 %v9072_v43, %v9001_v46 }
 0x513   :  { %9096 = vrot.lane.b32.xlu1 %v9073_v25, %s10999_s21 }
 0x517   :  { %v9079_v26 = vpop.permute.xlu0 %9078 }
 0x518   :  { %v9100_v27 = vsel %vm1795_vm2, %v11874_v0, %v9079_v26 }
 0x523   :  { %v9081_v33 = vpop.permute.xlu1 %9080 }
 0x524   :  { %v9101_v42 = vsel %vm1795_vm2, %v11897_v24, %v9081_v33 }
 0x54c   :  { %v9087_v1 = vpop.permute.xlu0 %9086 }
 0x54d   :  { %v9103_v28 = vsel %vm9102_vm3, %v9100_v27, %v9087_v1 }
 0x558   :  { %v9089_v35 = vpop.permute.xlu1 %9088 }
 0x559   :  { %v9104_v0 = vsel %vm9102_vm3, %v9101_v42, %v9089_v35 }
 0x577   :  { %v9095_v29 = vpop.permute.xlu0 %9094 }
 0x578   :  { %v9106_v14 = vsel %vm9105_vm4, %v9103_v28, %v9095_v29  ;;  %v9725_v29 = vld [vmem:[%s12032_s7] ss:$0 sm:$0xff] }
 0x579   :  { %v9120_v12 = vsel %vm118_vm0, %v9106_v14, 0 }
 0x57a   :  { %v9194_v30 = vand.u32 4294901760, %v9120_v12 }
 0x57c   :  { %v9195_v31 = vsub.f32 %v9120_v12, %v9194_v30  ;;  %10760 = vmatprep.mubr.f32.mxu1 %v9194_v30  ;;  %v9726_v12 = vld [vmem:[%s12033_s8] ss:$0 sm:$0xff] }
 0x57e   :  { %v9196_v36 = vand.u32 4294901760, %v9195_v31 }
 0x580   :  { %v9197_v34 = vsub.f32 %v9195_v31, %v9196_v36 }
 0x582   :  { %v9198_v39 = vand.u32 4294901760, %v9197_v34 }
 0x584   :  { %10749 = vmatprep.mubr.f32.mxu0 %v9198_v39 }
 0x585   :  { %v9097_v44 = vpop.permute.xlu1 %9096 }
 0x586   :  { %v9107_v38 = vsel %vm9105_vm4, %v9104_v0, %v9097_v44 }
 0x587   :  { %v9123_v49 = vsel %vm118_vm0, %v9107_v38, 0 }
 0x588   :  { %v9204_v41 = vand.u32 4294901760, %v9123_v49 }
 0x58a   :  { %v9205_v51 = vsub.f32 %v9123_v49, %v9204_v41  ;;  %10761 = vmatmul.mubr.f32.vlgmr.msra.gmra.mxu1 %v9204_v41 }
 0x58b   :  { %10775 = vmatpush3.msra.mxu1 %v11914_v32  ;;  %10782 = vmatprep.mubr.f32.mxu1 %v9196_v36 }
 0x58c   :  { %v9206_v10 = vand.u32 4294901760, %v9205_v51  ;;  %10776 = vmatprep.subr.mxu1 %v11919_v50 }
 0x58d   :  { %10777 = vmatpush3.msra.mxu1 %v11919_v50 }
 0x58e   :  { %v9207_v24 = vsub.f32 %v9205_v51, %v9206_v10  ;;  %10778 = vmatprep.subr.mxu1 %v11929_v48 }
 0x58f   :  { %10779 = vmatpush3.msra.mxu1 %v11929_v48 }
 0x590   :  { %v9208_v54 = vand.u32 4294901760, %v9207_v24  ;;  %10780 = vmatprep.subr.mxu1 %v11942_v55 }
 0x591   :  { %10781 = vmatpush3.msra.mxu1 %v11942_v55 }
 0x592   :  { %10783 = vmatmul.mubr.f32.vlgmr.msra.gmra.mxu1 %v9206_v10  ;;  %10796 = vmatprep.subr.mxu1 %v11914_v32 }
 0x593   :  { %10750 = vmatmul.mubr.f32.vlgmr.msra.gmra.mxu0 %v9208_v54  ;;  %10797 = vmatpush3.msra.mxu1 %v11914_v32 }
 0x594   :  { %10764 = vmatpush3.msra.mxu0 %v11917_v37  ;;  %10804 = vmatprep.mubr.f32.mxu1 %v9194_v30  ;;  %v9724_v37 = vld [vmem:[%s12031_s6] ss:$0 sm:$0xff] }
 0x595   :  { %10765 = vmatprep.subr.mxu0 %v11927_v45  ;;  %10771 = vmatprep.mubr.f32.mxu0 %v9195_v31 }
 0x596   :  { %10798 = vmatprep.subr.mxu1 %v11919_v50  ;;  %10766 = vmatpush3.msra.mxu0 %v11927_v45 }
 0x597   :  { %10799 = vmatpush3.msra.mxu1 %v11919_v50  ;;  %10767 = vmatprep.subr.mxu0 %v11939_v53 }
 0x598   :  { %10800 = vmatprep.subr.mxu1 %v11929_v48  ;;  %10768 = vmatpush3.msra.mxu0 %v11939_v53 }
 0x599   :  { %10801 = vmatpush3.msra.mxu1 %v11929_v48  ;;  %10769 = vmatprep.subr.mxu0 %v11951_v60 }
 0x59a   :  { %10802 = vmatprep.subr.mxu1 %v11942_v55  ;;  %10770 = vmatpush3.msra.mxu0 %v11951_v60 }
 0x59b   :  { %10803 = vmatpush3.msra.mxu1 %v11942_v55  ;;  %10772 = vmatmul.mubr.f32.vlgmr.msra.gmra.mxu0 %v9205_v51 }
 0x59c   :  { %10785 = vmatprep.subr.mxu0 %v11924_v2  ;;  %10805 = vmatmul.mubr.f32.vlgmr.msra.gmra.mxu1 %v9204_v41 }
 0x59d   :  { %10786 = vmatpush3.msra.mxu0 %v11924_v2  ;;  %10793 = vmatprep.mubr.f32.mxu0 %v9194_v30 }
 0x59e   :  { %10787 = vmatprep.subr.mxu0 %v11936_v52 }
 0x59f   :  { %10788 = vmatpush3.msra.mxu0 %v11936_v52 }
 0x5a0   :  { %10789 = vmatprep.subr.mxu0 %v11948_v58 }
 0x5a1   :  { %10790 = vmatpush3.msra.mxu0 %v11948_v58 }
 0x5a2   :  { %10791 = vmatprep.subr.mxu0 %v11958_v5 }
 0x5a3   :  { %10792 = vmatpush3.msra.mxu0 %v11958_v5 }
 0x5a4   :  { %10794 = vmatmul.mubr.f32.vlgmr.msra.gmra.mxu0 %v9204_v41 }
 0x64a   :  { %v10762_v50 = vpop.f32.mrf.mxu1 }
 0x64c   :  { %v9301_v52 = vpop.f32.mrf.mxu1 }
 0x652   :  { %v10784_v56 = vpop.f32.mrf.mxu1 }
 0x653   :  { %v10751_v32 = vpop.f32.mrf.mxu0 }
 0x654   :  { %v9211_v45 = vadd.f32 %v10751_v32, %v9724_v37  ;;  %v9471_v60 = vpop.f32.mrf.mxu1 }
 0x655   :  { %v9200_v2 = vpop.f32.mrf.mxu0 }
 0x656   :  { %v9201_v48 = vadd.f32 %v9724_v37, %v9200_v2  ;;  %v9308_v55 = vadd.f32 %v10762_v50, %v9211_v45 }
 0x658   :  { %v9302_v58 = vadd.f32 %v9301_v52, %v9201_v48 }
 0x65b   :  { %v10773_v53 = vpop.f32.mrf.mxu0 }
 0x65c   :  { %v9395_v57 = vadd.f32 %v10773_v53, %v9308_v55  ;;  %v10806_v62 = vpop.f32.mrf.mxu1 }
 0x65d   :  { %v9387_v22 = vpop.f32.mrf.mxu0 }
 0x65e   :  { %v9388_v47 = vadd.f32 %v9387_v22, %v9302_v58  ;;  %v9480_v61 = vadd.f32 %v10784_v56, %v9395_v57  ;;  %v9643_v13 = vpop.f32.mrf.mxu1 }
 0x660   :  { %v9472_v5 = vadd.f32 %v9471_v60, %v9388_v47 }
 0x664   :  { %v10795_v4 = vpop.f32.mrf.mxu0 }
 0x665   :  { %v9569_v8 = vadd.f32 %v10795_v4, %v9480_v61 }
 0x666   :  { %v9562_v11 = vpop.f32.mrf.mxu0 }
 0x667   :  { %v9563_v9 = vadd.f32 %v9562_v11, %v9472_v5  ;;  %v9650_v21 = vadd.f32 %v10806_v62, %v9569_v8 }
 0x669   :  { %v9656_v15 = vsel %vm118_vm0, %v9650_v21, 0.0  ;;  %v9644_v16 = vadd.f32 %v9643_v13, %v9563_v9 }
 0x66a   :  { %9657 = vadd.xlane.f32.xlu1 %v9656_v15 }
 0x66b   :  { %v9653_v23 = vsel %vm118_vm0, %v9644_v16, 0.0 }
 0x66c   :  { %9654 = vadd.xlane.f32.xlu0 %v9653_v23 }
 0x6f3   :  { %v9658_v59 = vpop.xlane.xlu1 %9657 }
 0x6f4   :  { %v9661_v63 = vmul.f32 0.03125, %v9658_v59 }
 0x6f5   :  { %v9655_v40 = vpop.xlane.xlu0 %9654 }
 0x6f6   :  { %v9660_v17 = vmul.f32 0.03125, %v9655_v40  ;;  %v9663_v18 = vsub.f32 %v9650_v21, %v9661_v63 }
 0x6f8   :  { %v9662_v3 = vsub.f32 %v9644_v16, %v9660_v17  ;;  %v9665_v43 = vmul.f32 %v9663_v18, %v9663_v18 }
 0x6fa   :  { %v9664_v19 = vmul.f32 %v9662_v3, %v9662_v3  ;;  %v9669_v46 = vsel %vm118_vm0, %v9665_v43, 0.0 }
 0x6fc   :  { %v9666_v6 = vsel %vm118_vm0, %v9664_v19, 0.0 }
 0x6fd   :  { %9667 = vadd.xlane.f32.xlu0 %v9666_v6 }
 0x701   :  { %9670 = vadd.xlane.f32.xlu0 %v9669_v46 }
 0x786   :  { %v9668_v20 = vpop.xlane.xlu0 %9667 }
 0x787   :  { %v9672_v7 = vmul.f32 0.03125, %v9668_v20 }
 0x789   :  { %v9674_v25 = vadd.f32 1e-05, %v9672_v7 }
 0x78a   :  { %v9671_v26 = vpop.xlane.xlu0 %9670 }
 0x78b   :  { %10854 = vrsqrt.f32 %v9674_v25  ;;  %v9673_v1 = vmul.f32 0.03125, %v9671_v26 }
 0x78d   :  { %v9675_v27 = vadd.f32 1e-05, %v9673_v1 }
 0x78f   :  { %10856 = vrsqrt.f32 %v9675_v27 }
 0x798   :  { %v10855_v28 = vpop.eup %10854 }
 0x799   :  { %v9678_v14 = vmul.f32 %v10855_v28, %v9662_v3 }
 0x79b   :  { %v9687_v30 = vmul.f32 %v9725_v29, %v9678_v14 }
 0x79c   :  { %v10857_v31 = vpop.eup %10856 }
 0x79d   :  { %v9679_v33 = vmul.f32 %v10857_v31, %v9663_v18  ;;  %v9696_v36 = vadd.f32 %v9726_v12, %v9687_v30 }
 0x79f   :  { %v9688_v34 = vmul.f32 %v9725_v29, %v9679_v33  ;;  %9698 = vst.msk [vmem:[#allocation11] sm:$0xff] %vm118_vm0, %v9696_v36 }
 0x7a1   :  { %v9697_v35 = vadd.f32 %v9726_v12, %v9688_v34 }
 0x7a3   :  { %9699 = vst.msk [vmem:[#allocation11 + $0x8] sm:$0xff] %vm118_vm0, %v9697_v35 }
 0x7a4   :  { %10969 = shalt.err (!%p10966_p1)
}
 0x7a5   :  { %9711 = dma.vmem_to_hbm [thread:$0]  %s9706_s3, 256, %s12034_s9, [#allocation4], %s10988_s14, %s10988_s14, %s10989_s15  }
 0x7a6   :  { %10984 = dma.done.wait [#allocation4], 256  }
 0x7a7   :  { %10985 = vsyncadd [#allocation4], 4294967040 }
 0x7a8   :  { %9715 = vsyncpa [#allocation3], 1 }
 0x7a9   :  { %9716 = vsyncpa [#allocation6], 1 }
 0x7aa   :  { %9717 = vsyncpa [#allocation9], 1 }
 0x7ab   :  { %9718 = vsyncpa [#allocation4], 1 }

// kernel: tpu_custom_call.1
= control target key start
LH: loop header
LB: loop body
LE: loop exit
PB: predicated region body
PF: predicated region fallthrough
CT: control target
= control target key end

     0   :  { %14 = vsyncpa [#allocation3], 0  ;;  %s12025_s0 = inlined_call_operand.hbm [shape: f32[2,8,32], index: 0, kind: input, shape index: {}]   ;;  %s12026_s1 = inlined_call_operand.hbm [shape: f32[2,8,32], index: 1, kind: input, shape index: {}]   ;;  %s12027_s2 = inlined_call_operand.hbm [shape: f32[2,8,32], index: 2, kind: input, shape index: {}]   ;;  %s12028_s3 = inlined_call_operand.hbm [shape: f32[3,32,32], index: 3, kind: input, shape index: {}]   ;;  %s12029_s4 = inlined_call_operand.vmem [shape: f32[3,1,32], index: 4, kind: input, shape index: {}]   ;;  %s12030_s5 = inlined_call_operand.hbm [shape: f32[32,32], index: 5, kind: input, shape index: {}]   ;;  %s12031_s6 = inlined_call_operand.vmem [shape: f32[1,32], index: 6, kind: input, shape index: {}]   ;;  %s12032_s7 = inlined_call_operand.vmem [shape: f32[1,32], index: 7, kind: input, shape index: {}]   ;;  %s12033_s8 = inlined_call_operand.vmem [shape: f32[1,32], index: 8, kind: input, shape index: {}]   ;;  %s12034_s9 = inlined_call_operand.hbm [shape: f32[2,8,32], index: 9, kind: output, shape index: {}]  }
   0x1   :  { %15 = vsyncpa [#allocation6], 0 }
   0x2   :  { %16 = vsyncpa [#allocation9], 0 }
   0x3   :  { %17 = vsyncpa [#allocation4], 0  ;;  %s10986_s30 = smov [#allocation5]   ;;  %s10987_s11 = smov [#allocation8]  }
   0x4   :  { %s35_s10 = sshll.u32 %s10986_s30, 4  ;;  %s59_s12 = sshll.u32 %s10987_s11, 4  ;;  %s36_s10 = int_to_ptr.vmem [resolvable:$true] %s35_s10  ;;  %s60_s12 = int_to_ptr.vmem [resolvable:$true] %s59_s12 }
   0x5   :  { %s10866_s13 = scalar_lea.vmem %s36_s10, 256  ;;  %p10871_p1 = scmp.lt.s32.totalorder %s36_s10, %s36_s10 }
   0x6   :  { %p10867_p0 = scmp.ne.s32.totalorder %s36_s10, %s10866_s13  ;;  %p10872_p2 = scmp.lt.s32.totalorder %s10866_s13, %s10866_s13 }
   0x8   :  { %p10873_p3 = por %p10872_p2, %p10871_p1 }
   0xa   :  { %p10874_p4 = pnand %p10873_p3, %p10867_p0 }
   0xc   :  { %10877 = shalt.err (!%p10874_p4)
}
   0xd   :  { %s10988_s14 = smov 128   ;;  %s10989_s15 = smov 8  }
   0xe   :  { %41 = dma.hbm_to_vmem [thread:$0]  %s12026_s1, 256, %s36_s10, [#allocation6], %s10988_s14, %s10988_s14, %s10989_s15  }
   0xf   :  { %s10886_s18 = scalar_lea.vmem %s60_s12, 1536  ;;  %p10891_p6 = scmp.lt.s32.totalorder %s60_s12, %s60_s12 }
  0x10   :  { %p10887_p5 = scmp.ne.s32.totalorder %s60_s12, %s10886_s18  ;;  %p10892_p7 = scmp.lt.s32.totalorder %s10886_s18, %s10886_s18 }
  0x12   :  { %p10893_p8 = por %p10892_p7, %p10891_p6 }
  0x14   :  { %p10894_p9 = pnand %p10893_p8, %p10887_p5 }
  0x16   :  { %10897 = shalt.err (!%p10894_p9)
}
  0x17   :  { %65 = dma.hbm_to_vmem [thread:$0]  %s12028_s3, 1536, %s60_s12, [#allocation9], %s10988_s14, %s10988_s14, %s10989_s15  }
  0x18   :  { %s10990_s21 = smov [#allocation2]   ;;  %s10991_s23 = smov [#allocation7]  }
  0x19   :  { %s23_s22 = sshll.u32 %s10990_s21, 4  ;;  %s47_s24 = sshll.u32 %s10991_s23, 4  ;;  %s24_s22 = int_to_ptr.vmem [resolvable:$true] %s23_s22  ;;  %s48_s24 = int_to_ptr.vmem [resolvable:$true] %s47_s24 }
  0x1a   :  { %s10906_s1 = scalar_lea.vmem %s24_s22, 256  ;;  %p10911_p11 = scmp.lt.s32.totalorder %s24_s22, %s24_s22 }
  0x1b   :  { %p10907_p10 = scmp.ne.s32.totalorder %s24_s22, %s10906_s1  ;;  %p10912_p12 = scmp.lt.s32.totalorder %s10906_s1, %s10906_s1 }
  0x1d   :  { %p10913_p13 = por %p10912_p12, %p10911_p11 }
  0x1f   :  { %p10914_p0 = pnand %p10913_p13, %p10907_p10 }
  0x21   :  { %10917 = shalt.err (!%p10914_p0)
}
  0x22   :  { %29 = dma.hbm_to_vmem [thread:$0]  %s12025_s0, 256, %s24_s22, [#allocation3], %s10988_s14, %s10988_s14, %s10989_s15  }
  0x23   :  { %s10926_s3 = scalar_lea.vmem %s48_s24, 256  ;;  %p10931_p2 = scmp.lt.s32.totalorder %s48_s24, %s48_s24 }
  0x24   :  { %p10927_p1 = scmp.ne.s32.totalorder %s48_s24, %s10926_s3  ;;  %p10932_p3 = scmp.lt.s32.totalorder %s10926_s3, %s10926_s3 }
  0x26   :  { %p10933_p4 = por %p10932_p3, %p10931_p2 }
  0x28   :  { %p10934_p5 = pnand %p10933_p4, %p10927_p1 }
  0x2a   :  { %10937 = shalt.err (!%p10934_p5)
}
  0x2b   :  { %53 = dma.hbm_to_vmem [thread:$0]  %s12027_s2, 256, %s48_s24, [#allocation6], %s10988_s14, %s10988_s14, %s10989_s15  }
  0x2c   :  { %s10992_s29 = smov [#allocation10]  }
  0x2d   :  { %s73_s30 = sshll.u32 %s10992_s29, 4  ;;  %s74_s30 = int_to_ptr.vmem [resolvable:$true] %s73_s30 }
  0x2e   :  { %s10946_s10 = scalar_lea.vmem %s74_s30, 512  ;;  %p10951_p7 = scmp.lt.s32.totalorder %s74_s30, %s74_s30 }
  0x2f   :  { %p10947_p6 = scmp.ne.s32.totalorder %s74_s30, %s10946_s10  ;;  %p10952_p8 = scmp.lt.s32.totalorder %s10946_s10, %s10946_s10 }
  0x31   :  { %p10953_p9 = por %p10952_p8, %p10951_p7 }
  0x33   :  { %p10954_p10 = pnand %p10953_p9, %p10947_p6 }
  0x35   :  { %10957 = shalt.err (!%p10954_p10)
}
  0x36   :  { %79 = dma.hbm_to_vmem [thread:$0]  %s12030_s5, 512, %s74_s30, [#allocation9], %s10988_s14, %s10988_s14, %s10989_s15  }
  0x37   :  { %10978 = dma.done.wait [#allocation3], 256  }
  0x38   :  { %10979 = vsyncadd [#allocation3], 4294967040 }
  0x39   :  { %10980 = dma.done.wait [#allocation6], 512  }
  0x3a   :  { %10981 = vsyncadd [#allocation6], 4294966784 }
  0x3b   :  { %10982 = dma.done.wait [#allocation9], 2048  }
  0x3c   :  { %10983 = vsyncadd [#allocation9], 4294965248  ;;  %vm118_vm0 = vcmask 261120   ;;  %v110_v0 = vld [vmem:[#allocation8 + $0x18] sm:$0xff]  ;;  %v109_v1 = vld [vmem:[#allocation8 + $0x10] sm:$0xff]  ;;  %vm10994_vm1 = vmmov 0  }
  0x3d   :  { %v108_v2 = vld [vmem:[#allocation8 + $0x8] sm:$0xff]  ;;  %v11081_v3 = vand.u32 4294901760, %v110_v0  ;;  %v11083_v4 = vand.u32 4294901760, %v109_v1  ;;  %v107_v6 = vld [vmem:[#allocation8] sm:$0xff]  ;;  %v101_v7 = vld [vmem:[#allocation2] sm:$0xff]  ;;  %vm1795_vm2 = vcmask 64512  }
  0x3e   :  { %v11085_v5 = vand.u32 4294901760, %v108_v2  ;;  %v102_v8 = vld [vmem:[#allocation2 + $0x8] sm:$0xff]  ;;  %v11087_v9 = vand.u32 4294901760, %v107_v6  ;;  %v120_v10 = vsel %vm118_vm0, %v101_v7, 0  ;;  %v103_v38 = vld [vmem:[#allocation5] sm:$0xff]  ;;  %v104_v40 = vld [vmem:[#allocation5 + $0x8] sm:$0xff] }
  0x3f   :  { %v123_v11 = vsel %vm118_vm0, %v102_v8, 0  ;;  %10063 = vmatprep.subr.mxu0 %v11081_v3  ;;  %v240_v12 = vsub.f32 %v110_v0, %v11081_v3  ;;  %v11093_v13 = vand.u32 4294901760, %v120_v10  ;;  %v247_v14 = vsub.f32 %v109_v1, %v11083_v4  ;;  %v657_v39 = vld [vmem:[#allocation8 + $0x38] sm:$0xff]  ;;  %v656_v41 = vld [vmem:[#allocation8 + $0x30] sm:$0xff]  ;;  %v655_v46 = vld [vmem:[#allocation8 + $0x28] sm:$0xff]  ;;  %s10995_s16 = smov 120  }
  0x40   :  { %v11096_v15 = vand.u32 4294901760, %v123_v11  ;;  %10064 = vmatpush3.msra.mxu0 %v11081_v3  ;;  %v254_v16 = vsub.f32 %v108_v2, %v11085_v5  ;;  %v261_v17 = vsub.f32 %v107_v6, %v11087_v9  ;;  %v667_v42 = vsel %vm118_vm0, %v103_v38, 0  ;;  %v654_v49 = vld [vmem:[#allocation8 + $0x20] sm:$0xff]  ;;  %s10996_s17 = smov 112   ;;  %s10997_s18 = smov 104  }
  0x41   :  { %10065 = vmatprep.subr.mxu0 %v11083_v4  ;;  %v241_v18 = vand.u32 4294901760, %v240_v12  ;;  %v11103_v19 = vsub.f32 %v120_v10, %v11093_v13  ;;  %v11105_v20 = vand.u32 4294901760, %v247_v14  ;;  %10082 = vmatprep.mubr.f32.mxu1 %v11093_v13  ;;  %v11134_v43 = vand.u32 4294901760, %v657_v39  ;;  %s10999_s21 = smov 24   ;;  %s11000_s26 = smov [#allocation11]  }
  0x42   :  { %v11108_v21 = vsub.f32 %v123_v11, %v11096_v15  ;;  %10066 = vmatpush3.msra.mxu0 %v11083_v4  ;;  %v11112_v22 = vand.u32 4294901760, %v254_v16  ;;  %v11114_v23 = vand.u32 4294901760, %v261_v17  ;;  %v670_v44 = vsel %vm118_vm0, %v104_v40, 0  ;;  %s9705_s3 = sshll.u32 %s11000_s26, 4  ;;  %s9706_s3 = int_to_ptr.vmem [resolvable:$true] %s9705_s3 }
  0x43   :  { %10067 = vmatprep.subr.mxu0 %v11085_v5  ;;  %v242_v24 = vsub.f32 %v240_v12, %v241_v18  ;;  %v196_v25 = vand.u32 4294901760, %v11103_v19  ;;  %v249_v26 = vsub.f32 %v247_v14, %v11105_v20  ;;  %v11140_v45 = vand.u32 4294901760, %v656_v41  ;;  %s10958_s27 = scalar_lea.vmem %s9706_s3, 256  ;;  %p10963_p12 = scmp.lt.s32.totalorder %s9706_s3, %s9706_s3 }
  0x44   :  { %v206_v27 = vand.u32 4294901760, %v11108_v21  ;;  %10068 = vmatpush3.msra.mxu0 %v11085_v5  ;;  %v256_v28 = vsub.f32 %v254_v16, %v11112_v22  ;;  %v263_v29 = vsub.f32 %v261_v17, %v11114_v23  ;;  %v11142_v47 = vand.u32 4294901760, %v667_v42  ;;  %p10959_p11 = scmp.ne.s32.totalorder %s9706_s3, %s10958_s27  ;;  %p10964_p13 = scmp.lt.s32.totalorder %s10958_s27, %s10958_s27 }
  0x45   :  { %10069 = vmatprep.subr.mxu0 %v11087_v9  ;;  %v243_v30 = vand.u32 4294901760, %v242_v24  ;;  %v197_v31 = vsub.f32 %v11103_v19, %v196_v25  ;;  %v250_v32 = vand.u32 4294901760, %v249_v26  ;;  %v11145_v48 = vand.u32 4294901760, %v670_v44  ;;  %v1202_v24 = vld [vmem:[#allocation8 + $0x48] sm:$0xff] }
  0x46   :  { %v207_v33 = vsub.f32 %v11108_v21, %v206_v27  ;;  %10070 = vmatpush3.msra.mxu0 %v11087_v9  ;;  %v257_v36 = vand.u32 4294901760, %v256_v28  ;;  %v264_v37 = vand.u32 4294901760, %v263_v29  ;;  %v11149_v50 = vsub.f32 %v657_v39, %v11134_v43  ;;  %p10965_p0 = por %p10964_p13, %p10963_p12 }
  0x47   :  { %10074 = vmatprep.subr.mxu1 %v243_v30  ;;  %v198_v34 = vand.u32 4294901760, %v197_v31  ;;  %10085 = vmatprep.subr.mxu0 %v240_v12  ;;  %v11153_v51 = vand.u32 4294901760, %v655_v46  ;;  %v11158_v52 = vsub.f32 %v667_v42, %v11142_v47  ;;  %v794_v53 = vsub.f32 %v656_v41, %v11140_v45 }
  0x48   :  { %v208_v35 = vand.u32 4294901760, %v207_v33  ;;  %10075 = vmatpush3.msra.mxu1 %v243_v30  ;;  %v11163_v54 = vand.u32 4294901760, %v654_v49  ;;  %v11166_v55 = vsub.f32 %v670_v44, %v11145_v48  ;;  %v11172_v56 = vand.u32 4294901760, %v11149_v50  ;;  %v1201_v30 = vld [vmem:[#allocation8 + $0x40] sm:$0xff]  ;;  %p10966_p1 = pnand %p10965_p0, %p10959_p11 }
  0x49   :  { %10071 = vmatprep.mubr.f32.mxu0 %v198_v34  ;;  %10076 = vmatprep.subr.mxu1 %v250_v32  ;;  %v801_v57 = vsub.f32 %v655_v46, %v11153_v51  ;;  %v743_v58 = vand.u32 4294901760, %v11158_v52  ;;  %v11181_v59 = vand.u32 4294901760, %v794_v53  ;;  %v11270_v26 = vand.u32 4294901760, %v1202_v24 }
  0x4a   :  { %10072 = vmatmul.mubr.f32.vlgmr.msra.gmra.mxu0 %v208_v35  ;;  %10077 = vmatpush3.msra.mxu1 %v250_v32  ;;  %v753_v60 = vand.u32 4294901760, %v11166_v55  ;;  %v808_v61 = vsub.f32 %v654_v49, %v11163_v54  ;;  %v789_v62 = vsub.f32 %v11149_v50, %v11172_v56  ;;  %v11276_v32 = vand.u32 4294901760, %v1201_v30 }
  0x4b   :  { %10086 = vmatpush3.msra.mxu0 %v240_v12  ;;  %10078 = vmatprep.subr.mxu1 %v257_v36  ;;  %v802_v63 = vand.u32 4294901760, %v801_v57  ;;  %v744_v0 = vsub.f32 %v11158_v52, %v743_v58  ;;  %v796_v1 = vsub.f32 %v794_v53, %v11181_v59  ;;  %v1204_v12 = vld [vmem:[#allocation8 + $0x58] sm:$0xff]  ;;  %vm9102_vm3 = vcmask 130048  }
  0x4c   :  { %10087 = vmatprep.subr.mxu0 %v247_v14  ;;  %10079 = vmatpush3.msra.mxu1 %v257_v36  ;;  %v754_v2 = vsub.f32 %v11166_v55, %v753_v60  ;;  %v1355_v41 = vsub.f32 %v1201_v30, %v11276_v32  ;;  %vm9105_vm4 = vcmask 195584  }
  0x4d   :  { %10088 = vmatpush3.msra.mxu0 %v247_v14  ;;  %10080 = vmatprep.subr.mxu1 %v264_v37  ;;  %v803_v6 = vsub.f32 %v801_v57, %v802_v63  ;;  %v745_v7 = vand.u32 4294901760, %v744_v0  ;;  %v797_v8 = vand.u32 4294901760, %v796_v1  ;;  %v105_v14 = vld [vmem:[#allocation7] sm:$0xff] }
  0x4e   :  { %10089 = vmatprep.subr.mxu0 %v254_v16  ;;  %10081 = vmatpush3.msra.mxu1 %v264_v37  ;;  %v755_v10 = vand.u32 4294901760, %v754_v2  ;;  %v1348_v37 = vsub.f32 %v1202_v24, %v11270_v26 }
  0x4f   :  { %10090 = vmatpush3.msra.mxu0 %v254_v16  ;;  %10083 = vmatmul.mubr.f32.vlgmr.msra.gmra.mxu1 %v11096_v15  ;;  %v804_v11 = vand.u32 4294901760, %v803_v6  ;;  %v106_v16 = vld [vmem:[#allocation7 + $0x8] sm:$0xff]  ;;  %v9721_v6 = vld [vmem:[%s12029_s4 + $0x1] ss:$0 sm:$0xff] }
  0x50   :  { %10091 = vmatprep.subr.mxu0 %v261_v17  ;;  %10096 = vmatprep.subr.mxu1 %v11081_v3 }
  0x51   :  { %10092 = vmatpush3.msra.mxu0 %v261_v17  ;;  %10093 = vmatprep.mubr.f32.mxu0 %v11103_v19  ;;  %v1203_v17 = vld [vmem:[#allocation8 + $0x50] sm:$0xff]  ;;  %v1217_v19 = vsel %vm118_vm0, %v106_v16, 0 }
  0x52   :  { %10097 = vmatpush3.msra.mxu1 %v11081_v3  ;;  %10094 = vmatmul.mubr.f32.vlgmr.msra.gmra.mxu0 %v11108_v21  ;;  %v11258_v21 = vand.u32 4294901760, %v1217_v19 }
  0x53   :  { %10098 = vmatprep.subr.mxu1 %v11083_v4  ;;  %10107 = vmatprep.subr.mxu0 %v241_v18 }
  0x54   :  { %10099 = vmatpush3.msra.mxu1 %v11083_v4  ;;  %10108 = vmatpush3.msra.mxu0 %v241_v18 }
  0x55   :  { %10100 = vmatprep.subr.mxu1 %v11085_v5  ;;  %10109 = vmatprep.subr.mxu0 %v11105_v20 }
  0x56   :  { %10101 = vmatpush3.msra.mxu1 %v11085_v5  ;;  %10110 = vmatpush3.msra.mxu0 %v11105_v20  ;;  %v11256_v20 = vand.u32 4294901760, %v1203_v17 }
  0x57   :  { %10102 = vmatprep.subr.mxu1 %v11087_v9  ;;  %10111 = vmatprep.subr.mxu0 %v11112_v22 }
  0x58   :  { %10103 = vmatpush3.msra.mxu1 %v11087_v9  ;;  %10104 = vmatprep.mubr.f32.mxu1 %v196_v25  ;;  %v11267_v25 = vsub.f32 %v1217_v19, %v11258_v21  ;;  %v1341_v29 = vsub.f32 %v1203_v17, %v11256_v20 }
  0x59   :  { %10112 = vmatpush3.msra.mxu0 %v11112_v22  ;;  %10105 = vmatmul.mubr.f32.vlgmr.msra.gmra.mxu1 %v206_v27 }
  0x5a   :  { %10113 = vmatprep.subr.mxu0 %v11114_v23  ;;  %10118 = vmatprep.subr.mxu1 %v11081_v3  ;;  %v1300_v31 = vand.u32 4294901760, %v11267_v25  ;;  %v1342_v35 = vand.u32 4294901760, %v1341_v29 }
  0x5b   :  { %10114 = vmatpush3.msra.mxu0 %v11114_v23  ;;  %10115 = vmatprep.mubr.f32.mxu0 %v11093_v13 }
  0x5c   :  { %10119 = vmatpush3.msra.mxu1 %v11081_v3  ;;  %10116 = vmatmul.mubr.f32.vlgmr.msra.gmra.mxu0 %v11096_v15  ;;  %v809_v3 = vand.u32 4294901760, %v808_v61  ;;  %v1301_v36 = vsub.f32 %v11267_v25, %v1300_v31  ;;  %v1343_v40 = vsub.f32 %v1341_v29, %v1342_v35 }
  0x5d   :  { %10120 = vmatprep.subr.mxu1 %v11083_v4  ;;  %10129 = vmatprep.subr.mxu0 %v11134_v43 }
  0x5e   :  { %10121 = vmatpush3.msra.mxu1 %v11083_v4  ;;  %10130 = vmatpush3.msra.mxu0 %v11134_v43  ;;  %v790_v4 = vand.u32 4294901760, %v789_v62  ;;  %v1302_v42 = vand.u32 4294901760, %v1301_v36  ;;  %v1344_v44 = vand.u32 4294901760, %v1343_v40 }
  0x5f   :  { %10122 = vmatprep.subr.mxu1 %v11085_v5  ;;  %10131 = vmatprep.subr.mxu0 %v11140_v45 }
  0x60   :  { %10123 = vmatpush3.msra.mxu1 %v11085_v5  ;;  %10132 = vmatpush3.msra.mxu0 %v11140_v45  ;;  %v810_v5 = vsub.f32 %v808_v61, %v809_v3 }
  0x61   :  { %10124 = vmatprep.subr.mxu1 %v11087_v9  ;;  %10133 = vmatprep.subr.mxu0 %v11153_v51 }
  0x62   :  { %10125 = vmatpush3.msra.mxu1 %v11087_v9  ;;  %10126 = vmatprep.mubr.f32.mxu1 %v11093_v13  ;;  %v811_v9 = vand.u32 4294901760, %v810_v5  ;;  %v11248_v13 = vand.u32 4294901760, %v1204_v12 }
  0x63   :  { %10134 = vmatpush3.msra.mxu0 %v11153_v51  ;;  %10127 = vmatmul.mubr.f32.vlgmr.msra.gmra.mxu1 %v11096_v15  ;;  %v1214_v15 = vsel %vm118_vm0, %v105_v14, 0 }
  0x64   :  { %10135 = vmatprep.subr.mxu0 %v11163_v54  ;;  %10140 = vmatprep.subr.mxu1 %v790_v4  ;;  %v11252_v18 = vand.u32 4294901760, %v1214_v15  ;;  %v1334_v23 = vsub.f32 %v1204_v12, %v11248_v13 }
  0x65   :  { %10136 = vmatpush3.msra.mxu0 %v11163_v54  ;;  %10141 = vmatpush3.msra.mxu1 %v790_v4 }
  0x66   :  { %10137 = vmatprep.mubr.f32.mxu0 %v745_v7  ;;  %10142 = vmatprep.subr.mxu1 %v797_v8  ;;  %v11261_v22 = vsub.f32 %v1214_v15, %v11252_v18  ;;  %v1335_v28 = vand.u32 4294901760, %v1334_v23 }
  0x67   :  { %10151 = vmatprep.subr.mxu0 %v11149_v50  ;;  %10138 = vmatmul.mubr.f32.vlgmr.msra.gmra.mxu0 %v755_v10 }
  0x68   :  { %10143 = vmatpush3.msra.mxu1 %v797_v8  ;;  %10152 = vmatpush3.msra.mxu0 %v11149_v50  ;;  %v1290_v27 = vand.u32 4294901760, %v11261_v22  ;;  %v1336_v34 = vsub.f32 %v1334_v23, %v1335_v28  ;;  %v10993_v50 = vmov 0.0  }
  0x69   :  { %10144 = vmatprep.subr.mxu1 %v804_v11  ;;  %10153 = vmatprep.subr.mxu0 %v794_v53 }
  0x6a   :  { %10145 = vmatpush3.msra.mxu1 %v804_v11  ;;  %10154 = vmatpush3.msra.mxu0 %v794_v53  ;;  %v1291_v33 = vsub.f32 %v11261_v22, %v1290_v27  ;;  %v1337_v39 = vand.u32 4294901760, %v1336_v34 }
  0x6b   :  { %10146 = vmatprep.subr.mxu1 %v811_v9  ;;  %10155 = vmatprep.subr.mxu0 %v801_v57 }
  0x6c   :  { %10147 = vmatpush3.msra.mxu1 %v811_v9  ;;  %10148 = vmatprep.mubr.f32.mxu1 %v11142_v47  ;;  %v1292_v38 = vand.u32 4294901760, %v1291_v33 }
  0x6d   :  { %10156 = vmatpush3.msra.mxu0 %v801_v57  ;;  %10149 = vmatmul.mubr.f32.vlgmr.msra.gmra.mxu1 %v11145_v48 }
  0x6e   :  { %10157 = vmatprep.subr.mxu0 %v808_v61  ;;  %10162 = vmatprep.subr.mxu1 %v11134_v43 }
  0x6f   :  { %10158 = vmatpush3.msra.mxu0 %v808_v61  ;;  %10159 = vmatprep.mubr.f32.mxu0 %v11158_v52 }
  0x70   :  { %10163 = vmatpush3.msra.mxu1 %v11134_v43  ;;  %10160 = vmatmul.mubr.f32.vlgmr.msra.gmra.mxu0 %v11166_v55 }
  0x71   :  { %10164 = vmatprep.subr.mxu1 %v11140_v45  ;;  %10173 = vmatprep.subr.mxu0 %v11172_v56 }
  0x72   :  { %10165 = vmatpush3.msra.mxu1 %v11140_v45  ;;  %10174 = vmatpush3.msra.mxu0 %v11172_v56 }
  0x73   :  { %10166 = vmatprep.subr.mxu1 %v11153_v51  ;;  %10175 = vmatprep.subr.mxu0 %v11181_v59 }
  0x74   :  { %10167 = vmatpush3.msra.mxu1 %v11153_v51  ;;  %10176 = vmatpush3.msra.mxu0 %v11181_v59 }
  0x75   :  { %10168 = vmatprep.subr.mxu1 %v11163_v54  ;;  %10177 = vmatprep.subr.mxu0 %v802_v63 }
  0x76   :  { %10169 = vmatpush3.msra.mxu1 %v11163_v54  ;;  %10170 = vmatprep.mubr.f32.mxu1 %v743_v58 }
  0x77   :  { %10178 = vmatpush3.msra.mxu0 %v802_v63  ;;  %10171 = vmatmul.mubr.f32.vlgmr.msra.gmra.mxu1 %v753_v60 }
  0x78   :  { %10179 = vmatprep.subr.mxu0 %v809_v3  ;;  %10184 = vmatprep.subr.mxu1 %v11134_v43 }
  0x79   :  { %10180 = vmatpush3.msra.mxu0 %v809_v3  ;;  %10181 = vmatprep.mubr.f32.mxu0 %v11142_v47 }
  0x7a   :  { %10185 = vmatpush3.msra.mxu1 %v11134_v43  ;;  %10182 = vmatmul.mubr.f32.vlgmr.msra.gmra.mxu0 %v11145_v48  ;;  %v1349_v43 = vand.u32 4294901760, %v1348_v37 }
  0x7b   :  { %10186 = vmatprep.subr.mxu1 %v11140_v45  ;;  %10192 = vmatprep.mubr.f32.mxu1 %v11142_v47 }
  0x7c   :  { %10187 = vmatpush3.msra.mxu1 %v11140_v45  ;;  %10195 = vmatprep.subr.mxu0 %v11248_v13  ;;  %v1356_v45 = vand.u32 4294901760, %v1355_v41  ;;  %v1350_v46 = vsub.f32 %v1348_v37, %v1349_v43 }
  0x7d   :  { %10188 = vmatprep.subr.mxu1 %v11153_v51  ;;  %10196 = vmatpush3.msra.mxu0 %v11248_v13 }
  0x7e   :  { %10189 = vmatpush3.msra.mxu1 %v11153_v51  ;;  %10197 = vmatprep.subr.mxu0 %v11256_v20  ;;  %v1357_v47 = vsub.f32 %v1355_v41, %v1356_v45 }
  0x7f   :  { %10190 = vmatprep.subr.mxu1 %v11163_v54  ;;  %10198 = vmatpush3.msra.mxu0 %v11256_v20 }
  0x80   :  { %10191 = vmatpush3.msra.mxu1 %v11163_v54  ;;  %10199 = vmatprep.subr.mxu0 %v11270_v26  ;;  %v1358_v49 = vand.u32 4294901760, %v1357_v47  ;;  %v9719_v54 = vld [vmem:[%s12029_s4] ss:$0 sm:$0xff] }
  0x81   :  { %10193 = vmatmul.mubr.f32.vlgmr.msra.gmra.mxu1 %v11145_v48  ;;  %10200 = vmatpush3.msra.mxu0 %v11270_v26  ;;  %v1351_v48 = vand.u32 4294901760, %v1350_v46 }
  0x82   :  { %10214 = vmatprep.mubr.f32.mxu1 %v11252_v18  ;;  %10201 = vmatprep.subr.mxu0 %v11276_v32 }
  0x83   :  { %10202 = vmatpush3.msra.mxu0 %v11276_v32  ;;  %10203 = vmatprep.mubr.f32.mxu0 %v1292_v38 }
  0x84   :  { %10206 = vmatprep.subr.mxu1 %v1337_v39  ;;  %10217 = vmatprep.subr.mxu0 %v1334_v23 }
  0x85   :  { %10204 = vmatmul.mubr.f32.vlgmr.msra.gmra.mxu0 %v1302_v42  ;;  %10207 = vmatpush3.msra.mxu1 %v1337_v39 }
  0x86   :  { %10218 = vmatpush3.msra.mxu0 %v1334_v23  ;;  %10208 = vmatprep.subr.mxu1 %v1344_v44 }
  0x87   :  { %10219 = vmatprep.subr.mxu0 %v1341_v29  ;;  %10209 = vmatpush3.msra.mxu1 %v1344_v44 }
  0x88   :  { %10220 = vmatpush3.msra.mxu0 %v1341_v29  ;;  %10210 = vmatprep.subr.mxu1 %v1351_v48 }
  0x89   :  { %10221 = vmatprep.subr.mxu0 %v1348_v37  ;;  %10211 = vmatpush3.msra.mxu1 %v1351_v48 }
  0x8a   :  { %10222 = vmatpush3.msra.mxu0 %v1348_v37  ;;  %10212 = vmatprep.subr.mxu1 %v1358_v49 }
  0x8b   :  { %10223 = vmatprep.subr.mxu0 %v1355_v41  ;;  %10213 = vmatpush3.msra.mxu1 %v1358_v49 }
  0x8c   :  { %10224 = vmatpush3.msra.mxu0 %v1355_v41  ;;  %10225 = vmatprep.mubr.f32.mxu0 %v11261_v22 }
  0x8d   :  { %10228 = vmatprep.subr.mxu1 %v11248_v13  ;;  %10239 = vmatprep.subr.mxu0 %v1335_v28 }
  0x8e   :  { %10215 = vmatmul.mubr.f32.vlgmr.msra.gmra.mxu1 %v11258_v21  ;;  %10226 = vmatmul.mubr.f32.vlgmr.msra.gmra.mxu0 %v11267_v25 }
  0x8f   :  { %10229 = vmatpush3.msra.mxu1 %v11248_v13  ;;  %10240 = vmatpush3.msra.mxu0 %v1335_v28 }
  0x90   :  { %10230 = vmatprep.subr.mxu1 %v11256_v20  ;;  %10241 = vmatprep.subr.mxu0 %v1342_v35 }
  0x91   :  { %10231 = vmatpush3.msra.mxu1 %v11256_v20  ;;  %10242 = vmatpush3.msra.mxu0 %v1342_v35 }
  0x92   :  { %10232 = vmatprep.subr.mxu1 %v11270_v26  ;;  %10243 = vmatprep.subr.mxu0 %v1349_v43 }
  0x93   :  { %10233 = vmatpush3.msra.mxu1 %v11270_v26  ;;  %10244 = vmatpush3.msra.mxu0 %v1349_v43 }
  0x94   :  { %10234 = vmatprep.subr.mxu1 %v11276_v32  ;;  %10245 = vmatprep.subr.mxu0 %v1356_v45 }
  0x95   :  { %10235 = vmatpush3.msra.mxu1 %v11276_v32  ;;  %10246 = vmatpush3.msra.mxu0 %v1356_v45 }
  0x96   :  { %10247 = vmatprep.mubr.f32.mxu0 %v11252_v18  ;;  %10236 = vmatprep.mubr.f32.mxu1 %v1290_v27 }
  0x97   :  { %10248 = vmatmul.mubr.f32.vlgmr.msra.gmra.mxu0 %v11258_v21  ;;  %10250 = vmatprep.subr.mxu1 %v11248_v13 }
  0x98   :  { %10261 = vmatprep.subr.mxu0 %v10993_v50  ;;  %10237 = vmatmul.mubr.f32.vlgmr.msra.gmra.mxu1 %v1300_v31 }
  0x99   :  { %10263 = vmatprep.mubr.msk.f32.mxu0 %vm10994_vm1, %v10993_v50  ;;  %10251 = vmatpush3.msra.mxu1 %v11248_v13 }
  0x9a   :  { %10258 = vmatprep.mubr.f32.mxu1 %v11252_v18  ;;  %10252 = vmatprep.subr.mxu1 %v11256_v20 }
  0x9b   :  { %10253 = vmatpush3.msra.mxu1 %v11256_v20 }
  0x9c   :  { %10254 = vmatprep.subr.mxu1 %v11270_v26 }
  0x9d   :  { %10255 = vmatpush3.msra.mxu1 %v11270_v26 }
  0x9e   :  { %10256 = vmatprep.subr.mxu1 %v11276_v32 }
  0x9f   :  { %10257 = vmatpush3.msra.mxu1 %v11276_v32 }
  0xa0   :  { %10259 = vmatmul.mubr.f32.vlgmr.msra.gmra.mxu1 %v11258_v21  ;;  %10266 = vmatprep.subr.mxu1 %v10993_v50 }
  0xa1   :  { %10268 = vmatprep.mubr.msk.f32.mxu1 %vm10994_vm1, %v10993_v50 }
 0x10a   :  { %v10073_v51 = vpop.f32.mrf.mxu0 }
 0x10b   :  { %v211_v7 = vadd.f32 %v10073_v51, %v9719_v54 }
 0x10c   :  { %v200_v52 = vpop.f32.mrf.mxu0 }
 0x10d   :  { %v201_v56 = vadd.f32 %v9719_v54, %v200_v52 }
 0x10f   :  { %v10084_v53 = vpop.f32.mrf.mxu1 }
 0x110   :  { %v308_v12 = vadd.f32 %v10084_v53, %v211_v7 }
 0x111   :  { %v301_v57 = vpop.f32.mrf.mxu1 }
 0x112   :  { %v10095_v55 = vpop.f32.mrf.mxu0  ;;  %v302_v60 = vadd.f32 %v301_v57, %v201_v56 }
 0x113   :  { %v395_v19 = vadd.f32 %v10095_v55, %v308_v12 }
 0x114   :  { %v387_v58 = vpop.f32.mrf.mxu0 }
 0x115   :  { %v388_v63 = vadd.f32 %v387_v58, %v302_v60 }
 0x119   :  { %v10106_v59 = vpop.f32.mrf.mxu1 }
 0x11a   :  { %v480_v22 = vadd.f32 %v10106_v59, %v395_v19 }
 0x11b   :  { %v471_v62 = vpop.f32.mrf.mxu1 }
 0x11c   :  { %v10117_v61 = vpop.f32.mrf.mxu0  ;;  %v472_v2 = vadd.f32 %v471_v62, %v388_v63  ;;  %v11401_v63 = vld [vmem:[%s12029_s4 + $0x2] ss:$0 sm:$0xff]  ;;  %s10998_s4 = smov 16  }
 0x11d   :  { %v569_v29 = vadd.f32 %v10117_v61, %v480_v22 }
 0x11e   :  { %v562_v0 = vpop.f32.mrf.mxu0 }
 0x11f   :  { %v563_v8 = vadd.f32 %v562_v0, %v472_v2 }
 0x123   :  { %v10128_v1 = vpop.f32.mrf.mxu1 }
 0x124   :  { %v650_v33 = vadd.f32 %v10128_v1, %v569_v29 }
 0x125   :  { %v643_v4 = vpop.f32.mrf.mxu1 }
 0x126   :  { %v11328_v9 = vadd.f32 %v643_v4, %v563_v8  ;;  %v2246_v40 = vsel %vm1795_vm2, %v650_v33, 0 }
 0x127   :  { %v10139_v3 = vpop.f32.mrf.mxu0  ;;  %v11339_v44 = vand.u32 4294901760, %v2246_v40 }
 0x128   :  { %v758_v11 = vadd.f32 %v10139_v3, %v9721_v6  ;;  %v1796_v17 = vsel %vm1795_vm2, %v11328_v9, 0 }
 0x129   :  { %v747_v10 = vpop.f32.mrf.mxu0  ;;  %v11332_v23 = vand.u32 4294901760, %v1796_v17  ;;  %v2317_v49 = vsub.f32 %v2246_v40, %v11339_v44 }
 0x12a   :  { %v748_v13 = vadd.f32 %v9721_v6, %v747_v10 }
 0x12b   :  { %v1867_v30 = vsub.f32 %v1796_v17, %v11332_v23  ;;  %v2318_v55 = vand.u32 4294901760, %v2317_v49 }
 0x12d   :  { %v10150_v5 = vpop.f32.mrf.mxu1  ;;  %v1868_v38 = vand.u32 4294901760, %v1867_v30  ;;  %v2319_v57 = vsub.f32 %v2317_v49, %v2318_v55 }
 0x12e   :  { %v855_v16 = vadd.f32 %v10150_v5, %v758_v11 }
 0x12f   :  { %v848_v14 = vpop.f32.mrf.mxu1  ;;  %v1869_v43 = vsub.f32 %v1867_v30, %v1868_v38  ;;  %v2320_v59 = vand.u32 4294901760, %v2319_v57 }
 0x130   :  { %v10161_v15 = vpop.f32.mrf.mxu0  ;;  %v849_v20 = vadd.f32 %v848_v14, %v748_v13 }
 0x131   :  { %v942_v24 = vadd.f32 %v10161_v15, %v855_v16  ;;  %v1870_v47 = vand.u32 4294901760, %v1869_v43 }
 0x132   :  { %v934_v21 = vpop.f32.mrf.mxu0 }
 0x133   :  { %v935_v27 = vadd.f32 %v934_v21, %v849_v20 }
 0x137   :  { %v10172_v18 = vpop.f32.mrf.mxu1 }
 0x138   :  { %v1027_v28 = vadd.f32 %v10172_v18, %v942_v24 }
 0x139   :  { %v1018_v25 = vpop.f32.mrf.mxu1 }
 0x13a   :  { %v10183_v26 = vpop.f32.mrf.mxu0  ;;  %v1019_v31 = vadd.f32 %v1018_v25, %v935_v27 }
 0x13b   :  { %v1116_v34 = vadd.f32 %v10183_v26, %v1027_v28 }
 0x13c   :  { %v1109_v32 = vpop.f32.mrf.mxu0 }
 0x13d   :  { %v1110_v36 = vadd.f32 %v1109_v32, %v1019_v31 }
 0x141   :  { %v10194_v35 = vpop.f32.mrf.mxu1 }
 0x142   :  { %v1197_v37 = vadd.f32 %v10194_v35, %v1116_v34 }
 0x143   :  { %v1190_v39 = vpop.f32.mrf.mxu1 }
 0x144   :  { %v1191_v41 = vadd.f32 %v1190_v39, %v1110_v36  ;;  %1765 = vrot.lane.b32.xlu1 %v1197_v37, %s10995_s16  ;;  %v2248_v48 = vsel %vm1795_vm2, %v1197_v37, 0 }
 0x145   :  { %v2281_v53 = vand.u32 4294901760, %v2248_v48  ;;  %v10205_v62 = vpop.f32.mrf.mxu0 }
 0x146   :  { %1763 = vrot.lane.b32.xlu0 %v1191_v41, %s10995_s16  ;;  %v1798_v42 = vsel %vm1795_vm2, %v1191_v41, 0  ;;  %v1305_v0 = vadd.f32 %v10205_v62, %v11401_v63 }
 0x147   :  { %v1831_v45 = vand.u32 4294901760, %v1798_v42  ;;  %v2358_v56 = vsub.f32 %v2248_v48, %v2281_v53  ;;  %v11404_v1 = vpop.f32.mrf.mxu0 }
 0x148   :  { %1751 = vrot.lane.b32.xlu1 %v650_v33, %s10995_s16 }
 0x149   :  { %10262 = vmatpush3.xpose.msra.mxu0 %v1831_v45  ;;  %v1908_v46 = vsub.f32 %v1798_v42, %v1831_v45  ;;  %v2359_v58 = vand.u32 4294901760, %v2358_v56 }
 0x14a   :  { %1749 = vrot.lane.b32.xlu0 %v11328_v9, %s10995_s16  ;;  %10271 = vmatprep.subr.mxu0 %v10993_v50 }
 0x14b   :  { %v1909_v51 = vand.u32 4294901760, %v1908_v46  ;;  %v2360_v60 = vsub.f32 %v2358_v56, %v2359_v58 }
 0x14c   :  { %1753 = vrot.lane.b32.xlu1 %v11328_v9, %s10996_s17  ;;  %10264 = vmatmul.mubr.f32.vlgmr.msra.gmra.mxu0 %v1870_v47 }
 0x14d   :  { %10272 = vmatpush3.xpose.msra.mxu0 %v1908_v46  ;;  %10273 = vmatprep.mubr.msk.f32.mxu0 %vm10994_vm1, %v10993_v50  ;;  %v1910_v52 = vsub.f32 %v1908_v46, %v1909_v51  ;;  %v2361_v61 = vand.u32 4294901760, %v2360_v60 }
 0x14e   :  { %1767 = vrot.lane.b32.xlu0 %v1191_v41, %s10996_s17  ;;  %10281 = vmatprep.subr.mxu0 %v10993_v50  ;;  %v10227_v2 = vpop.f32.mrf.mxu0  ;;  %v10216_v3 = vpop.f32.mrf.mxu1 }
 0x14f   :  { %v1911_v54 = vand.u32 4294901760, %v1910_v52  ;;  %v1402_v4 = vadd.f32 %v10216_v3, %v1305_v0 }
 0x150   :  { %1755 = vrot.lane.b32.xlu1 %v650_v33, %s10996_s17  ;;  %10274 = vmatmul.mubr.f32.vlgmr.msra.gmra.mxu0 %v1867_v30  ;;  %v11406_v6 = vpop.f32.mrf.mxu1  ;;  %v11408_v7 = vpop.f32.mrf.mxu0 }
 0x151   :  { %10267 = vmatpush3.xpose.msra.mxu1 %v1911_v54  ;;  %10282 = vmatpush3.xpose.msra.mxu0 %v1909_v51  ;;  %v1489_v8 = vadd.f32 %v10227_v2, %v1402_v4 }
 0x152   :  { %1769 = vrot.lane.b32.xlu0 %v1197_v37, %s10996_s17  ;;  %10283 = vmatprep.mubr.msk.f32.mxu0 %vm10994_vm1, %v10993_v50 }
 0x153   :  { %10276 = vmatprep.subr.mxu1 %v10993_v50  ;;  %10291 = vmatprep.subr.mxu0 %v10993_v50 }
 0x154   :  { %1757 = vrot.lane.b32.xlu1 %v11328_v9, %s10997_s18  ;;  %10269 = vmatmul.mubr.f32.vlgmr.msra.gmra.mxu1 %v11332_v23 }
 0x155   :  { %10284 = vmatmul.mubr.f32.vlgmr.msra.gmra.mxu0 %v11332_v23  ;;  %10277 = vmatpush3.xpose.msra.mxu1 %v1831_v45 }
 0x156   :  { %10292 = vmatpush3.xpose.msra.mxu0 %v2281_v53  ;;  %1771 = vrot.lane.b32.xlu0 %v1191_v41, %s10997_s18 }
 0x157   :  { %10278 = vmatprep.mubr.msk.f32.mxu1 %vm10994_vm1, %v10993_v50  ;;  %10293 = vmatprep.mubr.msk.f32.mxu0 %vm10994_vm1, %v10993_v50  ;;  %v10249_v11 = vpop.f32.mrf.mxu0 }
 0x158   :  { %1759 = vrot.lane.b32.xlu1 %v650_v33, %s10997_s18  ;;  %10279 = vmatmul.mubr.f32.vlgmr.msra.gmra.mxu1 %v1868_v38  ;;  %v10238_v10 = vpop.f32.mrf.mxu1 }
 0x159   :  { %10286 = vmatprep.subr.mxu1 %v10993_v50  ;;  %10294 = vmatmul.mubr.f32.vlgmr.msra.gmra.mxu0 %v2320_v59  ;;  %v1574_v5 = vadd.f32 %v10238_v10, %v1489_v8 }
 0x15a   :  { %10301 = vmatprep.subr.mxu0 %v10993_v50  ;;  %10287 = vmatpush3.xpose.msra.mxu1 %v1831_v45  ;;  %v11410_v12 = vpop.f32.mrf.mxu1 }
 0x15b   :  { %10302 = vmatpush3.xpose.msra.mxu0 %v2358_v56  ;;  %1773 = vrot.lane.b32.xlu0 %v1197_v37, %s10997_s18  ;;  %v1663_v9 = vadd.f32 %v10249_v11, %v1574_v5  ;;  %v1295_v11 = vadd.f32 %v11401_v63, %v11404_v1 }
 0x15c   :  { %10288 = vmatprep.mubr.msk.f32.mxu1 %vm10994_vm1, %v10993_v50  ;;  %10303 = vmatprep.mubr.msk.f32.mxu0 %vm10994_vm1, %v10993_v50 }
 0x15d   :  { %10289 = vmatmul.mubr.f32.vlgmr.msra.gmra.mxu1 %v11332_v23  ;;  %10296 = vmatprep.subr.mxu1 %v10993_v50  ;;  %v1396_v63 = vadd.f32 %v11406_v6, %v1295_v11 }
 0x15e   :  { %10304 = vmatmul.mubr.f32.vlgmr.msra.gmra.mxu0 %v2317_v49  ;;  %10311 = vmatprep.subr.mxu0 %v10993_v50 }
 0x15f   :  { %10297 = vmatpush3.xpose.msra.mxu1 %v2361_v61  ;;  %10312 = vmatpush3.xpose.msra.mxu0 %v2359_v58 }
 0x160   :  { %10298 = vmatprep.mubr.msk.f32.mxu1 %vm10994_vm1, %v10993_v50  ;;  %10313 = vmatprep.mubr.msk.f32.mxu0 %vm10994_vm1, %v10993_v50  ;;  %v10260_v13 = vpop.f32.mrf.mxu1 }
 0x161   :  { %10306 = vmatprep.subr.mxu1 %v10993_v50  ;;  %10321 = vmatprep.subr.mxu0 %v10993_v50  ;;  %v11412_v14 = vadd.f32 %v10260_v13, %v1663_v9 }
 0x162   :  { %10299 = vmatmul.mubr.f32.vlgmr.msra.gmra.mxu1 %v11339_v44  ;;  %10314 = vmatmul.mubr.f32.vlgmr.msra.gmra.mxu0 %v11339_v44 }
 0x163   :  { %10307 = vmatpush3.xpose.msra.mxu1 %v2281_v53  ;;  %10308 = vmatprep.mubr.msk.f32.mxu1 %vm10994_vm1, %v10993_v50 }
 0x164   :  { %10316 = vmatprep.subr.mxu1 %v10993_v50  ;;  %10323 = vmatprep.mubr.msk.f32.mxu0 %vm10994_vm1, %v10993_v50 }
 0x166   :  { %10309 = vmatmul.mubr.f32.vlgmr.msra.gmra.mxu1 %v2318_v55 }
 0x167   :  { %10317 = vmatpush3.xpose.msra.mxu1 %v2281_v53  ;;  %10318 = vmatprep.mubr.msk.f32.mxu1 %vm10994_vm1, %v10993_v50 }
 0x168   :  { %10326 = vmatprep.subr.mxu1 %v10993_v50 }
 0x16a   :  { %10319 = vmatmul.mubr.f32.vlgmr.msra.gmra.mxu1 %v11339_v44 }
 0x16b   :  { %10328 = vmatprep.mubr.msk.f32.mxu1 %vm10994_vm1, %v10993_v50 }
 0x1b6   :  { %v1766_v15 = vpop.permute.xlu1 %1765 }
 0x1b7   :  { %v3148_v19 = vsel %vm1795_vm2, %v1766_v15, 0 }
 0x1b8   :  { %v1764_v16 = vpop.permute.xlu0 %1763  ;;  %v11418_v24 = vand.u32 4294901760, %v3148_v19 }
 0x1b9   :  { %v2698_v17 = vsel %vm1795_vm2, %v1764_v16, 0 }
 0x1ba   :  { %v2731_v18 = vand.u32 4294901760, %v2698_v17  ;;  %v1752_v21 = vpop.permute.xlu1 %1751  ;;  %v11422_v30 = vsub.f32 %v3148_v19, %v11418_v24 }
 0x1bb   :  { %v3146_v27 = vsel %vm1795_vm2, %v1752_v21, 0 }
 0x1bc   :  { %v2808_v20 = vsub.f32 %v2698_v17, %v2731_v18  ;;  %v1750_v22 = vpop.permute.xlu0 %1749  ;;  %10322 = vmatpush3.xpose.msra.mxu0 %v2731_v18  ;;  %v11424_v32 = vand.u32 4294901760, %v3146_v27  ;;  %v3259_v36 = vand.u32 4294901760, %v11422_v30 }
 0x1bd   :  { %v2696_v23 = vsel %vm1795_vm2, %v1750_v22, 0  ;;  %10331 = vmatprep.subr.mxu0 %v10993_v50 }
 0x1be   :  { %v2809_v25 = vand.u32 4294901760, %v2808_v20  ;;  %v2766_v26 = vand.u32 4294901760, %v2696_v23  ;;  %v3217_v37 = vsub.f32 %v3146_v27, %v11424_v32  ;;  %v1754_v40 = vpop.permute.xlu1 %1753  ;;  %v3260_v41 = vsub.f32 %v11422_v30, %v3259_v36 }
 0x1bf   :  { %v3596_v44 = vsel %vm1795_vm2, %v1754_v40, 0 }
 0x1c0   :  { %v2810_v28 = vsub.f32 %v2808_v20, %v2809_v25  ;;  %v2767_v29 = vsub.f32 %v2696_v23, %v2766_v26  ;;  %v1768_v35 = vpop.permute.xlu0 %1767  ;;  %v3218_v42 = vand.u32 4294901760, %v3217_v37  ;;  %v3261_v45 = vand.u32 4294901760, %v3260_v41 }
 0x1c1   :  { %v3598_v39 = vsel %vm1795_vm2, %v1768_v35, 0  ;;  %v11442_v47 = vand.u32 4294901760, %v3596_v44  ;;  %v1737_v35 = vpop.f32.mrf.mxu1 }
 0x1c2   :  { %v2811_v31 = vand.u32 4294901760, %v2810_v28  ;;  %v2768_v33 = vand.u32 4294901760, %v2767_v29  ;;  %v11433_v43 = vand.u32 4294901760, %v3598_v39  ;;  %v3219_v46 = vsub.f32 %v3217_v37, %v3218_v42  ;;  %v1756_v55 = vpop.permute.xlu1 %1755 }
 0x1c3   :  { %v3667_v52 = vsub.f32 %v3596_v44, %v11442_v47  ;;  %v4046_v59 = vsel %vm1795_vm2, %v1756_v55, 0 }
 0x1c4   :  { %v2769_v34 = vsub.f32 %v2767_v29, %v2768_v33  ;;  %10327 = vmatpush3.xpose.msra.mxu1 %v2811_v31  ;;  %v11445_v48 = vsub.f32 %v3598_v39, %v11433_v43  ;;  %v1770_v49 = vpop.permute.xlu0 %1769  ;;  %v3220_v51 = vand.u32 4294901760, %v3219_v46  ;;  %v11477_v62 = vand.u32 4294901760, %v4046_v59 }
 0x1c5   :  { %10336 = vmatprep.subr.mxu1 %v10993_v50  ;;  %v4048_v54 = vsel %vm1795_vm2, %v1770_v49, 0  ;;  %v3668_v56 = vand.u32 4294901760, %v3667_v52 }
 0x1c6   :  { %v2770_v38 = vand.u32 4294901760, %v2769_v34  ;;  %v3709_v53 = vand.u32 4294901760, %v11445_v48  ;;  %v11467_v58 = vand.u32 4294901760, %v4048_v54  ;;  %v4117_v4 = vsub.f32 %v4046_v59, %v11477_v62  ;;  %v1758_v5 = vpop.permute.xlu1 %1757 }
 0x1c7   :  { %10329 = vmatmul.mubr.f32.vlgmr.msra.gmra.mxu1 %v2766_v26  ;;  %v3669_v60 = vsub.f32 %v3667_v52, %v3668_v56  ;;  %v4496_v16 = vsel %vm1795_vm2, %v1758_v5, 0 }
 0x1c8   :  { %10324 = vmatmul.mubr.f32.vlgmr.msra.gmra.mxu0 %v2770_v38  ;;  %10337 = vmatpush3.xpose.msra.mxu1 %v2731_v18  ;;  %v3710_v57 = vsub.f32 %v11445_v48, %v3709_v53  ;;  %v11480_v0 = vsub.f32 %v4048_v54, %v11467_v58  ;;  %v1772_v2 = vpop.permute.xlu0 %1771  ;;  %v4118_v9 = vand.u32 4294901760, %v4117_v4 }
 0x1c9   :  { %10332 = vmatpush3.xpose.msra.mxu0 %v2808_v20  ;;  %10338 = vmatprep.mubr.msk.f32.mxu1 %vm10994_vm1, %v10993_v50  ;;  %v3670_v3 = vand.u32 4294901760, %v3669_v60  ;;  %v4498_v10 = vsel %vm1795_vm2, %v1772_v2, 0  ;;  %v1482_v20 = vadd.f32 %v11408_v7, %v1396_v63 }
 0x1ca   :  { %10333 = vmatprep.mubr.msk.f32.mxu0 %vm10994_vm1, %v10993_v50  ;;  %10341 = vmatprep.subr.mxu0 %v10993_v50  ;;  %v3711_v61 = vand.u32 4294901760, %v3710_v57  ;;  %v4159_v8 = vand.u32 4294901760, %v11480_v0  ;;  %v11508_v15 = vand.u32 4294901760, %v4498_v10  ;;  %v4119_v1 = vsub.f32 %v4117_v4, %v4118_v9  ;;  %v1760_v7 = vpop.permute.xlu1 %1759 }
 0x1cb   :  { %10339 = vmatmul.mubr.f32.vlgmr.msra.gmra.mxu1 %v2768_v33  ;;  %10346 = vmatprep.subr.mxu1 %v10993_v50 }
 0x1cc   :  { %10334 = vmatmul.mubr.f32.vlgmr.msra.gmra.mxu0 %v2767_v29  ;;  %10347 = vmatpush3.xpose.msra.mxu1 %v2731_v18  ;;  %v4160_v13 = vsub.f32 %v11480_v0, %v4159_v8  ;;  %v11519_v18 = vand.u32 4294901760, %v4496_v16  ;;  %v11522_v19 = vsub.f32 %v4498_v10, %v11508_v15  ;;  %v4120_v21 = vand.u32 4294901760, %v4119_v1 }
 0x1cd   :  { %10342 = vmatpush3.xpose.msra.mxu0 %v2809_v25  ;;  %10348 = vmatprep.mubr.msk.f32.mxu1 %vm10994_vm1, %v10993_v50  ;;  %v1774_v6 = vpop.permute.xlu0 %1773  ;;  %v1566_v25 = vadd.f32 %v11410_v12, %v1482_v20  ;;  %v4946_v29 = vsel %vm1795_vm2, %v1760_v7, 0  ;;  %v1656_v12 = vpop.f32.mrf.mxu0 }
 0x1ce   :  { %10343 = vmatprep.mubr.msk.f32.mxu0 %vm10994_vm1, %v10993_v50  ;;  %10351 = vmatprep.subr.mxu0 %v10993_v50  ;;  %v4161_v17 = vand.u32 4294901760, %v4160_v13  ;;  %v4567_v22 = vsub.f32 %v4496_v16, %v11519_v18  ;;  %v4609_v23 = vand.u32 4294901760, %v11522_v19  ;;  %v11560_v33 = vand.u32 4294901760, %v4946_v29 }
 0x1cf   :  { %10349 = vmatmul.mubr.f32.vlgmr.msra.gmra.mxu1 %v2766_v26  ;;  %10356 = vmatprep.subr.mxu1 %v10993_v50 }
 0x1d0   :  { %10344 = vmatmul.mubr.f32.vlgmr.msra.gmra.mxu0 %v2766_v26  ;;  %10357 = vmatpush3.xpose.msra.mxu1 %v3261_v45  ;;  %v4568_v26 = vand.u32 4294901760, %v4567_v22  ;;  %v4610_v27 = vsub.f32 %v11522_v19, %v4609_v23  ;;  %v5017_v38 = vsub.f32 %v4946_v29, %v11560_v33 }
 0x1d1   :  { %10352 = vmatpush3.xpose.msra.mxu0 %v11418_v24  ;;  %10358 = vmatprep.mubr.msk.f32.mxu1 %vm10994_vm1, %v10993_v50 }
 0x1d2   :  { %10353 = vmatprep.mubr.msk.f32.mxu0 %vm10994_vm1, %v10993_v50  ;;  %10361 = vmatprep.subr.mxu0 %v10993_v50  ;;  %v4569_v31 = vsub.f32 %v4567_v22, %v4568_v26  ;;  %v5018_v41 = vand.u32 4294901760, %v5017_v38 }
 0x1d3   :  { %10359 = vmatmul.mubr.f32.vlgmr.msra.gmra.mxu1 %v11424_v32  ;;  %10366 = vmatprep.subr.mxu1 %v10993_v50 }
 0x1d4   :  { %10354 = vmatmul.mubr.f32.vlgmr.msra.gmra.mxu0 %v3220_v51  ;;  %10367 = vmatpush3.xpose.msra.mxu1 %v11418_v24  ;;  %v5019_v44 = vsub.f32 %v5017_v38, %v5018_v41 }
 0x1d5   :  { %10362 = vmatpush3.xpose.msra.mxu0 %v11422_v30  ;;  %10368 = vmatprep.mubr.msk.f32.mxu1 %vm10994_vm1, %v10993_v50  ;;  %v1657_v30 = vadd.f32 %v1656_v12, %v1566_v25 }
 0x1d6   :  { %10363 = vmatprep.mubr.msk.f32.mxu0 %vm10994_vm1, %v10993_v50  ;;  %10371 = vmatprep.subr.mxu0 %v10993_v50 }
 0x1d7   :  { %10369 = vmatmul.mubr.f32.vlgmr.msra.gmra.mxu1 %v3218_v42  ;;  %10376 = vmatprep.subr.mxu1 %v10993_v50 }
 0x1d8   :  { %10364 = vmatmul.mubr.f32.vlgmr.msra.gmra.mxu0 %v3217_v37  ;;  %10377 = vmatpush3.xpose.msra.mxu1 %v11418_v24  ;;  %v4948_v24 = vsel %vm1795_vm2, %v1774_v6, 0  ;;  %v4570_v37 = vand.u32 4294901760, %v4569_v31 }
 0x1d9   :  { %10372 = vmatpush3.xpose.msra.mxu0 %v3259_v36  ;;  %10378 = vmatprep.mubr.msk.f32.mxu1 %vm10994_vm1, %v10993_v50  ;;  %v11548_v28 = vand.u32 4294901760, %v4948_v24  ;;  %v11569_v36 = vadd.f32 %v1737_v35, %v1657_v30 }
 0x1da   :  { %10373 = vmatprep.mubr.msk.f32.mxu0 %vm10994_vm1, %v10993_v50  ;;  %10381 = vmatprep.subr.mxu0 %v10993_v50 }
 0x1db   :  { %10379 = vmatmul.mubr.f32.vlgmr.msra.gmra.mxu1 %v11424_v32  ;;  %10386 = vmatprep.subr.mxu1 %v10993_v50  ;;  %v5058_v34 = vsub.f32 %v4948_v24, %v11548_v28  ;;  %v11582_v40 = vand.u32 4294901760, %v11569_v36 }
 0x1dc   :  { %10374 = vmatmul.mubr.f32.vlgmr.msra.gmra.mxu0 %v11424_v32  ;;  %10387 = vmatpush3.xpose.msra.mxu1 %v3711_v61  ;;  %v4611_v32 = vand.u32 4294901760, %v4610_v27 }
 0x1dd   :  { %10382 = vmatpush3.xpose.msra.mxu0 %v11433_v43  ;;  %10388 = vmatprep.mubr.msk.f32.mxu1 %vm10994_vm1, %v10993_v50  ;;  %v5059_v39 = vand.u32 4294901760, %v5058_v34 }
 0x1de   :  { %10383 = vmatprep.mubr.msk.f32.mxu0 %vm10994_vm1, %v10993_v50  ;;  %10391 = vmatprep.subr.mxu0 %v10993_v50 }
 0x1df   :  { %10389 = vmatmul.mubr.f32.vlgmr.msra.gmra.mxu1 %v11442_v47  ;;  %10396 = vmatprep.subr.mxu1 %v10993_v50  ;;  %v5060_v42 = vsub.f32 %v5058_v34, %v5059_v39 }
 0x1e0   :  { %10384 = vmatmul.mubr.f32.vlgmr.msra.gmra.mxu0 %v3670_v3  ;;  %10397 = vmatpush3.xpose.msra.mxu1 %v11433_v43 }
 0x1e1   :  { %10392 = vmatpush3.xpose.msra.mxu0 %v11445_v48  ;;  %10398 = vmatprep.mubr.msk.f32.mxu1 %vm10994_vm1, %v10993_v50  ;;  %v5061_v45 = vand.u32 4294901760, %v5060_v42 }
 0x1e2   :  { %10393 = vmatprep.mubr.msk.f32.mxu0 %vm10994_vm1, %v10993_v50  ;;  %10401 = vmatprep.subr.mxu0 %v10993_v50 }
 0x1e3   :  { %10399 = vmatmul.mubr.f32.vlgmr.msra.gmra.mxu1 %v3668_v56  ;;  %10406 = vmatprep.subr.mxu1 %v10993_v50 }
 0x1e4   :  { %10394 = vmatmul.mubr.f32.vlgmr.msra.gmra.mxu0 %v3667_v52  ;;  %10407 = vmatpush3.xpose.msra.mxu1 %v11433_v43  ;;  %v11594_v43 = vsub.f32 %v11569_v36, %v11582_v40 }
 0x1e5   :  { %10402 = vmatpush3.xpose.msra.mxu0 %v3709_v53  ;;  %10408 = vmatprep.mubr.msk.f32.mxu1 %vm10994_vm1, %v10993_v50 }
 0x1e6   :  { %10403 = vmatprep.mubr.msk.f32.mxu0 %vm10994_vm1, %v10993_v50  ;;  %10411 = vmatprep.subr.mxu0 %v10993_v50  ;;  %v5596_v46 = vand.u32 4294901760, %v11594_v43 }
 0x1e7   :  { %10409 = vmatmul.mubr.f32.vlgmr.msra.gmra.mxu1 %v11442_v47  ;;  %10416 = vmatprep.subr.mxu1 %v10993_v50 }
 0x1e8   :  { %10404 = vmatmul.mubr.f32.vlgmr.msra.gmra.mxu0 %v11442_v47  ;;  %10417 = vmatpush3.xpose.msra.mxu1 %v4161_v17  ;;  %v5020_v47 = vand.u32 4294901760, %v5019_v44  ;;  %v5597_v48 = vsub.f32 %v11594_v43, %v5596_v46 }
 0x1e9   :  { %10412 = vmatpush3.xpose.msra.mxu0 %v11467_v58  ;;  %10418 = vmatprep.mubr.msk.f32.mxu1 %vm10994_vm1, %v10993_v50 }
 0x1ea   :  { %10413 = vmatprep.mubr.msk.f32.mxu0 %vm10994_vm1, %v10993_v50  ;;  %10421 = vmatprep.subr.mxu0 %v10993_v50  ;;  %v5598_v49 = vand.u32 4294901760, %v5597_v48 }
 0x1eb   :  { %10419 = vmatmul.mubr.f32.vlgmr.msra.gmra.mxu1 %v11477_v62  ;;  %10426 = vmatprep.subr.mxu1 %v10993_v50 }
 0x1ec   :  { %10414 = vmatmul.mubr.f32.vlgmr.msra.gmra.mxu0 %v4120_v21  ;;  %10427 = vmatpush3.xpose.msra.mxu1 %v11467_v58 }
 0x1ed   :  { %10422 = vmatpush3.xpose.msra.mxu0 %v11480_v0  ;;  %10428 = vmatprep.mubr.msk.f32.mxu1 %vm10994_vm1, %v10993_v50 }
 0x1ee   :  { %10423 = vmatprep.mubr.msk.f32.mxu0 %vm10994_vm1, %v10993_v50  ;;  %10431 = vmatprep.subr.mxu0 %v10993_v50 }
 0x1ef   :  { %10429 = vmatmul.mubr.f32.vlgmr.msra.gmra.mxu1 %v4118_v9  ;;  %10436 = vmatprep.subr.mxu1 %v10993_v50 }
 0x1f0   :  { %10424 = vmatmul.mubr.f32.vlgmr.msra.gmra.mxu0 %v4117_v4  ;;  %10437 = vmatpush3.xpose.msra.mxu1 %v11467_v58 }
 0x1f1   :  { %10432 = vmatpush3.xpose.msra.mxu0 %v4159_v8  ;;  %10438 = vmatprep.mubr.msk.f32.mxu1 %vm10994_vm1, %v10993_v50 }
 0x1f2   :  { %10433 = vmatprep.mubr.msk.f32.mxu0 %vm10994_vm1, %v10993_v50  ;;  %10441 = vmatprep.subr.mxu0 %v10993_v50 }
 0x1f3   :  { %10439 = vmatmul.mubr.f32.vlgmr.msra.gmra.mxu1 %v11477_v62  ;;  %10446 = vmatprep.subr.mxu1 %v10993_v50 }
 0x1f4   :  { %10434 = vmatmul.mubr.f32.vlgmr.msra.gmra.mxu0 %v11477_v62  ;;  %10447 = vmatpush3.xpose.msra.mxu1 %v4611_v32 }
 0x1f5   :  { %10442 = vmatpush3.xpose.msra.mxu0 %v11508_v15  ;;  %10448 = vmatprep.mubr.msk.f32.mxu1 %vm10994_vm1, %v10993_v50 }
 0x1f6   :  { %10443 = vmatprep.mubr.msk.f32.mxu0 %vm10994_vm1, %v10993_v50  ;;  %10451 = vmatprep.subr.mxu0 %v10993_v50 }
 0x1f7   :  { %10449 = vmatmul.mubr.f32.vlgmr.msra.gmra.mxu1 %v11519_v18  ;;  %10456 = vmatprep.subr.mxu1 %v10993_v50 }
 0x1f8   :  { %10444 = vmatmul.mubr.f32.vlgmr.msra.gmra.mxu0 %v4570_v37  ;;  %10457 = vmatpush3.xpose.msra.mxu1 %v11508_v15 }
 0x1f9   :  { %10452 = vmatpush3.xpose.msra.mxu0 %v11522_v19  ;;  %10458 = vmatprep.mubr.msk.f32.mxu1 %vm10994_vm1, %v10993_v50 }
 0x1fa   :  { %10453 = vmatprep.mubr.msk.f32.mxu0 %vm10994_vm1, %v10993_v50  ;;  %10461 = vmatprep.subr.mxu0 %v10993_v50 }
 0x1fb   :  { %10459 = vmatmul.mubr.f32.vlgmr.msra.gmra.mxu1 %v4568_v26  ;;  %10466 = vmatprep.subr.mxu1 %v10993_v50 }
 0x1fc   :  { %10454 = vmatmul.mubr.f32.vlgmr.msra.gmra.mxu0 %v4567_v22  ;;  %10467 = vmatpush3.xpose.msra.mxu1 %v11508_v15 }
 0x1fd   :  { %10462 = vmatpush3.xpose.msra.mxu0 %v4609_v23  ;;  %10468 = vmatprep.mubr.msk.f32.mxu1 %vm10994_vm1, %v10993_v50 }
 0x1fe   :  { %10463 = vmatprep.mubr.msk.f32.mxu0 %vm10994_vm1, %v10993_v50  ;;  %10471 = vmatprep.subr.mxu0 %v10993_v50 }
 0x1ff   :  { %10469 = vmatmul.mubr.f32.vlgmr.msra.gmra.mxu1 %v11519_v18  ;;  %10476 = vmatprep.subr.mxu1 %v10993_v50 }
 0x200   :  { %10464 = vmatmul.mubr.f32.vlgmr.msra.gmra.mxu0 %v11519_v18  ;;  %10477 = vmatpush3.xpose.msra.mxu1 %v5061_v45 }
 0x201   :  { %10472 = vmatpush3.xpose.msra.mxu0 %v11548_v28  ;;  %10478 = vmatprep.mubr.msk.f32.mxu1 %vm10994_vm1, %v10993_v50 }
 0x202   :  { %10473 = vmatprep.mubr.msk.f32.mxu0 %vm10994_vm1, %v10993_v50  ;;  %10481 = vmatprep.subr.mxu0 %v10993_v50 }
 0x203   :  { %10479 = vmatmul.mubr.f32.vlgmr.msra.gmra.mxu1 %v11560_v33  ;;  %10486 = vmatprep.subr.mxu1 %v10993_v50 }
 0x204   :  { %10474 = vmatmul.mubr.f32.vlgmr.msra.gmra.mxu0 %v5020_v47  ;;  %10487 = vmatpush3.xpose.msra.mxu1 %v11548_v28 }
 0x205   :  { %10482 = vmatpush3.xpose.msra.mxu0 %v5058_v34  ;;  %10488 = vmatprep.mubr.msk.f32.mxu1 %vm10994_vm1, %v10993_v50 }
 0x206   :  { %10483 = vmatprep.mubr.msk.f32.mxu0 %vm10994_vm1, %v10993_v50  ;;  %10491 = vmatprep.subr.mxu0 %v10993_v50 }
 0x207   :  { %10489 = vmatmul.mubr.f32.vlgmr.msra.gmra.mxu1 %v5018_v41  ;;  %10496 = vmatprep.subr.mxu1 %v10993_v50 }
 0x208   :  { %10484 = vmatmul.mubr.f32.vlgmr.msra.gmra.mxu0 %v5017_v38  ;;  %10497 = vmatpush3.xpose.msra.mxu1 %v11548_v28 }
 0x209   :  { %10492 = vmatpush3.xpose.msra.mxu0 %v5059_v39  ;;  %10498 = vmatprep.mubr.msk.f32.mxu1 %vm10994_vm1, %v10993_v50 }
 0x20a   :  { %10493 = vmatprep.mubr.msk.f32.mxu0 %vm10994_vm1, %v10993_v50  ;;  %10501 = vmatprep.subr.mxu0 %v10993_v50 }
 0x20b   :  { %10499 = vmatmul.mubr.f32.vlgmr.msra.gmra.mxu1 %v11560_v33  ;;  %10506 = vmatprep.subr.mxu1 %v10993_v50 }
 0x20c   :  { %v1872_v51 = vpop.f32.mrf.mxu0  ;;  %10494 = vmatmul.mubr.f32.vlgmr.msra.gmra.mxu0 %v11560_v33  ;;  %10507 = vmatpush3.msra.mxu1 %v5598_v49 }
 0x20d   :  { %10502 = vmatpush3.msra.mxu0 %v11582_v40  ;;  %10508 = vmatprep.mubr.msk.f32.mxu1 %vm10994_vm1, %v10993_v50 }
 0x20e   :  { %v10265_v52 = vpop.f32.mrf.mxu0  ;;  %10516 = vmatprep.subr.mxu1 %v10993_v50  ;;  %10503 = vmatprep.mubr.msk.f32.mxu0 %vm10994_vm1, %v10993_v50 }
 0x20f   :  { %10511 = vmatprep.subr.mxu0 %v10993_v50 }
 0x210   :  { %v2022_v53 = vpop.f32.mrf.mxu0 }
 0x212   :  { %v10275_v54 = vpop.f32.mrf.mxu0 }
 0x214   :  { %v1948_v55 = vpop.f32.mrf.mxu1 }
 0x215   :  { %v1949_v56 = vadd.f32 %v1948_v55, %v1872_v51  ;;  %v2170_v57 = vpop.f32.mrf.mxu0 }
 0x216   :  { %v10270_v58 = vpop.f32.mrf.mxu1 }
 0x217   :  { %v10285_v59 = vpop.f32.mrf.mxu0  ;;  %v2023_v60 = vadd.f32 %v2022_v53, %v1949_v56 }
 0x218   :  { %v2096_v61 = vpop.f32.mrf.mxu1 }
 0x219   :  { %v2097_v62 = vadd.f32 %v2096_v61, %v2023_v60  ;;  %v2322_v0 = vpop.f32.mrf.mxu0 }
 0x21a   :  { %v10280_v2 = vpop.f32.mrf.mxu1 }
 0x21b   :  { %v10295_v3 = vpop.f32.mrf.mxu0  ;;  %v2171_v4 = vadd.f32 %v2170_v57, %v2097_v62 }
 0x21d   :  { %v2242_v8 = vpop.f32.mrf.mxu1 }
 0x21e   :  { %v11639_v10 = vadd.f32 %v2242_v8, %v2171_v4  ;;  %v2472_v5 = vpop.f32.mrf.mxu0 }
 0x21f   :  { %v10290_v11 = vpop.f32.mrf.mxu1 }
 0x220   :  { %v10305_v9 = vpop.f32.mrf.mxu0  ;;  %v5396_v13 = vsel %vm1795_vm2, %v11639_v10, -inf }
 0x221   :  { %5397 = vmax.xlane.f32.xlu0 %v5396_v13 }
 0x222   :  { %v2398_v15 = vpop.f32.mrf.mxu1  ;;  %v2620_v16 = vpop.f32.mrf.mxu0 }
 0x223   :  { %v2399_v63 = vadd.f32 %v2398_v15, %v2322_v0 }
 0x224   :  { %v10300_v1 = vpop.f32.mrf.mxu1  ;;  %v10315_v17 = vpop.f32.mrf.mxu0 }
 0x225   :  { %v2473_v18 = vadd.f32 %v2472_v5, %v2399_v63 }
 0x226   :  { %v2546_v19 = vpop.f32.mrf.mxu1 }
 0x227   :  { %v2547_v6 = vadd.f32 %v2546_v19, %v2473_v18 }
 0x228   :  { %v10310_v20 = vpop.f32.mrf.mxu1 }
 0x229   :  { %v2621_v21 = vadd.f32 %v2620_v16, %v2547_v6 }
 0x22a   :  { %v2692_v22 = vpop.f32.mrf.mxu1 }
 0x22b   :  { %v11643_v23 = vadd.f32 %v2692_v22, %v2621_v21 }
 0x22c   :  { %v10320_v24 = vpop.f32.mrf.mxu1 }
 0x22d   :  { %v5399_v7 = vsel %vm1795_vm2, %v11643_v23, -inf }
 0x22e   :  { %5400 = vmax.xlane.f32.xlu1 %v5399_v7 }
 0x287   :  { %v2848_v25 = vpop.f32.mrf.mxu1 }
 0x288   :  { %v2772_v26 = vpop.f32.mrf.mxu0 }
 0x289   :  { %v10330_v27 = vpop.f32.mrf.mxu1  ;;  %v2849_v29 = vadd.f32 %v2848_v25, %v2772_v26 }
 0x28a   :  { %v10325_v28 = vpop.f32.mrf.mxu0 }
 0x28b   :  { %v2996_v12 = vpop.f32.mrf.mxu1 }
 0x28c   :  { %v2922_v30 = vpop.f32.mrf.mxu0 }
 0x28d   :  { %v2923_v31 = vadd.f32 %v2922_v30, %v2849_v29  ;;  %v10340_v32 = vpop.f32.mrf.mxu1 }
 0x28e   :  { %v10335_v33 = vpop.f32.mrf.mxu0 }
 0x28f   :  { %v3142_v34 = vpop.f32.mrf.mxu1  ;;  %v2997_v35 = vadd.f32 %v2996_v12, %v2923_v31 }
 0x290   :  { %v3070_v37 = vpop.f32.mrf.mxu0 }
 0x291   :  { %v3071_v38 = vadd.f32 %v3070_v37, %v2997_v35  ;;  %v10350_v39 = vpop.f32.mrf.mxu1 }
 0x292   :  { %v10345_v41 = vpop.f32.mrf.mxu0 }
 0x293   :  { %v3298_v42 = vpop.f32.mrf.mxu1  ;;  %v11647_v44 = vadd.f32 %v3142_v34, %v3071_v38 }
 0x294   :  { %v3222_v45 = vpop.f32.mrf.mxu0 }
 0x295   :  { %v10360_v47 = vpop.f32.mrf.mxu1  ;;  %v5402_v48 = vsel %vm1795_vm2, %v11647_v44, -inf  ;;  %v3299_v51 = vadd.f32 %v3298_v42, %v3222_v45 }
 0x296   :  { %5403 = vmax.xlane.f32.xlu0 %v5402_v48  ;;  %v10355_v49 = vpop.f32.mrf.mxu0 }
 0x297   :  { %v3446_v52 = vpop.f32.mrf.mxu1 }
 0x298   :  { %v3372_v53 = vpop.f32.mrf.mxu0 }
 0x299   :  { %v3373_v54 = vadd.f32 %v3372_v53, %v3299_v51  ;;  %v10370_v55 = vpop.f32.mrf.mxu1 }
 0x29a   :  { %v10365_v56 = vpop.f32.mrf.mxu0 }
 0x29b   :  { %v3592_v57 = vpop.f32.mrf.mxu1  ;;  %v3447_v58 = vadd.f32 %v3446_v52, %v3373_v54 }
 0x29c   :  { %v3520_v59 = vpop.f32.mrf.mxu0 }
 0x29d   :  { %v3521_v60 = vadd.f32 %v3520_v59, %v3447_v58  ;;  %v10380_v61 = vpop.f32.mrf.mxu1 }
 0x29e   :  { %v10375_v62 = vpop.f32.mrf.mxu0 }
 0x29f   :  { %v3748_v0 = vpop.f32.mrf.mxu1  ;;  %v11651_v2 = vadd.f32 %v3592_v57, %v3521_v60 }
 0x2a0   :  { %v3672_v3 = vpop.f32.mrf.mxu0 }
 0x2a1   :  { %v10390_v4 = vpop.f32.mrf.mxu1  ;;  %v5405_v8 = vsel %vm1795_vm2, %v11651_v2, -inf  ;;  %v3749_v11 = vadd.f32 %v3748_v0, %v3672_v3 }
 0x2a2   :  { %5406 = vmax.xlane.f32.xlu0 %v5405_v8  ;;  %v10385_v5 = vpop.f32.mrf.mxu0 }
 0x2a3   :  { %v3896_v9 = vpop.f32.mrf.mxu1 }
 0x2a4   :  { %v3822_v13 = vpop.f32.mrf.mxu0 }
 0x2a5   :  { %v3823_v15 = vadd.f32 %v3822_v13, %v3749_v11  ;;  %v10400_v16 = vpop.f32.mrf.mxu1 }
 0x2a6   :  { %v10395_v63 = vpop.f32.mrf.mxu0 }
 0x2a7   :  { %v4042_v1 = vpop.f32.mrf.mxu1  ;;  %v3897_v17 = vadd.f32 %v3896_v9, %v3823_v15 }
 0x2a8   :  { %v3970_v18 = vpop.f32.mrf.mxu0 }
 0x2a9   :  { %v3971_v19 = vadd.f32 %v3970_v18, %v3897_v17  ;;  %v10410_v6 = vpop.f32.mrf.mxu1 }
 0x2aa   :  { %v10405_v20 = vpop.f32.mrf.mxu0  ;;  %v5398_v26 = vpop.xlane.xlu0 %5397 }
 0x2ab   :  { %v4198_v21 = vpop.f32.mrf.mxu1  ;;  %v11655_v22 = vadd.f32 %v4042_v1, %v3971_v19  ;;  %v5420_v30 = vsub.f32 %v11639_v10, %v5398_v26 }
 0x2ac   :  { %v4122_v24 = vpop.f32.mrf.mxu0 }
 0x2ad   :  { %v10420_v7 = vpop.f32.mrf.mxu1  ;;  %v5408_v25 = vsel %vm1795_vm2, %v11655_v22, -inf  ;;  %v4199_v28 = vadd.f32 %v4198_v21, %v4122_v24  ;;  %v5428_v38 = vmul.f32 1.442695, %v5420_v30 }
 0x2ae   :  { %5409 = vmax.xlane.f32.xlu1 %v5408_v25  ;;  %v10415_v27 = vpop.f32.mrf.mxu0 }
 0x2af   :  { %v4346_v29 = vpop.f32.mrf.mxu1  ;;  %10822 = vpow2.f32 %v5428_v38 }
 0x2b0   :  { %v4272_v12 = vpop.f32.mrf.mxu0 }
 0x2b1   :  { %v4273_v31 = vadd.f32 %v4272_v12, %v4199_v28  ;;  %v10430_v32 = vpop.f32.mrf.mxu1 }
 0x2b2   :  { %v10425_v33 = vpop.f32.mrf.mxu0 }
 0x2b3   :  { %v4492_v34 = vpop.f32.mrf.mxu1  ;;  %v4347_v35 = vadd.f32 %v4346_v29, %v4273_v31 }
 0x2b4   :  { %v4420_v37 = vpop.f32.mrf.mxu0 }
 0x2b5   :  { %v4421_v39 = vadd.f32 %v4420_v37, %v4347_v35  ;;  %v10440_v41 = vpop.f32.mrf.mxu1 }
 0x2b6   :  { %v10435_v42 = vpop.f32.mrf.mxu0 }
 0x2b7   :  { %v4648_v45 = vpop.f32.mrf.mxu1  ;;  %v11660_v47 = vadd.f32 %v4492_v34, %v4421_v39  ;;  %v5401_v10 = vpop.xlane.xlu1 %5400 }
 0x2b8   :  { %v4572_v48 = vpop.f32.mrf.mxu0  ;;  %v5421_v56 = vsub.f32 %v11643_v23, %v5401_v10 }
 0x2b9   :  { %v10450_v49 = vpop.f32.mrf.mxu1  ;;  %v5411_v51 = vsel %vm1795_vm2, %v11660_v47, -inf  ;;  %v4649_v53 = vadd.f32 %v4648_v45, %v4572_v48 }
 0x2ba   :  { %5412 = vmax.xlane.f32.xlu0 %v5411_v51  ;;  %v10445_v52 = vpop.f32.mrf.mxu0  ;;  %v5430_v0 = vmul.f32 1.442695, %v5421_v56 }
 0x2bb   :  { %v4796_v54 = vpop.f32.mrf.mxu1 }
 0x2bc   :  { %v4722_v55 = vpop.f32.mrf.mxu0  ;;  %10824 = vpow2.f32 %v5430_v0  ;;  %v10823_v16 = vpop.eup %10822 }
 0x2bd   :  { %v4723_v57 = vadd.f32 %v4722_v55, %v4649_v53  ;;  %v10460_v58 = vpop.f32.mrf.mxu1  ;;  %v5444_v6 = vsel %vm1795_vm2, %v10823_v16, 0.0  ;;  %v5967_v55 = vand.u32 4294901760, %v11412_v14 }
 0x2be   :  { %v10455_v59 = vpop.f32.mrf.mxu0 }
 0x2bf   :  { %v4942_v60 = vpop.f32.mrf.mxu1  ;;  %v4797_v61 = vadd.f32 %v4796_v54, %v4723_v57 }
 0x2c0   :  { %v4870_v62 = vpop.f32.mrf.mxu0 }
 0x2c1   :  { %v4871_v3 = vadd.f32 %v4870_v62, %v4797_v61  ;;  %v10470_v4 = vpop.f32.mrf.mxu1 }
 0x2c2   :  { %v10465_v8 = vpop.f32.mrf.mxu0 }
 0x2c3   :  { %v5098_v5 = vpop.f32.mrf.mxu1  ;;  %v4943_v11 = vadd.f32 %v4942_v60, %v4871_v3 }
 0x2c4   :  { %v5022_v9 = vpop.f32.mrf.mxu0 }
 0x2c5   :  { %v10480_v13 = vpop.f32.mrf.mxu1  ;;  %v5414_v15 = vsel %vm1795_vm2, %v4943_v11, -inf  ;;  %v5099_v63 = vadd.f32 %v5098_v5, %v5022_v9 }
 0x2c6   :  { %5415 = vmax.xlane.f32.xlu1 %v5414_v15  ;;  %v10475_v23 = vpop.f32.mrf.mxu0 }
 0x2c7   :  { %v5246_v1 = vpop.f32.mrf.mxu1 }
 0x2c8   :  { %v5172_v17 = vpop.f32.mrf.mxu0 }
 0x2c9   :  { %v5173_v18 = vadd.f32 %v5172_v17, %v5099_v63  ;;  %v10490_v19 = vpop.f32.mrf.mxu1  ;;  %v11671_v12 = vpop.eup %10824 }
 0x2ca   :  { %5445 = vadd.xlane.f32.xlu1 %v5444_v6  ;;  %v10485_v20 = vpop.f32.mrf.mxu0  ;;  %v5447_v30 = vsel %vm1795_vm2, %v11671_v12, 0.0 }
 0x2cb   :  { %v5392_v21 = vpop.f32.mrf.mxu1  ;;  %v5247_v24 = vadd.f32 %v5246_v1, %v5173_v18 }
 0x2cc   :  { %v5320_v7 = vpop.f32.mrf.mxu0 }
 0x2cd   :  { %v5321_v25 = vadd.f32 %v5320_v7, %v5247_v24  ;;  %v10500_v26 = vpop.f32.mrf.mxu1 }
 0x2ce   :  { %v10495_v27 = vpop.f32.mrf.mxu0 }
 0x2cf   :  { %v11667_v28 = vadd.f32 %v5392_v21, %v5321_v25 }
 0x2d1   :  { %v5417_v29 = vsel %vm1795_vm2, %v11667_v28, -inf }
 0x2d2   :  { %5418 = vmax.xlane.f32.xlu0 %v5417_v29 }
 0x2d6   :  { %5448 = vadd.xlane.f32.xlu0 %v5447_v30 }
 0x31f   :  { %v5404_v31 = vpop.xlane.xlu0 %5403 }
 0x320   :  { %v5422_v32 = vsub.f32 %v11647_v44, %v5404_v31 }
 0x322   :  { %v5432_v33 = vmul.f32 1.442695, %v5422_v32 }
 0x324   :  { %10826 = vpow2.f32 %v5432_v33 }
 0x32b   :  { %v5407_v34 = vpop.xlane.xlu0 %5406 }
 0x32c   :  { %v5423_v35 = vsub.f32 %v11651_v2, %v5407_v34 }
 0x32e   :  { %v5434_v37 = vmul.f32 1.442695, %v5423_v35 }
 0x330   :  { %10828 = vpow2.f32 %v5434_v37 }
 0x331   :  { %v11677_v38 = vpop.eup %10826 }
 0x332   :  { %v5450_v39 = vsel %vm1795_vm2, %v11677_v38, 0.0 }
 0x333   :  { %5451 = vadd.xlane.f32.xlu1 %v5450_v39 }
 0x337   :  { %v5410_v44 = vpop.xlane.xlu1 %5409 }
 0x338   :  { %v5424_v2 = vsub.f32 %v11655_v22, %v5410_v44 }
 0x33a   :  { %v5436_v49 = vmul.f32 1.442695, %v5424_v2 }
 0x33d   :  { %v11681_v41 = vpop.eup %10828 }
 0x33e   :  { %v5453_v42 = vsel %vm1795_vm2, %v11681_v41, 0.0 }
 0x33f   :  { %5454 = vadd.xlane.f32.xlu0 %v5453_v42 }
 0x343   :  { %v5413_v48 = vpop.xlane.xlu0 %5412 }
 0x344   :  { %1779 = vrot.lane.b32.xlu1 %v11412_v14, %s10995_s16  ;;  %v5425_v51 = vsub.f32 %v11660_v47, %v5413_v48  ;;  %v11695_v47 = vsub.f32 %v11412_v14, %v5967_v55 }
 0x346   :  { %v5438_v52 = vmul.f32 1.442695, %v5425_v51  ;;  %v6045_v0 = vand.u32 4294901760, %v11695_v47 }
 0x34f   :  { %v5416_v45 = vpop.xlane.xlu1 %5415 }
 0x350   :  { %v5426_v54 = vsub.f32 %v4943_v11, %v5416_v45  ;;  %v6046_v11 = vsub.f32 %v11695_v47, %v6045_v0 }
 0x352   :  { %v5440_v22 = vmul.f32 1.442695, %v5426_v54 }
 0x353   :  { %v5446_v10 = vpop.xlane.xlu1 %5445 }
 0x354   :  { %10830 = vrcp.f32 %v5446_v10 }
 0x355   :  { %1777 = vrot.lane.b32.xlu0 %v11569_v36, %s10995_s16  ;;  %10832 = vpow2.f32 %v5436_v49 }
 0x356   :  { %10834 = vpow2.f32 %v5438_v52 }
 0x35b   :  { %v11691_v53 = vpop.xlane.xlu0 %5418 }
 0x35f   :  { %v5449_v56 = vpop.xlane.xlu0 %5448 }
 0x360   :  { %10836 = vrcp.f32 %v5449_v56 }
 0x361   :  { %v10831_v57 = vpop.eup %10830  ;;  %10838 = vpow2.f32 %v5440_v22 }
 0x362   :  { %v5469_v58 = vmul.f32 %v10831_v57, %v10823_v16  ;;  %v11697_v59 = vpop.eup %10832  ;;  %v6047_v16 = vand.u32 4294901760, %v6046_v11 }
 0x363   :  { %v5456_v62 = vsel %vm1795_vm2, %v11697_v59, 0.0  ;;  %v11703_v3 = vpop.eup %10834 }
 0x364   :  { %v5485_v60 = vsel %vm1795_vm2, %v5469_v58, 0  ;;  %v5459_v5 = vsel %vm1795_vm2, %v11703_v3, 0.0 }
 0x365   :  { %v5553_v61 = vand.u32 4294901760, %v5485_v60 }
 0x367   :  { %v5554_v4 = vsub.f32 %v5485_v60, %v5553_v61  ;;  %10509 = vmatmul.mubr.f32.vlgmr.msra.gmra.mxu1 %v5553_v61 }
 0x368   :  { %5457 = vadd.xlane.f32.xlu1 %v5456_v62  ;;  %10517 = vmatpush3.msra.mxu1 %v11582_v40 }
 0x369   :  { %10518 = vmatprep.mubr.msk.f32.mxu1 %vm10994_vm1, %v10993_v50  ;;  %10526 = vmatprep.subr.mxu1 %v10993_v50  ;;  %v5555_v8 = vand.u32 4294901760, %v5554_v4 }
 0x36b   :  { %10519 = vmatmul.mubr.f32.vlgmr.msra.gmra.mxu1 %v5555_v8  ;;  %v5556_v9 = vsub.f32 %v5554_v4, %v5555_v8 }
 0x36c   :  { %5460 = vadd.xlane.f32.xlu1 %v5459_v5  ;;  %10527 = vmatpush3.msra.mxu1 %v11582_v40 }
 0x36d   :  { %10528 = vmatprep.mubr.msk.f32.mxu1 %vm10994_vm1, %v10993_v50  ;;  %v10837_v13 = vpop.eup %10836  ;;  %10536 = vmatprep.subr.mxu1 %v10993_v50  ;;  %v5557_v15 = vand.u32 4294901760, %v5556_v9 }
 0x36e   :  { %v5471_v23 = vmul.f32 %v10837_v13, %v11671_v12  ;;  %v11719_v1 = vpop.eup %10838 }
 0x36f   :  { %10504 = vmatmul.mubr.f32.vlgmr.msra.gmra.mxu0 %v5557_v15  ;;  %10529 = vmatmul.mubr.f32.vlgmr.msra.gmra.mxu1 %v5553_v61  ;;  %v5462_v18 = vsel %vm1795_vm2, %v11719_v1, 0.0 }
 0x370   :  { %10512 = vmatpush3.msra.mxu0 %v11594_v43  ;;  %10537 = vmatpush3.msra.mxu1 %v6047_v16  ;;  %v5934_v63 = vsel %vm1795_vm2, %v5471_v23, 0 }
 0x371   :  { %10513 = vmatprep.mubr.msk.f32.mxu0 %vm10994_vm1, %v10993_v50  ;;  %10521 = vmatprep.subr.mxu0 %v10993_v50  ;;  %v6002_v40 = vand.u32 4294901760, %v5934_v63 }
 0x372   :  { %10538 = vmatprep.mubr.msk.f32.mxu1 %vm10994_vm1, %v10993_v50  ;;  %10546 = vmatprep.subr.mxu1 %v10993_v50 }
 0x373   :  { %10514 = vmatmul.mubr.f32.vlgmr.msra.gmra.mxu0 %v5554_v4  ;;  %v6003_v17 = vsub.f32 %v5934_v63, %v6002_v40  ;;  %10539 = vmatmul.mubr.f32.vlgmr.msra.gmra.mxu1 %v6002_v40 }
 0x374   :  { %10522 = vmatpush3.msra.mxu0 %v5596_v46  ;;  %10547 = vmatpush3.msra.mxu1 %v5967_v55  ;;  %v5427_v46 = vsub.f32 %v11667_v28, %v11691_v53 }
 0x375   :  { %5463 = vadd.xlane.f32.xlu0 %v5462_v18  ;;  %10523 = vmatprep.mubr.msk.f32.mxu0 %vm10994_vm1, %v10993_v50  ;;  %v6004_v19 = vand.u32 4294901760, %v6003_v17 }
 0x376   :  { %10531 = vmatprep.subr.mxu0 %v10993_v50  ;;  %10548 = vmatprep.mubr.msk.f32.mxu1 %vm10994_vm1, %v10993_v50  ;;  %v5442_v20 = vmul.f32 1.442695, %v5427_v46 }
 0x377   :  { %10556 = vmatprep.subr.mxu1 %v10993_v50  ;;  %10524 = vmatmul.mubr.f32.vlgmr.msra.gmra.mxu0 %v5553_v61  ;;  %v6005_v6 = vsub.f32 %v6003_v17, %v6004_v19 }
 0x378   :  { %10532 = vmatpush3.msra.mxu0 %v5967_v55  ;;  %10549 = vmatmul.mubr.f32.vlgmr.msra.gmra.mxu1 %v6004_v19  ;;  %10840 = vpow2.f32 %v5442_v20 }
 0x379   :  { %10557 = vmatpush3.msra.mxu1 %v5967_v55  ;;  %10533 = vmatprep.mubr.msk.f32.mxu0 %vm10994_vm1, %v10993_v50  ;;  %v6006_v43 = vand.u32 4294901760, %v6005_v6 }
 0x37a   :  { %10541 = vmatprep.subr.mxu0 %v10993_v50  ;;  %10558 = vmatprep.mubr.msk.f32.mxu1 %vm10994_vm1, %v10993_v50 }
 0x37b   :  { %10534 = vmatmul.mubr.f32.vlgmr.msra.gmra.mxu0 %v6006_v43  ;;  %10566 = vmatprep.subr.mxu1 %v10993_v50 }
 0x37c   :  { %10542 = vmatpush3.msra.mxu0 %v11695_v47  ;;  %10559 = vmatmul.mubr.f32.vlgmr.msra.gmra.mxu1 %v6002_v40 }
 0x37d   :  { %1783 = vrot.lane.b32.xlu1 %v11569_v36, %s10996_s17  ;;  %10543 = vmatprep.mubr.msk.f32.mxu0 %vm10994_vm1, %v10993_v50 }
 0x37e   :  { %10551 = vmatprep.subr.mxu0 %v10993_v50  ;;  %10568 = vmatprep.mubr.msk.f32.mxu1 %vm10994_vm1, %v10993_v50 }
 0x37f   :  { %10544 = vmatmul.mubr.f32.vlgmr.msra.gmra.mxu0 %v6003_v17 }
 0x380   :  { %10552 = vmatpush3.msra.mxu0 %v6045_v0  ;;  %10553 = vmatprep.mubr.msk.f32.mxu0 %vm10994_vm1, %v10993_v50 }
 0x381   :  { %10561 = vmatprep.subr.mxu0 %v10993_v50 }
 0x383   :  { %10554 = vmatmul.mubr.f32.vlgmr.msra.gmra.mxu0 %v6002_v40 }
 0x384   :  { %10563 = vmatprep.mubr.msk.f32.mxu0 %vm10994_vm1, %v10993_v50 }
 0x385   :  { %v11762_v21 = vpop.eup %10840 }
 0x386   :  { %v5465_v24 = vsel %vm1795_vm2, %v11762_v21, 0.0 }
 0x38b   :  { %1785 = vrot.lane.b32.xlu0 %v11412_v14, %s10996_s17 }
 0x38f   :  { %1791 = vrot.lane.b32.xlu0 %v11412_v14, %s10997_s18 }
 0x3a1   :  { %5466 = vadd.xlane.f32.xlu1 %v5465_v24 }
 0x3b2   :  { %1789 = vrot.lane.b32.xlu1 %v11569_v36, %s10997_s18 }
 0x3bc   :  { %v5452_v7 = vpop.xlane.xlu1 %5451 }
 0x3bd   :  { %10842 = vrcp.f32 %v5452_v7 }
 0x3c0   :  { %v1780_v29 = vpop.permute.xlu1 %1779 }
 0x3c1   :  { %v6865_v32 = vand.u32 4294901760, %v1780_v29 }
 0x3c3   :  { %v6942_v37 = vsub.f32 %v1780_v29, %v6865_v32 }
 0x3c5   :  { %v6943_v45 = vand.u32 4294901760, %v6942_v37 }
 0x3c8   :  { %v5455_v25 = vpop.xlane.xlu0 %5454 }
 0x3c9   :  { %10844 = vrcp.f32 %v5455_v25 }
 0x3ca   :  { %v10843_v26 = vpop.eup %10842 }
 0x3cb   :  { %v5473_v27 = vmul.f32 %v10843_v26, %v11677_v38 }
 0x3cc   :  { %v1778_v28 = vpop.permute.xlu0 %1777 }
 0x3cd   :  { %v6416_v14 = vand.u32 4294901760, %v1778_v28  ;;  %v6383_v12 = vsel %vm1795_vm2, %v5473_v27, 0 }
 0x3ce   :  { %v6451_v30 = vand.u32 4294901760, %v6383_v12 }
 0x3cf   :  { %v6493_v31 = vsub.f32 %v1778_v28, %v6416_v14  ;;  %10562 = vmatpush3.msra.mxu0 %v6416_v14 }
 0x3d0   :  { %10571 = vmatprep.subr.mxu0 %v10993_v50  ;;  %v6452_v33 = vsub.f32 %v6383_v12, %v6451_v30 }
 0x3d1   :  { %v6494_v36 = vand.u32 4294901760, %v6493_v31 }
 0x3d2   :  { %v6453_v34 = vand.u32 4294901760, %v6452_v33 }
 0x3d3   :  { %v6495_v35 = vsub.f32 %v6493_v31, %v6494_v36 }
 0x3d4   :  { %v6454_v39 = vsub.f32 %v6452_v33, %v6453_v34 }
 0x3d5   :  { %v6496_v42 = vand.u32 4294901760, %v6495_v35 }
 0x3d6   :  { %v10845_v44 = vpop.eup %10844  ;;  %v6455_v38 = vand.u32 4294901760, %v6454_v39 }
 0x3d7   :  { %v5475_v2 = vmul.f32 %v10845_v44, %v11681_v41  ;;  %10567 = vmatpush3.msra.mxu1 %v6496_v42  ;;  %v6944_v41 = vsub.f32 %v6942_v37, %v6943_v45 }
 0x3d8   :  { %10564 = vmatmul.mubr.f32.vlgmr.msra.gmra.mxu0 %v6455_v38  ;;  %10569 = vmatmul.mubr.f32.vlgmr.msra.gmra.mxu1 %v6451_v30 }
 0x3d9   :  { %10572 = vmatpush3.msra.mxu0 %v6493_v31  ;;  %10576 = vmatprep.subr.mxu1 %v10993_v50  ;;  %v6832_v48 = vsel %vm1795_vm2, %v5475_v2, 0  ;;  %v6945_v52 = vand.u32 4294901760, %v6944_v41 }
 0x3da   :  { %10577 = vmatpush3.msra.mxu1 %v6416_v14  ;;  %10573 = vmatprep.mubr.msk.f32.mxu0 %vm10994_vm1, %v10993_v50  ;;  %v6900_v49 = vand.u32 4294901760, %v6832_v48 }
 0x3db   :  { %10578 = vmatprep.mubr.msk.f32.mxu1 %vm10994_vm1, %v10993_v50  ;;  %10581 = vmatprep.subr.mxu0 %v10993_v50 }
 0x3dc   :  { %10586 = vmatprep.subr.mxu1 %v10993_v50  ;;  %10574 = vmatmul.mubr.f32.vlgmr.msra.gmra.mxu0 %v6452_v33  ;;  %v6901_v51 = vsub.f32 %v6832_v48, %v6900_v49 }
 0x3dd   :  { %10579 = vmatmul.mubr.f32.vlgmr.msra.gmra.mxu1 %v6453_v34  ;;  %10582 = vmatpush3.msra.mxu0 %v6494_v36 }
 0x3de   :  { %10587 = vmatpush3.msra.mxu1 %v6416_v14  ;;  %10583 = vmatprep.mubr.msk.f32.mxu0 %vm10994_vm1, %v10993_v50  ;;  %v6902_v10 = vand.u32 4294901760, %v6901_v51 }
 0x3df   :  { %10588 = vmatprep.mubr.msk.f32.mxu1 %vm10994_vm1, %v10993_v50  ;;  %10591 = vmatprep.subr.mxu0 %v10993_v50 }
 0x3e0   :  { %10596 = vmatprep.subr.mxu1 %v10993_v50  ;;  %10584 = vmatmul.mubr.f32.vlgmr.msra.gmra.mxu0 %v6451_v30  ;;  %v6903_v53 = vsub.f32 %v6901_v51, %v6902_v10 }
 0x3e1   :  { %10589 = vmatmul.mubr.f32.vlgmr.msra.gmra.mxu1 %v6451_v30  ;;  %10592 = vmatpush3.msra.mxu0 %v6865_v32 }
 0x3e2   :  { %10597 = vmatpush3.msra.mxu1 %v6945_v52  ;;  %10593 = vmatprep.mubr.msk.f32.mxu0 %vm10994_vm1, %v10993_v50  ;;  %v6904_v54 = vand.u32 4294901760, %v6903_v53 }
 0x3e3   :  { %10598 = vmatprep.mubr.msk.f32.mxu1 %vm10994_vm1, %v10993_v50  ;;  %10601 = vmatprep.subr.mxu0 %v10993_v50 }
 0x3e4   :  { %10606 = vmatprep.subr.mxu1 %v10993_v50  ;;  %10594 = vmatmul.mubr.f32.vlgmr.msra.gmra.mxu0 %v6904_v54 }
 0x3e5   :  { %10599 = vmatmul.mubr.f32.vlgmr.msra.gmra.mxu1 %v6900_v49  ;;  %10602 = vmatpush3.msra.mxu0 %v6942_v37 }
 0x3e6   :  { %10607 = vmatpush3.msra.mxu1 %v6865_v32  ;;  %10603 = vmatprep.mubr.msk.f32.mxu0 %vm10994_vm1, %v10993_v50 }
 0x3e7   :  { %10608 = vmatprep.mubr.msk.f32.mxu1 %vm10994_vm1, %v10993_v50  ;;  %10611 = vmatprep.subr.mxu0 %v10993_v50 }
 0x3e8   :  { %10616 = vmatprep.subr.mxu1 %v10993_v50  ;;  %10604 = vmatmul.mubr.f32.vlgmr.msra.gmra.mxu0 %v6901_v51 }
 0x3e9   :  { %10609 = vmatmul.mubr.f32.vlgmr.msra.gmra.mxu1 %v6902_v10  ;;  %10612 = vmatpush3.msra.mxu0 %v6943_v45 }
 0x3ea   :  { %10617 = vmatpush3.msra.mxu1 %v6865_v32  ;;  %10613 = vmatprep.mubr.msk.f32.mxu0 %vm10994_vm1, %v10993_v50 }
 0x3eb   :  { %10618 = vmatprep.mubr.msk.f32.mxu1 %vm10994_vm1, %v10993_v50  ;;  %10621 = vmatprep.subr.mxu0 %v10993_v50 }
 0x3ec   :  { %10614 = vmatmul.mubr.f32.vlgmr.msra.gmra.mxu0 %v6900_v49  ;;  %10626 = vmatprep.subr.mxu1 %v10993_v50 }
 0x3ed   :  { %10619 = vmatmul.mubr.f32.vlgmr.msra.gmra.mxu1 %v6900_v49  ;;  %10623 = vmatprep.mubr.msk.f32.mxu0 %vm10994_vm1, %v10993_v50 }
 0x3ee   :  { %10628 = vmatprep.mubr.msk.f32.mxu1 %vm10994_vm1, %v10993_v50 }
 0x3f1   :  { %v5458_v55 = vpop.xlane.xlu1 %5457 }
 0x3f2   :  { %10846 = vrcp.f32 %v5458_v55 }
 0x3f5   :  { %v5461_v56 = vpop.xlane.xlu1 %5460 }
 0x3f6   :  { %10848 = vrcp.f32 %v5461_v56 }
 0x3f9   :  { %v1784_v22 = vpop.permute.xlu1 %1783 }
 0x3fa   :  { %v7314_v57 = vand.u32 4294901760, %v1784_v22 }
 0x3fc   :  { %v7391_v58 = vsub.f32 %v1784_v22, %v7314_v57  ;;  %10622 = vmatpush3.msra.mxu0 %v7314_v57 }
 0x3fd   :  { %10631 = vmatprep.subr.mxu0 %v10993_v50 }
 0x3fe   :  { %v7392_v47 = vand.u32 4294901760, %v7391_v58  ;;  %v5464_v61 = vpop.xlane.xlu0 %5463 }
 0x3ff   :  { %v10847_v60 = vpop.eup %10846  ;;  %10850 = vrcp.f32 %v5464_v61 }
 0x400   :  { %v7393_v62 = vsub.f32 %v7391_v58, %v7392_v47  ;;  %v5477_v0 = vmul.f32 %v10847_v60, %v11697_v59 }
 0x402   :  { %v7394_v4 = vand.u32 4294901760, %v7393_v62  ;;  %v7281_v8 = vsel %vm1795_vm2, %v5477_v0, 0  ;;  %v1786_v11 = vpop.permute.xlu0 %1785 }
 0x403   :  { %v10849_v5 = vpop.eup %10848  ;;  %v7349_v9 = vand.u32 4294901760, %v7281_v8  ;;  %v7763_v13 = vand.u32 4294901760, %v1786_v11 }
 0x404   :  { %10627 = vmatpush3.msra.mxu1 %v7394_v4  ;;  %v5479_v15 = vmul.f32 %v10849_v5, %v11703_v3 }
 0x405   :  { %v7350_v16 = vsub.f32 %v7281_v8, %v7349_v9  ;;  %10629 = vmatmul.mubr.f32.vlgmr.msra.gmra.mxu1 %v7349_v9  ;;  %10636 = vmatprep.subr.mxu1 %v10993_v50  ;;  %v7840_v23 = vsub.f32 %v1786_v11, %v7763_v13 }
 0x406   :  { %10637 = vmatpush3.msra.mxu1 %v7314_v57  ;;  %10638 = vmatprep.mubr.msk.f32.mxu1 %vm10994_vm1, %v10993_v50  ;;  %v7730_v59 = vsel %vm1795_vm2, %v5479_v15, 0  ;;  %v1792_v33 = vpop.permute.xlu0 %1791 }
 0x407   :  { %10646 = vmatprep.subr.mxu1 %v10993_v50  ;;  %v7351_v63 = vand.u32 4294901760, %v7350_v16  ;;  %v7798_v40 = vand.u32 4294901760, %v7730_v59  ;;  %v7841_v17 = vand.u32 4294901760, %v7840_v23  ;;  %v11859_v44 = vand.u32 4294901760, %v1792_v33 }
 0x409   :  { %10639 = vmatmul.mubr.f32.vlgmr.msra.gmra.mxu1 %v7351_v63  ;;  %v7352_v18 = vsub.f32 %v7350_v16, %v7351_v63  ;;  %v7842_v3 = vsub.f32 %v7840_v23, %v7841_v17  ;;  %v7799_v6 = vsub.f32 %v7730_v59, %v7798_v40  ;;  %v11866_v10 = vsub.f32 %v1792_v33, %v11859_v44 }
 0x40a   :  { %10647 = vmatpush3.msra.mxu1 %v7314_v57  ;;  %10648 = vmatprep.mubr.msk.f32.mxu1 %vm10994_vm1, %v10993_v50 }
 0x40b   :  { %10656 = vmatprep.subr.mxu1 %v10993_v50  ;;  %v7353_v19 = vand.u32 4294901760, %v7352_v18  ;;  %v7843_v43 = vand.u32 4294901760, %v7842_v3  ;;  %v7800_v46 = vand.u32 4294901760, %v7799_v6  ;;  %v8739_v60 = vand.u32 4294901760, %v11866_v10 }
 0x40c   :  { %v10851_v24 = vpop.eup %10850 }
 0x40d   :  { %10624 = vmatmul.mubr.f32.vlgmr.msra.gmra.mxu0 %v7353_v19  ;;  %10649 = vmatmul.mubr.f32.vlgmr.msra.gmra.mxu1 %v7349_v9  ;;  %v7801_v20 = vsub.f32 %v7799_v6, %v7800_v46  ;;  %v5481_v25 = vmul.f32 %v10851_v24, %v11719_v1 }
 0x40e   :  { %10632 = vmatpush3.msra.mxu0 %v7391_v58  ;;  %10657 = vmatpush3.msra.mxu1 %v7843_v43 }
 0x40f   :  { %10633 = vmatprep.mubr.msk.f32.mxu0 %vm10994_vm1, %v10993_v50  ;;  %10641 = vmatprep.subr.mxu0 %v10993_v50  ;;  %v7802_v7 = vand.u32 4294901760, %v7801_v20  ;;  %v8179_v26 = vsel %vm1795_vm2, %v5481_v25, 0 }
 0x410   :  { %10658 = vmatprep.mubr.msk.f32.mxu1 %vm10994_vm1, %v10993_v50  ;;  %10666 = vmatprep.subr.mxu1 %v10993_v50  ;;  %v11848_v1 = vand.u32 4294901760, %v8179_v26 }
 0x411   :  { %10634 = vmatmul.mubr.f32.vlgmr.msra.gmra.mxu0 %v7350_v16  ;;  %10659 = vmatmul.mubr.f32.vlgmr.msra.gmra.mxu1 %v7798_v40 }
 0x412   :  { %10642 = vmatpush3.msra.mxu0 %v7392_v47  ;;  %10667 = vmatpush3.msra.mxu1 %v7763_v13  ;;  %v11853_v27 = vsub.f32 %v8179_v26, %v11848_v1 }
 0x413   :  { %10643 = vmatprep.mubr.msk.f32.mxu0 %vm10994_vm1, %v10993_v50  ;;  %10651 = vmatprep.subr.mxu0 %v10993_v50 }
 0x414   :  { %10668 = vmatprep.mubr.msk.f32.mxu1 %vm10994_vm1, %v10993_v50  ;;  %10676 = vmatprep.subr.mxu1 %v10993_v50  ;;  %v8249_v29 = vand.u32 4294901760, %v11853_v27 }
 0x415   :  { %10644 = vmatmul.mubr.f32.vlgmr.msra.gmra.mxu0 %v7349_v9  ;;  %10669 = vmatmul.mubr.f32.vlgmr.msra.gmra.mxu1 %v7800_v46 }
 0x416   :  { %10652 = vmatpush3.msra.mxu0 %v7763_v13  ;;  %10677 = vmatpush3.msra.mxu1 %v7763_v13  ;;  %v8250_v31 = vsub.f32 %v11853_v27, %v8249_v29  ;;  %v8740_v13 = vsub.f32 %v11866_v10, %v8739_v60 }
 0x417   :  { %10653 = vmatprep.mubr.msk.f32.mxu0 %vm10994_vm1, %v10993_v50  ;;  %10661 = vmatprep.subr.mxu0 %v10993_v50 }
 0x418   :  { %10678 = vmatprep.mubr.msk.f32.mxu1 %vm10994_vm1, %v10993_v50  ;;  %10686 = vmatprep.subr.mxu1 %v10993_v50  ;;  %v8251_v42 = vand.u32 4294901760, %v8250_v31 }
 0x419   :  { %10654 = vmatmul.mubr.f32.vlgmr.msra.gmra.mxu0 %v7802_v7  ;;  %10679 = vmatmul.mubr.f32.vlgmr.msra.gmra.mxu1 %v7798_v40 }
 0x41a   :  { %10662 = vmatpush3.msra.mxu0 %v7840_v23  ;;  %10663 = vmatprep.mubr.msk.f32.mxu0 %vm10994_vm1, %v10993_v50 }
 0x41b   :  { %10671 = vmatprep.subr.mxu0 %v10993_v50  ;;  %10688 = vmatprep.mubr.msk.f32.mxu1 %vm10994_vm1, %v10993_v50 }
 0x41d   :  { %10664 = vmatmul.mubr.f32.vlgmr.msra.gmra.mxu0 %v7799_v6 }
 0x41e   :  { %10672 = vmatpush3.msra.mxu0 %v7841_v17  ;;  %10673 = vmatprep.mubr.msk.f32.mxu0 %vm10994_vm1, %v10993_v50  ;;  %v8741_v17 = vand.u32 4294901760, %v8740_v13 }
 0x41f   :  { %10681 = vmatprep.subr.mxu0 %v10993_v50 }
 0x421   :  { %10674 = vmatmul.mubr.f32.vlgmr.msra.gmra.mxu0 %v7798_v40 }
 0x422   :  { %10683 = vmatprep.mubr.msk.f32.mxu0 %vm10994_vm1, %v10993_v50 }
 0x427   :  { %v5635_v28 = vpop.f32.mrf.mxu1 }
 0x429   :  { %v10510_v14 = vpop.f32.mrf.mxu1 }
 0x42a   :  { %v5467_v12 = vpop.xlane.xlu1 %5466 }
 0x42b   :  { %10852 = vrcp.f32 %v5467_v12  ;;  %v5783_v30 = vpop.f32.mrf.mxu1 }
 0x42d   :  { %v10520_v32 = vpop.f32.mrf.mxu1 }
 0x42e   :  { %v1790_v36 = vpop.permute.xlu1 %1789 }
 0x42f   :  { %v8212_v34 = vand.u32 4294901760, %v1790_v36  ;;  %v5559_v35 = vpop.f32.mrf.mxu0  ;;  %v5929_v37 = vpop.f32.mrf.mxu1 }
 0x430   :  { %v5636_v39 = vadd.f32 %v5635_v28, %v5559_v35 }
 0x431   :  { %v8289_v38 = vsub.f32 %v1790_v36, %v8212_v34  ;;  %v10505_v2 = vpop.f32.mrf.mxu0  ;;  %v10530_v45 = vpop.f32.mrf.mxu1  ;;  %10682 = vmatpush3.msra.mxu0 %v8212_v34 }
 0x432   :  { %10684 = vmatmul.mubr.f32.vlgmr.msra.gmra.mxu0 %v8251_v42  ;;  %10691 = vmatprep.subr.mxu0 %v10993_v50 }
 0x433   :  { %v8290_v48 = vand.u32 4294901760, %v8289_v38  ;;  %v5709_v49 = vpop.f32.mrf.mxu0  ;;  %v6084_v41 = vpop.f32.mrf.mxu1  ;;  %10692 = vmatpush3.msra.mxu0 %v8289_v38  ;;  %10693 = vmatprep.mubr.msk.f32.mxu0 %vm10994_vm1, %v10993_v50 }
 0x434   :  { %v5710_v51 = vadd.f32 %v5709_v49, %v5636_v39  ;;  %10701 = vmatprep.subr.mxu0 %v10993_v50 }
 0x435   :  { %v8291_v52 = vsub.f32 %v8289_v38, %v8290_v48  ;;  %v10515_v53 = vpop.f32.mrf.mxu0  ;;  %v10540_v54 = vpop.f32.mrf.mxu1 }
 0x436   :  { %10694 = vmatmul.mubr.f32.vlgmr.msra.gmra.mxu0 %v11853_v27  ;;  %v5784_v55 = vadd.f32 %v5783_v30, %v5710_v51 }
 0x437   :  { %v8292_v56 = vand.u32 4294901760, %v8291_v52  ;;  %10702 = vmatpush3.msra.mxu0 %v8290_v48  ;;  %v5857_v22 = vpop.f32.mrf.mxu0  ;;  %10703 = vmatprep.mubr.msk.f32.mxu0 %vm10994_vm1, %v10993_v50 }
 0x438   :  { %v10853_v57 = vpop.eup %10852  ;;  %v5858_v58 = vadd.f32 %v5857_v22, %v5784_v55  ;;  %v6232_v47 = vpop.f32.mrf.mxu1  ;;  %10711 = vmatprep.subr.mxu0 %v10993_v50 }
 0x439   :  { %v5483_v61 = vmul.f32 %v10853_v57, %v11762_v21  ;;  %v10525_v62 = vpop.f32.mrf.mxu0  ;;  %10687 = vmatpush3.msra.mxu1 %v8292_v56 }
 0x43a   :  { %v11874_v0 = vadd.f32 %v5929_v37, %v5858_v58  ;;  %v10550_v4 = vpop.f32.mrf.mxu1  ;;  %10689 = vmatmul.mubr.f32.vlgmr.msra.gmra.mxu1 %v11848_v1  ;;  %10696 = vmatprep.subr.mxu1 %v10993_v50 }
 0x43b   :  { %10704 = vmatmul.mubr.f32.vlgmr.msra.gmra.mxu0 %v11848_v1  ;;  %v6008_v8 = vpop.f32.mrf.mxu0  ;;  %10697 = vmatpush3.msra.mxu1 %v8212_v34  ;;  %v8628_v5 = vsel %vm1795_vm2, %v5483_v61, 0 }
 0x43c   :  { %10712 = vmatpush3.msra.mxu0 %v11859_v44  ;;  %v6085_v11 = vadd.f32 %v6084_v41, %v6008_v8  ;;  %v6378_v9 = vpop.f32.mrf.mxu1  ;;  %10698 = vmatprep.mubr.msk.f32.mxu1 %vm10994_vm1, %v10993_v50  ;;  %v8696_v21 = vand.u32 4294901760, %v8628_v5 }
 0x43d   :  { %v10535_v15 = vpop.f32.mrf.mxu0  ;;  %10706 = vmatprep.subr.mxu1 %v10993_v50  ;;  %10713 = vmatprep.mubr.msk.f32.mxu0 %vm10994_vm1, %v10993_v50 }
 0x43e   :  { %v10560_v16 = vpop.f32.mrf.mxu1  ;;  %10699 = vmatmul.mubr.f32.vlgmr.msra.gmra.mxu1 %v8249_v29  ;;  %10721 = vmatprep.subr.mxu0 %v10993_v50  ;;  %v8697_v23 = vsub.f32 %v8628_v5, %v8696_v21 }
 0x43f   :  { %10707 = vmatpush3.msra.mxu1 %v8212_v34  ;;  %v6158_v59 = vpop.f32.mrf.mxu0  ;;  %10708 = vmatprep.mubr.msk.f32.mxu1 %vm10994_vm1, %v10993_v50 }
 0x440   :  { %v6159_v63 = vadd.f32 %v6158_v59, %v6085_v11  ;;  %10716 = vmatprep.subr.mxu1 %v10993_v50  ;;  %v8698_v40 = vand.u32 4294901760, %v8697_v23 }
 0x441   :  { %v10545_v18 = vpop.f32.mrf.mxu0 }
 0x442   :  { %10709 = vmatmul.mubr.f32.vlgmr.msra.gmra.mxu1 %v11848_v1  ;;  %v6233_v3 = vadd.f32 %v6232_v47, %v6159_v63  ;;  %v8699_v19 = vsub.f32 %v8697_v23, %v8698_v40 }
 0x443   :  { %10717 = vmatpush3.msra.mxu1 %v8741_v17  ;;  %v6306_v6 = vpop.f32.mrf.mxu0  ;;  %10718 = vmatprep.mubr.msk.f32.mxu1 %vm10994_vm1, %v10993_v50 }
 0x444   :  { %v6307_v43 = vadd.f32 %v6306_v6, %v6233_v3  ;;  %10726 = vmatprep.subr.mxu1 %v10993_v50  ;;  %v8700_v46 = vand.u32 4294901760, %v8699_v19 }
 0x445   :  { %v10555_v20 = vpop.f32.mrf.mxu0 }
 0x446   :  { %v11897_v24 = vadd.f32 %v6378_v9, %v6307_v43  ;;  %10714 = vmatmul.mubr.f32.vlgmr.msra.gmra.mxu0 %v8700_v46  ;;  %10719 = vmatmul.mubr.f32.vlgmr.msra.gmra.mxu1 %v8696_v21 }
 0x447   :  { %10722 = vmatpush3.msra.mxu0 %v11866_v10  ;;  %10727 = vmatpush3.msra.mxu1 %v11859_v44 }
 0x448   :  { %10723 = vmatprep.mubr.msk.f32.mxu0 %vm10994_vm1, %v10993_v50  ;;  %10728 = vmatprep.mubr.msk.f32.mxu1 %vm10994_vm1, %v10993_v50 }
 0x449   :  { %10731 = vmatprep.subr.mxu0 %v10993_v50  ;;  %10736 = vmatprep.subr.mxu1 %v10993_v50 }
 0x44a   :  { %10724 = vmatmul.mubr.f32.vlgmr.msra.gmra.mxu0 %v8697_v23  ;;  %10729 = vmatmul.mubr.f32.vlgmr.msra.gmra.mxu1 %v8698_v40 }
 0x44b   :  { %10732 = vmatpush3.msra.mxu0 %v8739_v60  ;;  %10737 = vmatpush3.msra.mxu1 %v11859_v44 }
 0x44c   :  { %10733 = vmatprep.mubr.msk.f32.mxu0 %vm10994_vm1, %v10993_v50  ;;  %10738 = vmatprep.mubr.msk.f32.mxu1 %vm10994_vm1, %v10993_v50 }
 0x44e   :  { %10734 = vmatmul.mubr.f32.vlgmr.msra.gmra.mxu0 %v8696_v21  ;;  %10739 = vmatmul.mubr.f32.vlgmr.msra.gmra.mxu1 %v8696_v21 }
 0x498   :  { %v6457_v7 = vpop.f32.mrf.mxu0  ;;  %v6533_v25 = vpop.f32.mrf.mxu1 }
 0x499   :  { %v6534_v27 = vadd.f32 %v6533_v25, %v6457_v7 }
 0x49a   :  { %v10565_v26 = vpop.f32.mrf.mxu0  ;;  %v10570_v1 = vpop.f32.mrf.mxu1 }
 0x49c   :  { %v6607_v28 = vpop.f32.mrf.mxu0 }
 0x49d   :  { %v6608_v29 = vadd.f32 %v6607_v28, %v6534_v27  ;;  %v6681_v14 = vpop.f32.mrf.mxu1 }
 0x49e   :  { %v10575_v12 = vpop.f32.mrf.mxu0 }
 0x49f   :  { %v6682_v30 = vadd.f32 %v6681_v14, %v6608_v29  ;;  %v10580_v31 = vpop.f32.mrf.mxu1 }
 0x4a0   :  { %v6755_v32 = vpop.f32.mrf.mxu0  ;;  %v9111_v31 = vld [vmem:[#allocation10 + $0x18] sm:$0xff] }
 0x4a1   :  { %v6756_v33 = vadd.f32 %v6755_v32, %v6682_v30  ;;  %v6827_v36 = vpop.f32.mrf.mxu1  ;;  %v11914_v32 = vand.u32 4294901760, %v9111_v31 }
 0x4a2   :  { %v10585_v34 = vpop.f32.mrf.mxu0 }
 0x4a3   :  { %v6828_v35 = vadd.f32 %v6827_v36, %v6756_v33  ;;  %v10590_v37 = vpop.f32.mrf.mxu1  ;;  %v9110_v36 = vld [vmem:[#allocation10 + $0x10] sm:$0xff]  ;;  %10741 = vmatprep.subr.mxu0 %v11914_v32 }
 0x4a4   :  { %v6906_v50 = vpop.f32.mrf.mxu0  ;;  %v11917_v37 = vsub.f32 %v9111_v31, %v11914_v32  ;;  %10742 = vmatpush3.msra.mxu0 %v11914_v32 }
 0x4a5   :  { %v6982_v39 = vpop.f32.mrf.mxu1  ;;  %9078 = vrot.lane.b32.xlu0 %v6828_v35, %s10989_s15 }
 0x4a6   :  { %v10595_v42 = vpop.f32.mrf.mxu0  ;;  %v6983_v44 = vadd.f32 %v6982_v39, %v6906_v50  ;;  %v11919_v50 = vand.u32 4294901760, %v9110_v36 }
 0x4a7   :  { %v10600_v38 = vpop.f32.mrf.mxu1  ;;  %v9109_v42 = vld [vmem:[#allocation10 + $0x8] sm:$0xff] }
 0x4a8   :  { %v7056_v2 = vpop.f32.mrf.mxu0  ;;  %10743 = vmatprep.subr.mxu0 %v11919_v50 }
 0x4a9   :  { %v7057_v45 = vadd.f32 %v7056_v2, %v6983_v44  ;;  %v7130_v48 = vpop.f32.mrf.mxu1  ;;  %v11924_v2 = vand.u32 4294901760, %v11917_v37  ;;  %10744 = vmatpush3.msra.mxu0 %v11919_v50 }
 0x4aa   :  { %v10605_v49 = vpop.f32.mrf.mxu0 }
 0x4ab   :  { %v7131_v41 = vadd.f32 %v7130_v48, %v7057_v45  ;;  %v10610_v51 = vpop.f32.mrf.mxu1  ;;  %v11927_v45 = vsub.f32 %v9110_v36, %v11919_v50  ;;  %v11929_v48 = vand.u32 4294901760, %v9109_v42 }
 0x4ac   :  { %v7204_v10 = vpop.f32.mrf.mxu0 }
 0x4ad   :  { %v7205_v52 = vadd.f32 %v7204_v10, %v7131_v41  ;;  %v7276_v53 = vpop.f32.mrf.mxu1  ;;  %v9108_v41 = vld [vmem:[#allocation10] sm:$0xff]  ;;  %v9242_v10 = vsub.f32 %v11917_v37, %v11924_v2  ;;  %10745 = vmatprep.subr.mxu0 %v11929_v48 }
 0x4ae   :  { %v10615_v54 = vpop.f32.mrf.mxu0  ;;  %10746 = vmatpush3.msra.mxu0 %v11929_v48 }
 0x4af   :  { %v7277_v55 = vadd.f32 %v7276_v53, %v7205_v52  ;;  %v10620_v56 = vpop.f32.mrf.mxu1  ;;  %v11936_v52 = vand.u32 4294901760, %v11927_v45  ;;  %v11939_v53 = vsub.f32 %v9109_v42, %v11929_v48 }
 0x4b1   :  { %9080 = vrot.lane.b32.xlu1 %v7277_v55, %s10989_s15  ;;  %v11942_v55 = vand.u32 4294901760, %v9108_v41 }
 0x4b3   :  { %10747 = vmatprep.subr.mxu0 %v11942_v55 }
 0x4b4   :  { %10748 = vmatpush3.msra.mxu0 %v11942_v55 }
 0x4b5   :  { %10763 = vmatprep.subr.mxu0 %v11917_v37 }
 0x4c5   :  { %v7431_v22 = vpop.f32.mrf.mxu1 }
 0x4c7   :  { %v10630_v57 = vpop.f32.mrf.mxu1 }
 0x4c8   :  { %v9249_v57 = vsub.f32 %v11927_v45, %v11936_v52 }
 0x4c9   :  { %v7579_v58 = vpop.f32.mrf.mxu1 }
 0x4cb   :  { %v10640_v47 = vpop.f32.mrf.mxu1 }
 0x4cd   :  { %v7355_v60 = vpop.f32.mrf.mxu0  ;;  %v7725_v61 = vpop.f32.mrf.mxu1 }
 0x4ce   :  { %v7432_v8 = vadd.f32 %v7431_v22, %v7355_v60  ;;  %v9243_v22 = vand.u32 4294901760, %v9242_v10  ;;  %v11951_v60 = vsub.f32 %v9108_v41, %v11942_v55 }
 0x4cf   :  { %v10625_v62 = vpop.f32.mrf.mxu0  ;;  %v10650_v4 = vpop.f32.mrf.mxu1 }
 0x4d0   :  { %10752 = vmatprep.subr.mxu1 %v9243_v22  ;;  %v9250_v62 = vand.u32 4294901760, %v9249_v57 }
 0x4d1   :  { %v7505_v5 = vpop.f32.mrf.mxu0  ;;  %v7880_v11 = vpop.f32.mrf.mxu1  ;;  %10753 = vmatpush3.msra.mxu1 %v9243_v22 }
 0x4d2   :  { %v7506_v9 = vadd.f32 %v7505_v5, %v7432_v8  ;;  %v11958_v5 = vand.u32 4294901760, %v11951_v60  ;;  %10754 = vmatprep.subr.mxu1 %v9250_v62 }
 0x4d3   :  { %v10635_v21 = vpop.f32.mrf.mxu0  ;;  %v10660_v13 = vpop.f32.mrf.mxu1  ;;  %10755 = vmatpush3.msra.mxu1 %v9250_v62 }
 0x4d4   :  { %v7580_v15 = vadd.f32 %v7579_v58, %v7506_v9  ;;  %v11948_v58 = vand.u32 4294901760, %v11939_v53  ;;  %v9263_v13 = vsub.f32 %v11951_v60, %v11958_v5 }
 0x4d5   :  { %v7653_v16 = vpop.f32.mrf.mxu0  ;;  %v8028_v23 = vpop.f32.mrf.mxu1 }
 0x4d6   :  { %v7654_v59 = vadd.f32 %v7653_v16, %v7580_v15  ;;  %v9256_v4 = vsub.f32 %v11939_v53, %v11948_v58 }
 0x4d7   :  { %v10645_v63 = vpop.f32.mrf.mxu0  ;;  %v10670_v40 = vpop.f32.mrf.mxu1 }
 0x4d8   :  { %v7726_v17 = vadd.f32 %v7725_v61, %v7654_v59 }
 0x4d9   :  { %v7804_v18 = vpop.f32.mrf.mxu0  ;;  %v8174_v3 = vpop.f32.mrf.mxu1 }
 0x4da   :  { %9086 = vrot.lane.b32.xlu0 %v7726_v17, %s10998_s4  ;;  %v7881_v43 = vadd.f32 %v7880_v11, %v7804_v18  ;;  %v9257_v11 = vand.u32 4294901760, %v9256_v4 }
 0x4db   :  { %v10655_v19 = vpop.f32.mrf.mxu0  ;;  %v10680_v6 = vpop.f32.mrf.mxu1 }
 0x4dc   :  { %10756 = vmatprep.subr.mxu1 %v9257_v11 }
 0x4dd   :  { %v7954_v46 = vpop.f32.mrf.mxu0  ;;  %10757 = vmatpush3.msra.mxu1 %v9257_v11 }
 0x4de   :  { %v7955_v20 = vadd.f32 %v7954_v46, %v7881_v43 }
 0x4df   :  { %v10665_v7 = vpop.f32.mrf.mxu0 }
 0x4e0   :  { %v8029_v25 = vadd.f32 %v8028_v23, %v7955_v20  ;;  %v9264_v23 = vand.u32 4294901760, %v9263_v13 }
 0x4e1   :  { %v8102_v26 = vpop.f32.mrf.mxu0 }
 0x4e2   :  { %v8103_v1 = vadd.f32 %v8102_v26, %v8029_v25  ;;  %10758 = vmatprep.subr.mxu1 %v9264_v23 }
 0x4e3   :  { %v10675_v27 = vpop.f32.mrf.mxu0  ;;  %10759 = vmatpush3.msra.mxu1 %v9264_v23 }
 0x4e4   :  { %v8175_v28 = vadd.f32 %v8174_v3, %v8103_v1  ;;  %10774 = vmatprep.subr.mxu1 %v11914_v32 }
 0x4e6   :  { %9088 = vrot.lane.b32.xlu1 %v8175_v28, %s10998_s4 }
 0x4f2   :  { %v8253_v29 = vpop.f32.mrf.mxu0 }
 0x4f4   :  { %v10685_v14 = vpop.f32.mrf.mxu0 }
 0x4f6   :  { %v8403_v12 = vpop.f32.mrf.mxu0 }
 0x4f8   :  { %v10695_v30 = vpop.f32.mrf.mxu0 }
 0x4fa   :  { %v8329_v33 = vpop.f32.mrf.mxu1 }
 0x4fb   :  { %v8330_v34 = vadd.f32 %v8329_v33, %v8253_v29  ;;  %v8551_v35 = vpop.f32.mrf.mxu0 }
 0x4fc   :  { %v10690_v39 = vpop.f32.mrf.mxu1 }
 0x4fd   :  { %v10705_v44 = vpop.f32.mrf.mxu0  ;;  %v8404_v38 = vadd.f32 %v8403_v12, %v8330_v34 }
 0x4fe   :  { %v8477_v49 = vpop.f32.mrf.mxu1 }
 0x4ff   :  { %v8478_v51 = vadd.f32 %v8477_v49, %v8404_v38 }
 0x500   :  { %v10700_v54 = vpop.f32.mrf.mxu1 }
 0x501   :  { %v8552_v56 = vadd.f32 %v8551_v35, %v8478_v51 }
 0x502   :  { %v8623_v47 = vpop.f32.mrf.mxu1 }
 0x503   :  { %v8624_v61 = vadd.f32 %v8623_v47, %v8552_v56 }
 0x504   :  { %v10710_v8 = vpop.f32.mrf.mxu1 }
 0x505   :  { %9094 = vrot.lane.b32.xlu0 %v8624_v61, %s10999_s21 }
 0x506   :  { %v8702_v9 = vpop.f32.mrf.mxu0  ;;  %v8778_v21 = vpop.f32.mrf.mxu1 }
 0x507   :  { %v8779_v59 = vadd.f32 %v8778_v21, %v8702_v9 }
 0x508   :  { %v10715_v15 = vpop.f32.mrf.mxu0  ;;  %v10720_v16 = vpop.f32.mrf.mxu1 }
 0x50a   :  { %v8852_v63 = vpop.f32.mrf.mxu0  ;;  %v8926_v40 = vpop.f32.mrf.mxu1 }
 0x50b   :  { %v8853_v17 = vadd.f32 %v8852_v63, %v8779_v59 }
 0x50c   :  { %v10725_v18 = vpop.f32.mrf.mxu0  ;;  %v10730_v3 = vpop.f32.mrf.mxu1 }
 0x50d   :  { %v8927_v19 = vadd.f32 %v8926_v40, %v8853_v17 }
 0x50e   :  { %v9000_v6 = vpop.f32.mrf.mxu0  ;;  %v9072_v43 = vpop.f32.mrf.mxu1 }
 0x50f   :  { %v9001_v46 = vadd.f32 %v9000_v6, %v8927_v19 }
 0x510   :  { %v10735_v20 = vpop.f32.mrf.mxu0  ;;  %v10740_v7 = vpop.f32.mrf.mxu1 }
 0x511   :  { %v9073_v25 = vadd.f32 %v9072_v43, %v9001_v46 }
 0x513   :  { %9096 = vrot.lane.b32.xlu1 %v9073_v25, %s10999_s21 }
 0x517   :  { %v9079_v26 = vpop.permute.xlu0 %9078 }
 0x518   :  { %v9100_v27 = vsel %vm1795_vm2, %v11874_v0, %v9079_v26 }
 0x523   :  { %v9081_v33 = vpop.permute.xlu1 %9080 }
 0x524   :  { %v9101_v42 = vsel %vm1795_vm2, %v11897_v24, %v9081_v33 }
 0x54c   :  { %v9087_v1 = vpop.permute.xlu0 %9086 }
 0x54d   :  { %v9103_v28 = vsel %vm9102_vm3, %v9100_v27, %v9087_v1 }
 0x558   :  { %v9089_v35 = vpop.permute.xlu1 %9088 }
 0x559   :  { %v9104_v0 = vsel %vm9102_vm3, %v9101_v42, %v9089_v35 }
 0x577   :  { %v9095_v29 = vpop.permute.xlu0 %9094 }
 0x578   :  { %v9106_v14 = vsel %vm9105_vm4, %v9103_v28, %v9095_v29  ;;  %v9725_v29 = vld [vmem:[%s12032_s7] ss:$0 sm:$0xff] }
 0x579   :  { %v9120_v12 = vsel %vm118_vm0, %v9106_v14, 0 }
 0x57a   :  { %v9194_v30 = vand.u32 4294901760, %v9120_v12 }
 0x57c   :  { %v9195_v31 = vsub.f32 %v9120_v12, %v9194_v30  ;;  %10760 = vmatprep.mubr.f32.mxu1 %v9194_v30  ;;  %v9726_v12 = vld [vmem:[%s12033_s8] ss:$0 sm:$0xff] }
 0x57e   :  { %v9196_v36 = vand.u32 4294901760, %v9195_v31 }
 0x580   :  { %v9197_v34 = vsub.f32 %v9195_v31, %v9196_v36 }
 0x582   :  { %v9198_v39 = vand.u32 4294901760, %v9197_v34 }
 0x584   :  { %10749 = vmatprep.mubr.f32.mxu0 %v9198_v39 }
 0x585   :  { %v9097_v44 = vpop.permute.xlu1 %9096 }
 0x586   :  { %v9107_v38 = vsel %vm9105_vm4, %v9104_v0, %v9097_v44 }
 0x587   :  { %v9123_v49 = vsel %vm118_vm0, %v9107_v38, 0 }
 0x588   :  { %v9204_v41 = vand.u32 4294901760, %v9123_v49 }
 0x58a   :  { %v9205_v51 = vsub.f32 %v9123_v49, %v9204_v41  ;;  %10761 = vmatmul.mubr.f32.vlgmr.msra.gmra.mxu1 %v9204_v41 }
 0x58b   :  { %10775 = vmatpush3.msra.mxu1 %v11914_v32  ;;  %10782 = vmatprep.mubr.f32.mxu1 %v9196_v36 }
 0x58c   :  { %v9206_v10 = vand.u32 4294901760, %v9205_v51  ;;  %10776 = vmatprep.subr.mxu1 %v11919_v50 }
 0x58d   :  { %10777 = vmatpush3.msra.mxu1 %v11919_v50 }
 0x58e   :  { %v9207_v24 = vsub.f32 %v9205_v51, %v9206_v10  ;;  %10778 = vmatprep.subr.mxu1 %v11929_v48 }
 0x58f   :  { %10779 = vmatpush3.msra.mxu1 %v11929_v48 }
 0x590   :  { %v9208_v54 = vand.u32 4294901760, %v9207_v24  ;;  %10780 = vmatprep.subr.mxu1 %v11942_v55 }
 0x591   :  { %10781 = vmatpush3.msra.mxu1 %v11942_v55 }
 0x592   :  { %10783 = vmatmul.mubr.f32.vlgmr.msra.gmra.mxu1 %v9206_v10  ;;  %10796 = vmatprep.subr.mxu1 %v11914_v32 }
 0x593   :  { %10750 = vmatmul.mubr.f32.vlgmr.msra.gmra.mxu0 %v9208_v54  ;;  %10797 = vmatpush3.msra.mxu1 %v11914_v32 }
 0x594   :  { %10764 = vmatpush3.msra.mxu0 %v11917_v37  ;;  %10804 = vmatprep.mubr.f32.mxu1 %v9194_v30  ;;  %v9724_v37 = vld [vmem:[%s12031_s6] ss:$0 sm:$0xff] }
 0x595   :  { %10765 = vmatprep.subr.mxu0 %v11927_v45  ;;  %10771 = vmatprep.mubr.f32.mxu0 %v9195_v31 }
 0x596   :  { %10798 = vmatprep.subr.mxu1 %v11919_v50  ;;  %10766 = vmatpush3.msra.mxu0 %v11927_v45 }
 0x597   :  { %10799 = vmatpush3.msra.mxu1 %v11919_v50  ;;  %10767 = vmatprep.subr.mxu0 %v11939_v53 }
 0x598   :  { %10800 = vmatprep.subr.mxu1 %v11929_v48  ;;  %10768 = vmatpush3.msra.mxu0 %v11939_v53 }
 0x599   :  { %10801 = vmatpush3.msra.mxu1 %v11929_v48  ;;  %10769 = vmatprep.subr.mxu0 %v11951_v60 }
 0x59a   :  { %10802 = vmatprep.subr.mxu1 %v11942_v55  ;;  %10770 = vmatpush3.msra.mxu0 %v11951_v60 }
 0x59b   :  { %10803 = vmatpush3.msra.mxu1 %v11942_v55  ;;  %10772 = vmatmul.mubr.f32.vlgmr.msra.gmra.mxu0 %v9205_v51 }
 0x59c   :  { %10785 = vmatprep.subr.mxu0 %v11924_v2  ;;  %10805 = vmatmul.mubr.f32.vlgmr.msra.gmra.mxu1 %v9204_v41 }
 0x59d   :  { %10786 = vmatpush3.msra.mxu0 %v11924_v2  ;;  %10793 = vmatprep.mubr.f32.mxu0 %v9194_v30 }
 0x59e   :  { %10787 = vmatprep.subr.mxu0 %v11936_v52 }
 0x59f   :  { %10788 = vmatpush3.msra.mxu0 %v11936_v52 }
 0x5a0   :  { %10789 = vmatprep.subr.mxu0 %v11948_v58 }
 0x5a1   :  { %10790 = vmatpush3.msra.mxu0 %v11948_v58 }
 0x5a2   :  { %10791 = vmatprep.subr.mxu0 %v11958_v5 }
 0x5a3   :  { %10792 = vmatpush3.msra.mxu0 %v11958_v5 }
 0x5a4   :  { %10794 = vmatmul.mubr.f32.vlgmr.msra.gmra.mxu0 %v9204_v41 }
 0x64a   :  { %v10762_v50 = vpop.f32.mrf.mxu1 }
 0x64c   :  { %v9301_v52 = vpop.f32.mrf.mxu1 }
 0x652   :  { %v10784_v56 = vpop.f32.mrf.mxu1 }
 0x653   :  { %v10751_v32 = vpop.f32.mrf.mxu0 }
 0x654   :  { %v9211_v45 = vadd.f32 %v10751_v32, %v9724_v37  ;;  %v9471_v60 = vpop.f32.mrf.mxu1 }
 0x655   :  { %v9200_v2 = vpop.f32.mrf.mxu0 }
 0x656   :  { %v9201_v48 = vadd.f32 %v9724_v37, %v9200_v2  ;;  %v9308_v55 = vadd.f32 %v10762_v50, %v9211_v45 }
 0x658   :  { %v9302_v58 = vadd.f32 %v9301_v52, %v9201_v48 }
 0x65b   :  { %v10773_v53 = vpop.f32.mrf.mxu0 }
 0x65c   :  { %v9395_v57 = vadd.f32 %v10773_v53, %v9308_v55  ;;  %v10806_v62 = vpop.f32.mrf.mxu1 }
 0x65d   :  { %v9387_v22 = vpop.f32.mrf.mxu0 }
 0x65e   :  { %v9388_v47 = vadd.f32 %v9387_v22, %v9302_v58  ;;  %v9480_v61 = vadd.f32 %v10784_v56, %v9395_v57  ;;  %v9643_v13 = vpop.f32.mrf.mxu1 }
 0x660   :  { %v9472_v5 = vadd.f32 %v9471_v60, %v9388_v47 }
 0x664   :  { %v10795_v4 = vpop.f32.mrf.mxu0 }
 0x665   :  { %v9569_v8 = vadd.f32 %v10795_v4, %v9480_v61 }
 0x666   :  { %v9562_v11 = vpop.f32.mrf.mxu0 }
 0x667   :  { %v9563_v9 = vadd.f32 %v9562_v11, %v9472_v5  ;;  %v9650_v21 = vadd.f32 %v10806_v62, %v9569_v8 }
 0x669   :  { %v9656_v15 = vsel %vm118_vm0, %v9650_v21, 0.0  ;;  %v9644_v16 = vadd.f32 %v9643_v13, %v9563_v9 }
 0x66a   :  { %9657 = vadd.xlane.f32.xlu1 %v9656_v15 }
 0x66b   :  { %v9653_v23 = vsel %vm118_vm0, %v9644_v16, 0.0 }
 0x66c   :  { %9654 = vadd.xlane.f32.xlu0 %v9653_v23 }
 0x6f3   :  { %v9658_v59 = vpop.xlane.xlu1 %9657 }
 0x6f4   :  { %v9661_v63 = vmul.f32 0.03125, %v9658_v59 }
 0x6f5   :  { %v9655_v40 = vpop.xlane.xlu0 %9654 }
 0x6f6   :  { %v9660_v17 = vmul.f32 0.03125, %v9655_v40  ;;  %v9663_v18 = vsub.f32 %v9650_v21, %v9661_v63 }
 0x6f8   :  { %v9662_v3 = vsub.f32 %v9644_v16, %v9660_v17  ;;  %v9665_v43 = vmul.f32 %v9663_v18, %v9663_v18 }
 0x6fa   :  { %v9664_v19 = vmul.f32 %v9662_v3, %v9662_v3  ;;  %v9669_v46 = vsel %vm118_vm0, %v9665_v43, 0.0 }
 0x6fc   :  { %v9666_v6 = vsel %vm118_vm0, %v9664_v19, 0.0 }
 0x6fd   :  { %9667 = vadd.xlane.f32.xlu0 %v9666_v6 }
 0x701   :  { %9670 = vadd.xlane.f32.xlu0 %v9669_v46 }
 0x786   :  { %v9668_v20 = vpop.xlane.xlu0 %9667 }
 0x787   :  { %v9672_v7 = vmul.f32 0.03125, %v9668_v20 }
 0x789   :  { %v9674_v25 = vadd.f32 1e-05, %v9672_v7 }
 0x78a   :  { %v9671_v26 = vpop.xlane.xlu0 %9670 }
 0x78b   :  { %10854 = vrsqrt.f32 %v9674_v25  ;;  %v9673_v1 = vmul.f32 0.03125, %v9671_v26 }
 0x78d   :  { %v9675_v27 = vadd.f32 1e-05, %v9673_v1 }
 0x78f   :  { %10856 = vrsqrt.f32 %v9675_v27 }
 0x798   :  { %v10855_v28 = vpop.eup %10854 }
 0x799   :  { %v9678_v14 = vmul.f32 %v10855_v28, %v9662_v3 }
 0x79b   :  { %v9687_v30 = vmul.f32 %v9725_v29, %v9678_v14 }
 0x79c   :  { %v10857_v31 = vpop.eup %10856 }
 0x79d   :  { %v9679_v33 = vmul.f32 %v10857_v31, %v9663_v18  ;;  %v9696_v36 = vadd.f32 %v9726_v12, %v9687_v30 }
 0x79f   :  { %v9688_v34 = vmul.f32 %v9725_v29, %v9679_v33  ;;  %9698 = vst.msk [vmem:[#allocation11] sm:$0xff] %vm118_vm0, %v9696_v36 }
 0x7a1   :  { %v9697_v35 = vadd.f32 %v9726_v12, %v9688_v34 }
 0x7a3   :  { %9699 = vst.msk [vmem:[#allocation11 + $0x8] sm:$0xff] %vm118_vm0, %v9697_v35 }
 0x7a4   :  { %10969 = shalt.err (!%p10966_p1)
}
 0x7a5   :  { %9711 = dma.vmem_to_hbm [thread:$0]  %s9706_s3, 256, %s12034_s9, [#allocation4], %s10988_s14, %s10988_s14, %s10989_s15  }
 0x7a6   :  { %10984 = dma.done.wait [#allocation4], 256  }
 0x7a7   :  { %10985 = vsyncadd [#allocation4], 4294967040 }
 0x7a8   :  { %9715 = vsyncpa [#allocation3], 1 }
 0x7a9   :  { %9716 = vsyncpa [#allocation6], 1 }
 0x7aa   :  { %9717 = vsyncpa [#allocation9], 1 }
 0x7ab   :  { %9718 = vsyncpa [#allocation4], 1 }

</bundles_post_ra>
